<compile_context>
chip_gen: v5e
topology: v5e:2x2
jax: 0.10.0
libtpu: 0.0.40
codegen_flags: <defaults>
</compile_context>

<pallas_src>
import functools

import numpy as np
import jax
import jax.numpy as jnp
from jax import lax
from jax.experimental import pallas as pl
from jax.experimental.pallas import tpu as pltpu


def _pick_tile(n, max_tile, min_tile=128):
    """Largest tile <= max_tile that keeps >=2 grid steps when possible
    (so both v7x TensorCores get work); always a multiple of 8."""
    t = max_tile
    while t > min_tile and pl.cdiv(n, t) < 2:
        t //= 2
    return t


# --------------------------------------------------------------------------
# Kernel 1: atom-node embedding  (Linear -> SiLU -> Linear -> LayerNorm)
# --------------------------------------------------------------------------
def _embed_atm_kernel(x_ref, w1_ref, b1_ref, w2_ref, b2_ref, g_ref, beta_ref, o_ref):
    x = x_ref[...]                                                    # (tm, S) f32
    h = jnp.dot(x, w1_ref[...], preferred_element_type=jnp.float32) + b1_ref[...]
    h = h * jax.nn.sigmoid(h)                                         # SiLU
    # bf16 operands, f32 accumulate: single MXU pass (w2 is passed pre-cast to bf16)
    h = jnp.dot(h.astype(jnp.bfloat16), w2_ref[...],
                preferred_element_type=jnp.float32) + b2_ref[...]
    # LayerNorm over the feature (lane) axis
    mu = jnp.mean(h, axis=-1, keepdims=True)
    var = jnp.mean((h - mu) ** 2, axis=-1, keepdims=True)
    hn = (h - mu) * lax.rsqrt(var + 1e-5)
    o_ref[...] = (hn * g_ref[...] + beta_ref[...]).astype(o_ref.dtype)


def embed_g_node(x_atm, w1, b1, w2, b2, gamma, beta, *,
                 tile_rows_max=2048, out_dtype=jnp.bfloat16):
    n, s = x_atm.shape
    d = w1.shape[1]
    tile_rows = _pick_tile(n, tile_rows_max)
    grid = (pl.cdiv(n, tile_rows),)           # edge block masked by Pallas (no jnp.pad)
    full = lambda i: (0, 0)
    w2_bf16 = w2.astype(jnp.bfloat16)
    return pl.pallas_call(
        _embed_atm_kernel,
        out_shape=jax.ShapeDtypeStruct((n, d), out_dtype),
        grid_spec=pltpu.PrefetchScalarGridSpec(
            num_scalar_prefetch=0,
            grid=grid,
            in_specs=[
                pl.BlockSpec((tile_rows, s), lambda i: (i, 0)),
                pl.BlockSpec((s, d), full),
                pl.BlockSpec((1, d), full),
                pl.BlockSpec((d, d), full),
                pl.BlockSpec((1, d), full),
                pl.BlockSpec((1, d), full),
                pl.BlockSpec((1, d), full),
            ],
            out_specs=pl.BlockSpec((tile_rows, d), lambda i: (i, 0)),
        ),
        compiler_params=pltpu.CompilerParams(dimension_semantics=("parallel",)),
    )(x_atm, w1, b1, w2_bf16, b2, gamma, beta)


# --------------------------------------------------------------------------
# Kernels 2/3: bond Bessel basis and angle Gaussian basis (independent grids).
# When D < 128 (and 128 % D == 0), g = 128//D consecutive elements are packed
# per output row via a one-hot expansion matmul so stores stay 128-lane dense.
# At the module default D = 128 the output is naturally lane-dense (g = 1) and
# the expansion degenerates to a free lane broadcast.
# --------------------------------------------------------------------------
def _bessel_kernel(*refs, g, dim, width, block_rows, freq_scale, coef, shift):
    if g == 1:
        x_ref, o_ref = refs
    else:
        x_ref, e_ref, o_ref = refs
    xn = x_ref[...] + shift                          # (block_rows, g)   x - start + eps
    inv_n = 1.0 / xn                                 # reciprocal hoisted before expansion
    if g == 1:
        xb = jnp.broadcast_to(xn, (block_rows, width))
        inv = jnp.broadcast_to(inv_n, (block_rows, width))
    else:
        e = e_ref[...]                               # (g, g*D) one-hot selector
        xb = jnp.dot(xn, e, preferred_element_type=jnp.float32)
        inv = jnp.dot(inv_n, e, preferred_element_type=jnp.float32)
    lane = lax.broadcasted_iota(jnp.int32, (1, width), 1)
    k = lane if width == dim else lane % dim
    freq = (k.astype(jnp.float32) + 1.0) * freq_scale          # n * pi / c
    o_ref[...] = (coef * jnp.sin(freq * xb) * inv).astype(o_ref.dtype)


def _gaussian_kernel(*refs, g, dim, width, block_rows, start, step, inv_step, coef):
    if g == 1:
        x_ref, o_ref = refs
    else:
        x_ref, e_ref, o_ref = refs
    cn = jnp.cos(x_ref[...])                         # narrow cos, before expansion
    if g == 1:
        c = jnp.broadcast_to(cn, (block_rows, width))
    else:
        c = jnp.dot(cn, e_ref[...], preferred_element_type=jnp.float32)
    lane = lax.broadcasted_iota(jnp.int32, (1, width), 1)
    k = lane if width == dim else lane % dim
    mu = start + k.astype(jnp.float32) * step
    d = (c - mu) * inv_step
    o_ref[...] = (coef * jnp.exp(-(d * d))).astype(o_ref.dtype)


def _basis_embed(x, kernel_fn, *, dim, block_rows_max=2048, out_dtype=jnp.bfloat16):
    n0 = x.shape[0]
    x = x.astype(jnp.float32)
    # lane-packing factor
    if dim % 128 == 0 or 128 % dim != 0:
        g = 1
    else:
        g = 128 // dim
    width = g * dim
    if g > 1 and n0 % g:
        x = jnp.pad(x, (0, g - n0 % g))              # tiny pad, only in the D<128 packing path
    n_rows = x.shape[0] // g
    x2 = x.reshape(n_rows, g)

    block_rows = _pick_tile(n_rows, block_rows_max)
    grid = (pl.cdiv(n_rows, block_rows),)            # edge block masked by Pallas

    kernel = functools.partial(kernel_fn, g=g, dim=dim, width=width,
                               block_rows=block_rows)

    in_specs = [pl.BlockSpec((block_rows, g), lambda i: (i, 0))]
    args = [x2]
    if g > 1:
        expand = jnp.asarray(np.kron(np.eye(g, dtype=np.float32),
                                     np.ones((1, dim), dtype=np.float32)))
        in_specs.append(pl.BlockSpec((g, width), lambda i: (0, 0)))
        args.append(expand)

    out = pl.pallas_call(
        kernel,
        out_shape=jax.ShapeDtypeStruct((n_rows, width), out_dtype),
        grid_spec=pltpu.PrefetchScalarGridSpec(
            num_scalar_prefetch=0,
            grid=grid,
            in_specs=in_specs,
            out_specs=pl.BlockSpec((block_rows, width), lambda i: (i, 0)),
        ),
        compiler_params=pltpu.CompilerParams(dimension_semantics=("parallel",)),
    )(*args)
    return out.reshape(n_rows * g, dim)[:n0]


def embed_bessel(x_bnd, *, cutoff, dim, start=0.0, eps=1e-5, **kw):
    c = float(cutoff - start)
    kfn = functools.partial(_bessel_kernel,
                            freq_scale=float(np.pi / c),
                            coef=float(np.sqrt(2.0 / c)),
                            shift=float(eps - start))
    return _basis_embed(x_bnd, kfn, dim=dim, **kw)


def embed_gaussian(x_ang, *, dim, start=-1.0, end=1.0, **kw):
    step = (end - start) / (dim - 1)
    kfn = functools.partial(_gaussian_kernel,
                            start=float(start), step=float(step),
                            inv_step=float(1.0 / step), coef=float(1.0 / 1.12))
    return _basis_embed(x_ang, kfn, dim=dim, **kw)


# --------------------------------------------------------------------------
# Encoder wrapper (forward pass on the Atomic_Graph_Data branch)
# --------------------------------------------------------------------------
# TODO(synk): embed_ang_with_dihedral (boolean-masked scatter into half/quarter
# feature slabs) is not implemented; this covers dihedral=False.
def encoder_atomic_forward(params, x_atm, x_bnd, x_ang, *, cutoff, dim):
    h_atm = embed_g_node(
        x_atm,
        params["w1"], params["b1"], params["w2"], params["b2"],
        params["ln_gamma"], params["ln_beta"],
    )
    h_bnd = embed_bessel(x_bnd, cutoff=cutoff, dim=dim)
    h_ang = embed_gaussian(x_ang, dim=dim)
    return h_atm, h_bnd, h_ang


# Pure-JAX reference (correctness sanity check, all f32)
def _reference(params, x_atm, x_bnd, x_ang, *, cutoff, dim):
    h = x_atm @ params["w1"] + params["b1"]
    h = h * jax.nn.sigmoid(h)
    h = h @ params["w2"] + params["b2"]
    mu = jnp.mean(h, axis=-1, keepdims=True)
    var = jnp.mean((h - mu) ** 2, axis=-1, keepdims=True)
    h_atm = (h - mu) / jnp.sqrt(var + 1e-5) * params["ln_gamma"] + params["ln_beta"]

    eps = 1e-5
    xb = x_bnd[:, None] - 0.0 + eps
    n = jnp.arange(1, dim + 1, dtype=jnp.float32)[None, :]
    h_bnd = jnp.sqrt(2.0 / cutoff) * jnp.sin(n * jnp.pi * xb / cutoff) / xb

    mus = jnp.linspace(-1.0, 1.0, dim)[None, :]
    step = 2.0 / (dim - 1)
    diff = (jnp.cos(x_ang)[:, None] - mus) / step
    h_ang = jnp.exp(-(diff ** 2)) / 1.12
    return h_atm, h_bnd, h_ang


if __name__ == "__main__":
    # Small synthetic problem; dim matches the module default (128 -> lane-dense, g=1).
    num_species = 8     # one-hot species vector length
    dim = 128           # embedding width (module default)
    cutoff = 4.0
    # Non-multiples of the tile sizes, and n_ang >> n_bnd (independent padding path).
    n_atm, n_bnd, n_ang = 1000, 1500, 3500

    key = jax.random.PRNGKey(0)
    k1, k2, k3, k4, k5, k6, k7 = jax.random.split(key, 7)

    # Deterministic parameter init (Linear weights stored as (in, out)).
    params = {
        "w1": jax.random.normal(k1, (num_species, dim), jnp.float32) * 0.1,
        "b1": jax.random.normal(k2, (1, dim), jnp.float32) * 0.01,
        "w2": jax.random.normal(k3, (dim, dim), jnp.float32) * 0.1,
        "b2": jax.random.normal(k4, (1, dim), jnp.float32) * 0.01,
        "ln_gamma": jnp.ones((1, dim), jnp.float32),
        "ln_beta": jnp.zeros((1, dim), jnp.float32),
    }

    # Inputs: one-hot atom species, bond lengths in (0, cutoff), angles in (0, pi).
    species_idx = jax.random.randint(k5, (n_atm,), 0, num_species)
    x_atm = jax.nn.one_hot(species_idx, num_species, dtype=jnp.float32)
    x_bnd = jax.random.uniform(k6, (n_bnd,), jnp.float32, 0.5, cutoff)
    x_ang = jax.random.uniform(k7, (n_ang,), jnp.float32, 0.0, jnp.pi)

    h_atm, h_bnd, h_ang = encoder_atomic_forward(
        params, x_atm, x_bnd, x_ang, cutoff=cutoff, dim=dim
    )
    jax.block_until_ready((h_atm, h_bnd, h_ang))

    r_atm, r_bnd, r_ang = _reference(params, x_atm, x_bnd, x_ang, cutoff=cutoff, dim=dim)
    assert h_atm.shape == (n_atm, dim)
    assert h_bnd.shape == (n_bnd, dim)
    assert h_ang.shape == (n_ang, dim)
    # bf16 outputs (and bf16-operand second matmul) -> loosened tolerances vs f32 reference.
    assert jnp.allclose(h_atm.astype(jnp.float32), r_atm, atol=5e-2, rtol=5e-2)
    assert jnp.allclose(h_bnd.astype(jnp.float32), r_bnd, atol=2e-2, rtol=2e-2)
    assert jnp.allclose(h_ang.astype(jnp.float32), r_ang, atol=2e-2, rtol=2e-2)

    print("KERNEL_OK")
</pallas_src>

<mosaic_0001>
module attributes {stable_mosaic.version = 11 : i64} {
  func.func @_embed_atm_kernel(%arg0: i32, %arg1: memref<512x8xf32, #tpu.memory_space<vmem>>, %arg2: memref<8x128xf32, #tpu.memory_space<vmem>>, %arg3: memref<1x128xf32, #tpu.memory_space<vmem>>, %arg4: memref<128x128xbf16, #tpu.memory_space<vmem>>, %arg5: memref<1x128xf32, #tpu.memory_space<vmem>>, %arg6: memref<1x128xf32, #tpu.memory_space<vmem>>, %arg7: memref<1x128xf32, #tpu.memory_space<vmem>>, %arg8: memref<512x128xbf16, #tpu.memory_space<vmem>>) attributes {dimension_semantics = [#tpu.dimension_semantics<parallel>], iteration_bounds = array<i64: 2>, scalar_prefetch = 0 : i64, scratch_operands = 0 : i64, tpu.core_type = #tpu.core_type<tc>, window_params = [{transform_indices = @transform_0, window_bounds = array<i64: 512, 8>}, {pipeline_mode = #tpu.pipeline_mode<synchronous>, transform_indices = @transform_1, window_bounds = array<i64: 8, 128>}, {pipeline_mode = #tpu.pipeline_mode<synchronous>, transform_indices = @transform_2, window_bounds = array<i64: 1, 128>}, {pipeline_mode = #tpu.pipeline_mode<synchronous>, transform_indices = @transform_3, window_bounds = array<i64: 128, 128>}, {pipeline_mode = #tpu.pipeline_mode<synchronous>, transform_indices = @transform_4, window_bounds = array<i64: 1, 128>}, {pipeline_mode = #tpu.pipeline_mode<synchronous>, transform_indices = @transform_5, window_bounds = array<i64: 1, 128>}, {pipeline_mode = #tpu.pipeline_mode<synchronous>, transform_indices = @transform_6, window_bounds = array<i64: 1, 128>}, {transform_indices = @transform_7, window_bounds = array<i64: 512, 128>}]} {
    %c0 = arith.constant 0 : index
    %c0_0 = arith.constant 0 : index
    %0 = vector.load %arg1[%c0, %c0_0] : memref<512x8xf32, #tpu.memory_space<vmem>>, vector<512x8xf32>
    %c0_1 = arith.constant 0 : index
    %c0_2 = arith.constant 0 : index
    %1 = vector.load %arg2[%c0_1, %c0_2] : memref<8x128xf32, #tpu.memory_space<vmem>>, vector<8x128xf32>
    %cst = arith.constant dense<0.000000e+00> : vector<512x128xf32>
    %2 = tpu.matmul %0, %1, %cst {dimension_numbers = #tpu.dot_dimension_numbers<[1], [0], [0], [1], [0, 0, 1, 1], [], []>} : vector<512x8xf32>, vector<8x128xf32>, vector<512x128xf32> -> vector<512x128xf32>
    %c0_3 = arith.constant 0 : index
    %c0_4 = arith.constant 0 : index
    %3 = vector.load %arg3[%c0_3, %c0_4] : memref<1x128xf32, #tpu.memory_space<vmem>>, vector<1x128xf32>
    %4 = vector.broadcast %3 : vector<1x128xf32> to vector<512x128xf32>
    %5 = arith.addf %2, %4 : vector<512x128xf32>
    %6 = arith.negf %5 : vector<512x128xf32>
    %7 = math.exp %6 : vector<512x128xf32>
    %cst_5 = arith.constant 1.000000e+00 : f32
    %8 = vector.broadcast %cst_5 : f32 to vector<512x128xf32>
    %9 = arith.addf %8, %7 : vector<512x128xf32>
    %10 = arith.divf %8, %9 : vector<512x128xf32>
    %11 = arith.mulf %5, %10 : vector<512x128xf32>
    %12 = arith.truncf %11 : vector<512x128xf32> to vector<512x128xbf16>
    %c0_6 = arith.constant 0 : index
    %c0_7 = arith.constant 0 : index
    %13 = vector.load %arg4[%c0_6, %c0_7] : memref<128x128xbf16, #tpu.memory_space<vmem>>, vector<128x128xbf16>
    %cst_8 = arith.constant dense<0.000000e+00> : vector<512x128xf32>
    %14 = tpu.matmul %12, %13, %cst_8 {dimension_numbers = #tpu.dot_dimension_numbers<[1], [0], [0], [1], [0, 0, 1, 1], [], []>} : vector<512x128xbf16>, vector<128x128xbf16>, vector<512x128xf32> -> vector<512x128xf32>
    %c0_9 = arith.constant 0 : index
    %c0_10 = arith.constant 0 : index
    %15 = vector.load %arg5[%c0_9, %c0_10] : memref<1x128xf32, #tpu.memory_space<vmem>>, vector<1x128xf32>
    %16 = vector.broadcast %15 : vector<1x128xf32> to vector<512x128xf32>
    %17 = arith.addf %14, %16 : vector<512x128xf32>
    %cst_11 = arith.constant dense<0.000000e+00> : vector<512xf32>
    %18 = vector.multi_reduction <add>, %17, %cst_11 [1] : vector<512x128xf32> to vector<512xf32>
    %19 = vector.shape_cast %18 : vector<512xf32> to vector<512x1xf32>
    %cst_12 = arith.constant 1.280000e+02 : f32
    %20 = vector.broadcast %cst_12 : f32 to vector<512x1xf32>
    %21 = arith.divf %19, %20 : vector<512x1xf32>
    %22 = vector.broadcast %21 : vector<512x1xf32> to vector<512x128xf32>
    %23 = arith.subf %17, %22 : vector<512x128xf32>
    %24 = arith.mulf %23, %23 : vector<512x128xf32>
    %cst_13 = arith.constant dense<0.000000e+00> : vector<512xf32>
    %25 = vector.multi_reduction <add>, %24, %cst_13 [1] : vector<512x128xf32> to vector<512xf32>
    %26 = vector.shape_cast %25 : vector<512xf32> to vector<512x1xf32>
    %cst_14 = arith.constant 1.280000e+02 : f32
    %27 = vector.broadcast %cst_14 : f32 to vector<512x1xf32>
    %28 = arith.divf %26, %27 : vector<512x1xf32>
    %29 = vector.broadcast %21 : vector<512x1xf32> to vector<512x128xf32>
    %30 = arith.subf %17, %29 : vector<512x128xf32>
    %cst_15 = arith.constant 9.99999974E-6 : f32
    %31 = vector.broadcast %cst_15 : f32 to vector<512x1xf32>
    %32 = arith.addf %28, %31 : vector<512x1xf32>
    %33 = math.rsqrt %32 : vector<512x1xf32>
    %34 = vector.broadcast %33 : vector<512x1xf32> to vector<512x128xf32>
    %35 = arith.mulf %30, %34 : vector<512x128xf32>
    %c0_16 = arith.constant 0 : index
    %c0_17 = arith.constant 0 : index
    %36 = vector.load %arg6[%c0_16, %c0_17] : memref<1x128xf32, #tpu.memory_space<vmem>>, vector<1x128xf32>
    %37 = vector.broadcast %36 : vector<1x128xf32> to vector<512x128xf32>
    %38 = arith.mulf %35, %37 : vector<512x128xf32>
    %c0_18 = arith.constant 0 : index
    %c0_19 = arith.constant 0 : index
    %39 = vector.load %arg7[%c0_18, %c0_19] : memref<1x128xf32, #tpu.memory_space<vmem>>, vector<1x128xf32>
    %40 = vector.broadcast %39 : vector<1x128xf32> to vector<512x128xf32>
    %41 = arith.addf %38, %40 : vector<512x128xf32>
    %42 = arith.truncf %41 : vector<512x128xf32> to vector<512x128xbf16>
    %c0_20 = arith.constant 0 : index
    %c0_21 = arith.constant 0 : index
    %43 = vector.load %arg8[%c0_20, %c0_21] : memref<512x128xbf16, #tpu.memory_space<vmem>>, vector<512x128xbf16>
    tpu.vector_store %arg8[%c0_20, %c0_21], %42 {strides = array<i32>} : memref<512x128xbf16, #tpu.memory_space<vmem>>, vector<512x128xbf16>,
    return
  }
  func.func @transform_0(%arg0: i32) -> (i32, i32) {
    %c0_i32 = arith.constant 0 : i32
    %c0_i32_0 = arith.constant 0 : i32
    return %arg0, %c0_i32 : i32, i32
  }
  func.func @transform_1(%arg0: i32) -> (i32, i32) {
    %c0_i32 = arith.constant 0 : i32
    %c0_i32_0 = arith.constant 0 : i32
    %c0_i32_1 = arith.constant 0 : i32
    return %c0_i32, %c0_i32_0 : i32, i32
  }
  func.func @transform_2(%arg0: i32) -> (i32, i32) {
    %c0_i32 = arith.constant 0 : i32
    %c0_i32_0 = arith.constant 0 : i32
    %c0_i32_1 = arith.constant 0 : i32
    return %c0_i32, %c0_i32_0 : i32, i32
  }
  func.func @transform_3(%arg0: i32) -> (i32, i32) {
    %c0_i32 = arith.constant 0 : i32
    %c0_i32_0 = arith.constant 0 : i32
    %c0_i32_1 = arith.constant 0 : i32
    return %c0_i32, %c0_i32_0 : i32, i32
  }
  func.func @transform_4(%arg0: i32) -> (i32, i32) {
    %c0_i32 = arith.constant 0 : i32
    %c0_i32_0 = arith.constant 0 : i32
    %c0_i32_1 = arith.constant 0 : i32
    return %c0_i32, %c0_i32_0 : i32, i32
  }
  func.func @transform_5(%arg0: i32) -> (i32, i32) {
    %c0_i32 = arith.constant 0 : i32
    %c0_i32_0 = arith.constant 0 : i32
    %c0_i32_1 = arith.constant 0 : i32
    return %c0_i32, %c0_i32_0 : i32, i32
  }
  func.func @transform_6(%arg0: i32) -> (i32, i32) {
    %c0_i32 = arith.constant 0 : i32
    %c0_i32_0 = arith.constant 0 : i32
    %c0_i32_1 = arith.constant 0 : i32
    return %c0_i32, %c0_i32_0 : i32, i32
  }
  func.func @transform_7(%arg0: i32) -> (i32, i32) {
    %c0_i32 = arith.constant 0 : i32
    %c0_i32_0 = arith.constant 0 : i32
    return %arg0, %c0_i32 : i32, i32
  }
}

</mosaic_0001>

<bundles_post_ra>
// kernel: tpu_custom_call.1
= control target key start
LH: loop header
LB: loop body
LE: loop exit
PB: predicated region body
PF: predicated region fallthrough
CT: control target
= control target key end

     0   :  { %12 = vsyncpa [#allocation3], 0  ;;  %s8209_s0 = inlined_call_operand.vmem [shape: f32[1000,8], index: 0, kind: input, shape index: {}]   ;;  %s8210_s1 = inlined_call_operand.vmem [shape: f32[8,128], index: 1, kind: input, shape index: {}]   ;;  %s8211_s2 = inlined_call_operand.vmem [shape: f32[1,128], index: 2, kind: input, shape index: {}]   ;;  %s8212_s3 = inlined_call_operand.vmem [shape: bf16[128,128], index: 3, kind: input, shape index: {}]   ;;  %s8213_s4 = inlined_call_operand.vmem [shape: f32[1,128], index: 4, kind: input, shape index: {}]   ;;  %s8214_s5 = inlined_call_operand.vmem [shape: f32[1,128], index: 5, kind: input, shape index: {}]   ;;  %s8215_s6 = inlined_call_operand.vmem [shape: f32[1,128], index: 6, kind: input, shape index: {}]   ;;  %s8216_s7 = inlined_call_operand.hbm [shape: bf16[1000,128], index: 7, kind: output, shape index: {}]  }
   0x1   :  { %14 = vsyncpa [#allocation3 + $0x1], 0  ;;  %s4912_s24 = smov 0   ;;  %s4914_s25 = smov 0  }
   0x2   :  { %s4916_s26 = smov 0   ;;  %s4918_s27 = smov 0  }
   0x3 LB: > { %s4933_s28 = sadd.s32 4294967295, %s4866_s27   ;;  %s3960_s29 = sadd.s32 4294967294, %s4866_s27   ;;  %s4866_s27 = sphi %s4918_s27, %s8501_s27   ;;  %s4862_s26 = sphi %s4916_s26, %s8500_s26   ;;  %s4858_s25 = sphi %s4914_s25, %s8499_s25   ;;  %s4854_s24 = sphi %s4912_s24, %s8498_s24  }
   0x4   : > { %s4937_s30 = sadd.s32 1, %s4866_s27   ;;  %s179_s8 = sadd.s32 1, %s4862_s26 }
   0x5   : > { %s176_s9 = ssub.s32 %s4866_s27, %s4937_s30  ;;  %p189_p0 = scmp.ne.s32.totalorder %s4862_s26, %s4858_s25 }
   0x6   : > { %p177_p1 = scmp.eq.s32.totalorder %s176_s9, 0  ;;  %p190_p2 = scmp.eq.s32.totalorder %s4933_s28, 1 }
   0x7   : > { %p195_p3 = scmp.ne.s32.totalorder %s4858_s25, %s4854_s24  ;;  %p196_p4 = scmp.eq.s32.totalorder %s3960_s29, 1 }
   0x8   : > { %s4948_s10 = scalar_select %p177_p1, %s4862_s26, %s179_s8  }
   0x9   : > { %p4950_p5 = por %p190_p2, %p189_p0  ;;  %p4954_p6 = por %p196_p4, %p195_p3 }
   0xa   : > { %p3963_p7 = scmp.ge.s32.totalorder %s4866_s27, 1  ;;  %p249_p8 = scmp.lt.s32.totalorder %s4866_s27, 3 }
   0xc   : > { %p250_p9 = pnand %p3963_p7, %p249_p8 }
   0xe   : > { %253 = sbr.rel (%p250_p9) target bundleno = 1134 (0x46e), region = 48 }
  0x13   : > { %v368_v0 = vld [vmem:[%s8210_s1] sm:$0xff]  ;;  %s4964_s15 = sshll.u32 %s4933_s28, 6  ;;  %vm373_vm0 = vcmask 64512   ;;  %v4143_v29 = vld [vmem:[%s8212_s3 + $0x38] sm:$0xff]  ;;  %v4142_v30 = vld [vmem:[%s8212_s3 + $0x30] sm:$0xff]  ;;  %s282_s9 = sand.u32 1, %s4858_s25  }
  0x14   : > { %581 = vmatpush.msra.mxu0 %v368_v0  ;;  %4336 = vmatpush.msra.mxu3 %v368_v0  ;;  %p290_p10 = scmp.lt.s32.totalorder %s4964_s15, 124  ;;  %v4141_v33 = vld [vmem:[%s8212_s3 + $0x28] sm:$0xff]  ;;  %v4140_v34 = vld [vmem:[%s8212_s3 + $0x20] sm:$0xff]  ;;  %v4139_v37 = vld [vmem:[%s8212_s3 + $0x18] sm:$0xff]  ;;  %s3964_s14 = sshll.u32 %s282_s9, 8 }
  0x15   : > { %2155 = vmatpush.bf16.msra.mxu1 %v4143_v29  ;;  %4337 = vmatpush.bf16.msra.mxu2 %v4143_v29  ;;  %v5055_v38 = vld [vmem:[%s8211_s2] ss:$0 sm:$0xff]  ;;  %v4138_v39 = vld [vmem:[%s8212_s3 + $0x10] sm:$0xff]  ;;  %v4137_v44 = vld [vmem:[%s8212_s3 + $0x8] sm:$0xff] }
  0x16   : > { %s291_s16 = scalar_select %p290_p10, %s4964_s15, 124  ;;  %4338 = vmatpush.bf16.msrb.mxu3 %v4143_v29  ;;  %v4136_v47 = vld [vmem:[%s8212_s3] sm:$0xff] }
  0x18   : > { %s3966_s17 = sshll.u32 %s291_s16, 3  ;;  %s7352_s16 = scalar_lea.vmem [#allocation2], %s3964_s14 }
  0x19   : > { %s4971_s20 = scalar_lea.vmem %s8209_s0, %s3966_s17  ;;  %2156 = vmatpush.bf16.msra.mxu1 %v4142_v30  ;;  %4339 = vmatpush.bf16.msra.mxu2 %v4142_v30  ;;  %s8148_s14 = scalar_lea.sflag [#allocation3], %s282_s9 }
  0x1a   : > { %v304_v1 = vld [vmem:[%s4971_s20] sm:$0xff]  ;;  %v338_v2 = vld [vmem:[%s4971_s20 + $0x110] sm:$0xff]  ;;  %v305_v3 = vld [vmem:[%s4971_s20 + $0x8] sm:$0xff]  ;;  %4340 = vmatpush.bf16.msrb.mxu3 %v4142_v30  ;;  %s3884_s17 = ssub.s32 (%p4950_p5), 125, %s4964_s15 }
  0x1b   : > { %3967 = vmatmul.msk.f32.vlgmr.msra.gmra.mxu0 %vm373_vm0, %v304_v1  ;;  %4001 = vmatmul.msk.f32.vlgmr.msra.gmra.mxu3 %vm373_vm0, %v338_v2  ;;  %v339_v4 = vld [vmem:[%s4971_s20 + $0x118] sm:$0xff]  ;;  %v306_v5 = vld [vmem:[%s4971_s20 + $0x10] sm:$0xff]  ;;  %v340_v6 = vld [vmem:[%s4971_s20 + $0x120] sm:$0xff]  ;;  %p3885_p11 = scmp.lt.s32.totalorder (%p4950_p5), %s3884_s17, 64 }
  0x1c   : > { %v307_v7 = vld [vmem:[%s4971_s20 + $0x18] sm:$0xff]  ;;  %v341_v8 = vld [vmem:[%s4971_s20 + $0x128] sm:$0xff]  ;;  %v308_v9 = vld [vmem:[%s4971_s20 + $0x20] sm:$0xff] }
  0x1d   : > { %v342_v10 = vld [vmem:[%s4971_s20 + $0x130] sm:$0xff]  ;;  %v309_v11 = vld [vmem:[%s4971_s20 + $0x28] sm:$0xff]  ;;  %v343_v12 = vld [vmem:[%s4971_s20 + $0x138] sm:$0xff]  ;;  %2157 = vmatpush.bf16.msra.mxu1 %v4141_v33  ;;  %4341 = vmatpush.bf16.msra.mxu2 %v4141_v33 }
  0x1e   : > { %v310_v13 = vld [vmem:[%s4971_s20 + $0x30] sm:$0xff]  ;;  %v344_v14 = vld [vmem:[%s4971_s20 + $0x140] sm:$0xff]  ;;  %v311_v15 = vld [vmem:[%s4971_s20 + $0x38] sm:$0xff]  ;;  %4342 = vmatpush.bf16.msrb.mxu3 %v4141_v33 }
  0x1f   : > { %v345_v16 = vld [vmem:[%s4971_s20 + $0x148] sm:$0xff]  ;;  %v312_v17 = vld [vmem:[%s4971_s20 + $0x40] sm:$0xff]  ;;  %v346_v18 = vld [vmem:[%s4971_s20 + $0x150] sm:$0xff] }
  0x20   : > { %v313_v19 = vld [vmem:[%s4971_s20 + $0x48] sm:$0xff]  ;;  %v347_v20 = vld [vmem:[%s4971_s20 + $0x158] sm:$0xff]  ;;  %v314_v21 = vld [vmem:[%s4971_s20 + $0x50] sm:$0xff] }
  0x21   : > { %v348_v22 = vld [vmem:[%s4971_s20 + $0x160] sm:$0xff]  ;;  %v315_v23 = vld [vmem:[%s4971_s20 + $0x58] sm:$0xff]  ;;  %v349_v24 = vld [vmem:[%s4971_s20 + $0x168] sm:$0xff]  ;;  %2158 = vmatpush.bf16.msra.mxu1 %v4140_v34  ;;  %4343 = vmatpush.bf16.msra.mxu2 %v4140_v34 }
  0x22   : > { %v316_v25 = vld [vmem:[%s4971_s20 + $0x60] sm:$0xff]  ;;  %v350_v26 = vld [vmem:[%s4971_s20 + $0x170] sm:$0xff]  ;;  %v317_v27 = vld [vmem:[%s4971_s20 + $0x68] sm:$0xff]  ;;  %4344 = vmatpush.bf16.msrb.mxu3 %v4140_v34 }
  0x23   : > { %3968 = vmatmul.msk.f32.gmra.mxu0 %vm373_vm0, %v305_v3  ;;  %4002 = vmatmul.msk.f32.gmra.mxu3 %vm373_vm0, %v339_v4  ;;  %v351_v28 = vld [vmem:[%s4971_s20 + $0x178] sm:$0xff]  ;;  %v318_v31 = vld [vmem:[%s4971_s20 + $0x70] sm:$0xff]  ;;  %v352_v32 = vld [vmem:[%s4971_s20 + $0x180] sm:$0xff] }
  0x24   : > { %v319_v35 = vld [vmem:[%s4971_s20 + $0x78] sm:$0xff]  ;;  %v353_v36 = vld [vmem:[%s4971_s20 + $0x188] sm:$0xff]  ;;  %v320_v41 = vld [vmem:[%s4971_s20 + $0x80] sm:$0xff] }
  0x25   : > { %2159 = vmatpush.bf16.msra.mxu1 %v4139_v37  ;;  %4345 = vmatpush.bf16.msra.mxu2 %v4139_v37  ;;  %v354_v42 = vld [vmem:[%s4971_s20 + $0x190] sm:$0xff]  ;;  %v321_v50 = vld [vmem:[%s4971_s20 + $0x88] sm:$0xff]  ;;  %v355_v51 = vld [vmem:[%s4971_s20 + $0x198] sm:$0xff] }
  0x26   : > { %4346 = vmatpush.bf16.msrb.mxu3 %v4139_v37  ;;  %v322_v60 = vld [vmem:[%s4971_s20 + $0x90] sm:$0xff]  ;;  %v356_v61 = vld [vmem:[%s4971_s20 + $0x1a0] sm:$0xff] }
  0x29   : > { %2160 = vmatpush.bf16.msra.mxu1 %v4138_v39  ;;  %4347 = vmatpush.bf16.msra.mxu2 %v4138_v39 }
  0x2a   : > { %4348 = vmatpush.bf16.msrb.mxu3 %v4138_v39 }
  0x2b   : > { %3969 = vmatmul.msk.f32.gmra.mxu0 %vm373_vm0, %v306_v5  ;;  %4003 = vmatmul.msk.f32.gmra.mxu3 %vm373_vm0, %v340_v6 }
  0x2d   : > { %2161 = vmatpush.bf16.msra.mxu1 %v4137_v44  ;;  %4349 = vmatpush.bf16.msra.mxu2 %v4137_v44 }
  0x2e   : > { %4350 = vmatpush.bf16.msrb.mxu3 %v4137_v44 }
  0x31   : > { %2162 = vmatpush.bf16.msra.mxu1 %v4136_v47  ;;  %4351 = vmatpush.bf16.msra.mxu2 %v4136_v47 }
  0x32   : > { %4352 = vmatpush.bf16.msrb.mxu3 %v4136_v47 }
  0x33   : > { %3970 = vmatmul.msk.f32.gmra.mxu0 %vm373_vm0, %v307_v7  ;;  %4004 = vmatmul.msk.f32.gmra.mxu3 %vm373_vm0, %v341_v8 }
  0x3b   : > { %3971 = vmatmul.msk.f32.gmra.mxu0 %vm373_vm0, %v308_v9  ;;  %4005 = vmatmul.msk.f32.gmra.mxu3 %vm373_vm0, %v342_v10  ;;  %v323_v10 = vld [vmem:[%s4971_s20 + $0x98] sm:$0xff] }
  0x43   : > { %3972 = vmatmul.msk.f32.gmra.mxu0 %vm373_vm0, %v309_v11  ;;  %4006 = vmatmul.msk.f32.gmra.mxu3 %vm373_vm0, %v343_v12  ;;  %v357_v11 = vld [vmem:[%s4971_s20 + $0x1a8] sm:$0xff] }
  0x4b   : > { %3973 = vmatmul.msk.f32.gmra.mxu0 %vm373_vm0, %v310_v13  ;;  %4007 = vmatmul.msk.f32.gmra.mxu3 %vm373_vm0, %v344_v14 }
  0x53   : > { %3974 = vmatmul.msk.f32.gmra.mxu0 %vm373_vm0, %v311_v15  ;;  %4008 = vmatmul.msk.f32.gmra.mxu3 %vm373_vm0, %v345_v16 }
  0x5b   : > { %3975 = vmatmul.msk.f32.gmra.mxu0 %vm373_vm0, %v312_v17  ;;  %4009 = vmatmul.msk.f32.gmra.mxu3 %vm373_vm0, %v346_v18 }
  0x63   : > { %3976 = vmatmul.msk.f32.gmra.mxu0 %vm373_vm0, %v313_v19  ;;  %4010 = vmatmul.msk.f32.gmra.mxu3 %vm373_vm0, %v347_v20 }
  0x6b   : > { %3977 = vmatmul.msk.f32.gmra.mxu0 %vm373_vm0, %v314_v21  ;;  %4011 = vmatmul.msk.f32.gmra.mxu3 %vm373_vm0, %v348_v22 }
  0x73   : > { %3978 = vmatmul.msk.f32.gmra.mxu0 %vm373_vm0, %v315_v23  ;;  %4012 = vmatmul.msk.f32.gmra.mxu3 %vm373_vm0, %v349_v24 }
  0x7b   : > { %3979 = vmatmul.msk.f32.gmra.mxu0 %vm373_vm0, %v316_v25  ;;  %4013 = vmatmul.msk.f32.gmra.mxu3 %vm373_vm0, %v350_v26 }
  0x83   : > { %3980 = vmatmul.msk.f32.gmra.mxu0 %vm373_vm0, %v317_v27  ;;  %4014 = vmatmul.msk.f32.gmra.mxu3 %vm373_vm0, %v351_v28  ;;  %v324_v27 = vld [vmem:[%s4971_s20 + $0xa0] sm:$0xff]  ;;  %v358_v28 = vld [vmem:[%s4971_s20 + $0x1b0] sm:$0xff] }
  0x8b   : > { %3981 = vmatmul.msk.f32.gmra.mxu0 %vm373_vm0, %v318_v31  ;;  %4015 = vmatmul.msk.f32.gmra.mxu3 %vm373_vm0, %v352_v32 }
  0x93   : > { %3982 = vmatmul.msk.f32.gmra.mxu0 %vm373_vm0, %v319_v35  ;;  %4016 = vmatmul.msk.f32.gmra.mxu3 %vm373_vm0, %v353_v36 }
  0x98   : > { %v583_v40 = vpop.f32.mrf.mxu0 }
  0x99   : > { %v5063_v43 = vadd.f32 %v5055_v38, %v583_v40 }
  0x9b   : > { %v4031_v45 = vmul.f32 -1.442695, %v5063_v43  ;;  %3983 = vmatmul.msk.f32.gmra.mxu0 %vm373_vm0, %v320_v41  ;;  %4017 = vmatmul.msk.f32.gmra.mxu3 %vm373_vm0, %v354_v42 }
  0x9d   : > { %4398 = vpow2.f32 %v4031_v45 }
  0x9e   : > { %v685_v46 = vpop.f32.mrf.mxu3 }
  0x9f   : > { %v5075_v48 = vadd.f32 %v5055_v38, %v685_v46 }
  0xa0   : > { %v586_v49 = vpop.f32.mrf.mxu0 }
  0xa1   : > { %v5080_v52 = vadd.f32 %v5055_v38, %v586_v49  ;;  %v4065_v54 = vmul.f32 -1.442695, %v5075_v48 }
  0xa3   : > { %v4399_v53 = vpop.eup %4398  ;;  %v4032_v55 = vmul.f32 -1.442695, %v5080_v52  ;;  %3984 = vmatmul.msk.f32.gmra.mxu0 %vm373_vm0, %v321_v50  ;;  %4018 = vmatmul.msk.f32.gmra.mxu3 %vm373_vm0, %v355_v51 }
  0xa4   : > { %v5086_v56 = vadd.f32 1.0, %v4399_v53 }
  0xa5   : > { %4400 = vpow2.f32 %v4032_v55 }
  0xa6   : > { %4402 = vrcp.f32 %v5086_v56  ;;  %v688_v57 = vpop.f32.mrf.mxu3  ;;  %v1042_v22 = vand.u32 2147483648, %v5086_v56  ;;  %vm1036_vm2 = vweird.f32 %v5086_v56  ;;  %v1040_v23 = vand.u32 2147483647, %v5086_v56 }
  0xa7   : > { %4404 = vpow2.f32 %v4065_v54  ;;  %v5090_v58 = vadd.f32 %v5055_v38, %v688_v57  ;;  %v325_v57 = vld [vmem:[%s4971_s20 + $0xa8] sm:$0xff] }
  0xa8   : > { %v589_v59 = vpop.f32.mrf.mxu0  ;;  %v1043_v36 = vor.u32 1.1754944e-38, %v1042_v22  ;;  %vm1041_vm5 = vcmp.eq.f32.partialorder %v1040_v23, 8.507059e+37  ;;  %v326_v22 = vld [vmem:[%s4971_s20 + $0xb0] sm:$0xff]  ;;  %v360_v23 = vld [vmem:[%s4971_s20 + $0x1c0] sm:$0xff] }
  0xa9   : > { %v5095_v62 = vadd.f32 %v5055_v38, %v589_v59  ;;  %v4066_v0 = vmul.f32 -1.442695, %v5090_v58  ;;  %v359_v59 = vld [vmem:[%s4971_s20 + $0x1b8] sm:$0xff] }
  0xab   : > { %v4401_v63 = vpop.eup %4400  ;;  %v4033_v1 = vmul.f32 -1.442695, %v5095_v62  ;;  %3985 = vmatmul.msk.f32.gmra.mxu0 %vm373_vm0, %v322_v60  ;;  %4019 = vmatmul.msk.f32.gmra.mxu3 %vm373_vm0, %v356_v61 }
  0xac   : > { %v4403_v2 = vpop.eup %4402  ;;  %v968_v3 = vadd.f32 1.0, %v4401_v63 }
  0xad   : > { %v4405_v4 = vpop.eup %4404  ;;  %4406 = vpow2.f32 %v4033_v1  ;;  %v1032_v5 = vmul.f32 %v4403_v2, %v5086_v56  ;;  %vm1037_vm1 = vweird.f32 %v4403_v2 }
  0xae   : > { %4408 = vrcp.f32 %v968_v3  ;;  %v5102_v6 = vpop.f32.mrf.mxu3  ;;  %v5104_v8 = vadd.f32 1.0, %v4405_v4  ;;  %vm5127_vm3 = vmor %vm1036_vm2, %vm1037_vm1  ;;  %v1055_v30 = vand.u32 2147483647, %v968_v3  ;;  %v1057_v31 = vand.u32 2147483648, %v968_v3 }
  0xaf   : > { %4410 = vpow2.f32 %v4066_v0  ;;  %v1033_v7 = vsub.f32 1.0, %v1032_v5  ;;  %vm1051_vm6 = vweird.f32 %v968_v3 }
  0xb0   : > { %v592_v9 = vpop.f32.mrf.mxu0  ;;  %4412 = vrcp.f32 %v5104_v8  ;;  %v1058_v45 = vor.u32 1.1754944e-38, %v1057_v31  ;;  %vm1056_vm8 = vcmp.eq.f32.partialorder %v1055_v30, 8.507059e+37  ;;  %v1552_v29 = vand.u32 2147483648, %v5104_v8 }
  0xb1   : > { %v5109_v12 = vadd.f32 %v5055_v38, %v592_v9  ;;  %v1034_v13 = vmul.f32 %v4403_v2, %v1033_v7  ;;  %vm1546_vm1 = vweird.f32 %v5104_v8 }
  0xb3   : > { %v4407_v14 = vpop.eup %4406  ;;  %v4034_v15 = vmul.f32 -1.442695, %v5109_v12  ;;  %3986 = vmatmul.msk.f32.gmra.mxu0 %vm373_vm0, %v323_v10  ;;  %4020 = vmatmul.msk.f32.gmra.mxu3 %vm373_vm0, %v357_v11  ;;  %v1035_v19 = vadd.f32 %v4403_v2, %v1034_v13 }
  0xb4   : > { %v4409_v16 = vpop.eup %4408  ;;  %v5115_v17 = vadd.f32 1.0, %v4407_v14 }
  0xb5   : > { %v4411_v18 = vpop.eup %4410  ;;  %4414 = vpow2.f32 %v4034_v15  ;;  %v1047_v20 = vmul.f32 %v4409_v16, %v968_v3  ;;  %v1039_v33 = vsel %vm5127_vm3, %v4403_v2, %v1035_v19  ;;  %vm1052_vm4 = vweird.f32 %v4409_v16 }
  0xb6   : > { %4416 = vrcp.f32 %v5115_v17  ;;  %v5118_v21 = vpop.f32.mrf.mxu3  ;;  %v5123_v25 = vadd.f32 1.0, %v4411_v18  ;;  %v5136_v35 = vpop.eup %4412  ;;  %v1044_v44 = vsel %vm1041_vm5, %v1043_v36, %v1039_v33  ;;  %vm1053_vm7 = vmor %vm1051_vm6, %vm1052_vm4  ;;  %v1072_v2 = vand.u32 2147483648, %v5115_v17 }
  0xb7   : > { %v1048_v24 = vsub.f32 1.0, %v1047_v20  ;;  %v1991_v51 = vmul.f32 %v1044_v44, %v5063_v43  ;;  %v1542_v55 = vmul.f32 %v5136_v35, %v5104_v8  ;;  %vm1066_vm10 = vweird.f32 %v5115_v17 }
  0xb8   : > { %v595_v26 = vpop.f32.mrf.mxu0  ;;  %4418 = vrcp.f32 %v5123_v25  ;;  %vm1547_vm2 = vweird.f32 %v5136_v35  ;;  %vm1561_vm4 = vweird.f32 %v5123_v25 }
  0xb9   : > { %v5132_v32 = vadd.f32 %v5055_v38, %v595_v26  ;;  %v1049_v34 = vmul.f32 %v4409_v16, %v1048_v24  ;;  %v1543_v3 = vsub.f32 1.0, %v1542_v55  ;;  %v1073_v24 = vor.u32 1.1754944e-38, %v1072_v2  ;;  %vm5228_vm6 = vmor %vm1546_vm1, %vm1547_vm2 }
  0xbb   : > { %v4415_v37 = vpop.eup %4414  ;;  %v4035_v39 = vmul.f32 -1.442695, %v5132_v32  ;;  %3987 = vmatmul.msk.f32.gmra.mxu0 %vm373_vm0, %v324_v27  ;;  %4021 = vmatmul.msk.f32.gmra.mxu3 %vm373_vm0, %v358_v28  ;;  %v1050_v40 = vadd.f32 %v4409_v16, %v1049_v34  ;;  %v1544_v19 = vmul.f32 %v5136_v35, %v1543_v3 }
  0xbc   : > { %v5141_v41 = vpop.eup %4416  ;;  %v5144_v42 = vadd.f32 1.0, %v4415_v37 }
  0xbd   : > { %4420 = vpow2.f32 %v4035_v39  ;;  %v1054_v46 = vsel %vm1053_vm7, %v4409_v16, %v1050_v40  ;;  %v1062_v47 = vmul.f32 %v5141_v41, %v5115_v17  ;;  %vm1067_vm9 = vweird.f32 %v5141_v41 }
  0xbe   : > { %4422 = vrcp.f32 %v5144_v42  ;;  %v5149_v49 = vpop.f32.mrf.mxu3  ;;  %v1059_v50 = vsel %vm1056_vm8, %v1058_v45, %v1054_v46  ;;  %v5161_v0 = vpop.eup %4418  ;;  %v1085_v9 = vand.u32 2147483647, %v5144_v42  ;;  %v1087_v13 = vand.u32 2147483648, %v5144_v42  ;;  %vm5181_vm11 = vmor %vm1066_vm10, %vm1067_vm9 }
  0xbf   : > { %v1992_v53 = vmul.f32 %v1059_v50, %v5080_v52  ;;  %v1063_v54 = vsub.f32 1.0, %v1062_v47  ;;  %v1070_v52 = vand.u32 2147483647, %v5115_v17  ;;  %v1557_v14 = vmul.f32 %v5161_v0, %v5123_v25 }
  0xc0   : > { %v598_v56 = vpop.f32.mrf.mxu0  ;;  %vm1081_vm13 = vweird.f32 %v5144_v42  ;;  %vm5196_vm14 = vcmp.eq.f32.partialorder %v1085_v9, 8.507059e+37  ;;  %v1088_v30 = vor.u32 1.1754944e-38, %v1087_v13  ;;  %v1545_v39 = vadd.f32 %v5136_v35, %v1544_v19 }
  0xc1   : > { %v5158_v60 = vadd.f32 %v5055_v38, %v598_v56  ;;  %v2055_v61 = vpack.c.bf16 %v1992_v53, %v1991_v51  ;;  %v1064_v63 = vmul.f32 %v5141_v41, %v1063_v54  ;;  %vm5185_vm12 = vcmp.eq.f32.partialorder %v1070_v52, 8.507059e+37 }
  0xc2   : > { %v1558_v31 = vsub.f32 1.0, %v1557_v14  ;;  %vm1562_vm5 = vweird.f32 %v5161_v0  ;;  %v1550_v47 = vand.u32 2147483647, %v5104_v8  ;;  %v1565_v53 = vand.u32 2147483647, %v5123_v25  ;;  %v327_v8 = vld [vmem:[%s4971_s20 + $0xb8] sm:$0xff] }
  0xc3   : > { %v4421_v1 = vpop.eup %4420  ;;  %v4036_v43 = vmul.f32 -1.442695, %v5158_v60  ;;  %3988 = vmatmul.msk.f32.gmra.mxu0 %vm373_vm0, %v325_v57  ;;  %4022 = vmatmul.msk.f32.gmra.mxu3 %vm373_vm0, %v359_v59  ;;  %v1065_v7 = vadd.f32 %v5141_v41, %v1064_v63  ;;  %vm5241_vm7 = vmor %vm1561_vm4, %vm1562_vm5  ;;  %v1549_v63 = vsel %vm5228_vm6, %v5136_v35, %v1545_v39  ;;  %v1567_v52 = vand.u32 2147483648, %v5123_v25 }
  0xc4   : > { %v4423_v4 = vpop.eup %4422  ;;  %v5168_v5 = vadd.f32 1.0, %v4421_v1  ;;  %2163 = vmatmul.bf16.vlgmr.msra.gmra.mxu1 %v2055_v61  ;;  %v1559_v44 = vmul.f32 %v5161_v0, %v1558_v31  ;;  %v361_v61 = vld [vmem:[%s4971_s20 + $0x1c8] sm:$0xff]  ;;  %v1553_v1 = vor.u32 1.1754944e-38, %v1552_v29  ;;  %vm1551_vm8 = vcmp.eq.f32.partialorder %v1550_v47, 8.507059e+37 }
  0xc5   : > { %4424 = vpow2.f32 %v4036_v43  ;;  %v1077_v10 = vmul.f32 %v4423_v4, %v5144_v42  ;;  %v1069_v17 = vsel %vm5181_vm11, %v5141_v41, %v1065_v7  ;;  %vm1082_vm15 = vweird.f32 %v4423_v4 }
  0xc6   : > { %4426 = vrcp.f32 %v5168_v5  ;;  %v5175_v11 = vpop.f32.mrf.mxu3  ;;  %v1074_v36 = vsel %vm5185_vm12, %v1073_v24, %v1069_v17  ;;  %vm1083_vm3 = vmor %vm1081_vm13, %vm1082_vm15  ;;  %v1560_v43 = vadd.f32 %v5161_v0, %v1559_v44  ;;  %vm1566_vm9 = vcmp.eq.f32.partialorder %v1565_v53, 8.507059e+37  ;;  %v329_v53 = vld [vmem:[%s4971_s20 + $0xc8] sm:$0xff] }
  0xc7   : > { %v1078_v18 = vsub.f32 1.0, %v1077_v10  ;;  %v1993_v54 = vmul.f32 %v1074_v36, %v5095_v62  ;;  %v1554_v10 = vsel %vm1551_vm8, %v1553_v1, %v1549_v63  ;;  %v1102_v16 = vand.u32 2147483648, %v5168_v5 }
  0xc8   : > { %v601_v20 = vpop.f32.mrf.mxu0  ;;  %v1564_v3 = vsel %vm5241_vm7, %v5161_v0, %v1560_v43  ;;  %vm1096_vm11 = vweird.f32 %v5168_v5  ;;  %v330_v43 = vld [vmem:[%s4971_s20 + $0xd0] sm:$0xff] }
  0xc9   : > { %v5201_v27 = vadd.f32 %v5055_v38, %v601_v20  ;;  %v1079_v28 = vmul.f32 %v4423_v4, %v1078_v18  ;;  %v1100_v18 = vand.u32 2147483647, %v5168_v5  ;;  %v1103_v31 = vor.u32 1.1754944e-38, %v1102_v16 }
  0xcb   : > { %v4425_v33 = vpop.eup %4424  ;;  %v4037_v34 = vmul.f32 -1.442695, %v5201_v27  ;;  %3989 = vmatmul.msk.f32.gmra.mxu0 %vm373_vm0, %v326_v22  ;;  %4023 = vmatmul.msk.f32.gmra.mxu3 %vm373_vm0, %v360_v23  ;;  %v1080_v37 = vadd.f32 %v4423_v4, %v1079_v28  ;;  %v328_v22 = vld [vmem:[%s4971_s20 + $0xc0] sm:$0xff]  ;;  %v362_v23 = vld [vmem:[%s4971_s20 + $0x1d0] sm:$0xff]  ;;  %v5284_v28 = vmul.f32 %v1554_v10, %v5075_v48 }
  0xcc   : > { %v5212_v40 = vpop.eup %4426  ;;  %v5214_v41 = vadd.f32 1.0, %v4425_v33 }
  0xcd   : > { %4428 = vpow2.f32 %v4037_v34  ;;  %v1084_v45 = vsel %vm1083_vm3, %v4423_v4, %v1080_v37  ;;  %v1092_v46 = vmul.f32 %v5212_v40, %v5168_v5  ;;  %v1568_v4 = vor.u32 1.1754944e-38, %v1567_v52  ;;  %8268 = vst [vmem:[#allocation7_spill] sm:$0xff] %v5284_v28  ;;  %v364_v52 = vld [vmem:[%s4971_s20 + $0x1e0] sm:$0xff] }
  0xce   : > { %4430 = vrcp.f32 %v5214_v41  ;;  %v5234_v50 = vpop.f32.mrf.mxu3  ;;  %v1089_v51 = vsel %vm5196_vm14, %v1088_v30, %v1084_v45  ;;  %vm1097_vm10 = vweird.f32 %v5212_v40  ;;  %v1115_v24 = vand.u32 2147483647, %v5214_v41 }
  0xcf   : > { %8262 = vst [vmem:[#allocation5_spill] sm:$0xff] %v5234_v50  ;;  %v1994_v55 = vmul.f32 %v1089_v51, %v5109_v12  ;;  %v1093_v56 = vsub.f32 1.0, %v1092_v46  ;;  %v1569_v14 = vsel %vm1566_vm9, %v1568_v4, %v1564_v3  ;;  %vm5277_vm12 = vmor %vm1096_vm11, %vm1097_vm10  ;;  %v1117_v26 = vand.u32 2147483648, %v5214_v41 }
  0xd0   : > { %v604_v59 = vpop.f32.mrf.mxu0  ;;  %v5287_v29 = vmul.f32 %v1569_v14, %v5090_v58  ;;  %vm1101_vm14 = vcmp.eq.f32.partialorder %v1100_v18, 8.507059e+37  ;;  %vm1111_vm15 = vweird.f32 %v5214_v41  ;;  %vm1116_vm2 = vcmp.eq.f32.partialorder %v1115_v24, 8.507059e+37 }
  0xd1   : > { %v5253_v62 = vadd.f32 %v5055_v38, %v604_v59  ;;  %v2056_v12 = vpack.c.bf16 %v1994_v55, %v1993_v54  ;;  %v1094_v2 = vmul.f32 %v5212_v40, %v1093_v56  ;;  %v1118_v37 = vor.u32 1.1754944e-38, %v1117_v26  ;;  %v363_v54 = vld [vmem:[%s4971_s20 + $0x1d8] sm:$0xff] }
  0xd2   : > { %8269 = vst [vmem:[#allocation8_spill] sm:$0xff] %v5287_v29  ;;  %v331_v26 = vld [vmem:[%s4971_s20 + $0xd8] sm:$0xff] }
  0xd3   : > { %v4429_v7 = vpop.eup %4428  ;;  %v4038_v35 = vmul.f32 -1.442695, %v5253_v62  ;;  %3990 = vmatmul.msk.f32.gmra.mxu0 %vm373_vm0, %v327_v8  ;;  %4024 = vmatmul.msk.f32.gmra.mxu3 %vm373_vm0, %v361_v61  ;;  %v1095_v0 = vadd.f32 %v5212_v40, %v1094_v2 }
  0xd4   : > { %v4431_v25 = vpop.eup %4430  ;;  %v5262_v9 = vadd.f32 1.0, %v4429_v7  ;;  %2168 = vmatmul.bf16.gmra.mxu1 %v2056_v12 }
  0xd5   : > { %4432 = vpow2.f32 %v4038_v35  ;;  %v1107_v13 = vmul.f32 %v4431_v25, %v5214_v41  ;;  %v1099_v5 = vsel %vm5277_vm12, %v5212_v40, %v1095_v0  ;;  %vm1112_vm13 = vweird.f32 %v4431_v25 }
  0xd6   : > { %4434 = vrcp.f32 %v5262_v9  ;;  %v5268_v15 = vpop.f32.mrf.mxu3  ;;  %v1104_v36 = vsel %vm1101_vm14, %v1103_v31, %v1099_v5  ;;  %vm1113_vm1 = vmor %vm1111_vm15, %vm1112_vm13  ;;  %v1132_v3 = vand.u32 2147483648, %v5262_v9  ;;  %vm1126_vm4 = vweird.f32 %v5262_v9  ;;  %v365_v5 = vld [vmem:[%s4971_s20 + $0x1e8] sm:$0xff] }
  0xd7   : > { %8265 = vst [vmem:[#allocation6_spill] sm:$0xff] %v5268_v15  ;;  %v1108_v19 = vsub.f32 1.0, %v1107_v13  ;;  %v1995_v41 = vmul.f32 %v1104_v36, %v5132_v32 }
  0xd8   : > { %v607_v20 = vpop.f32.mrf.mxu0 }
  0xd9   : > { %v1109_v30 = vmul.f32 %v4431_v25, %v1108_v19  ;;  %v5300_v40 = vadd.f32 %v5055_v38, %v607_v20  ;;  %v1133_v20 = vor.u32 1.1754944e-38, %v1132_v3 }
  0xdb   : > { %v4433_v34 = vpop.eup %4432  ;;  %3991 = vmatmul.msk.f32.gmra.mxu0 %vm373_vm0, %v328_v22  ;;  %4025 = vmatmul.msk.f32.gmra.mxu3 %vm373_vm0, %v362_v23  ;;  %v1110_v48 = vadd.f32 %v4431_v25, %v1109_v30  ;;  %v4039_v55 = vmul.f32 -1.442695, %v5300_v40 }
  0xdc   : > { %v5297_v58 = vpop.eup %4434  ;;  %v974_v39 = vadd.f32 1.0, %v4433_v34 }
  0xdd   : > { %v1114_v44 = vsel %vm1113_vm1, %v4431_v25, %v1110_v48  ;;  %v1122_v45 = vmul.f32 %v5297_v58, %v5262_v9  ;;  %vm1127_vm3 = vweird.f32 %v5297_v58  ;;  %v1130_v25 = vand.u32 2147483647, %v5262_v9 }
  0xde   : > { %v5304_v46 = vpop.f32.mrf.mxu3  ;;  %v1119_v42 = vsel %vm1116_vm2, %v1118_v37, %v1114_v44  ;;  %4436 = vrcp.f32 %v974_v39  ;;  %v1147_v10 = vand.u32 2147483648, %v974_v39  ;;  %vm5332_vm5 = vmor %vm1126_vm4, %vm1127_vm3  ;;  %v1145_v13 = vand.u32 2147483647, %v974_v39 }
  0xdf   : > { %v1996_v47 = vmul.f32 %v1119_v42, %v5158_v60  ;;  %v1123_v59 = vsub.f32 1.0, %v1122_v45  ;;  %4438 = vpow2.f32 %v4039_v55  ;;  %vm1141_vm7 = vweird.f32 %v974_v39 }
  0xe0   : > { %v610_v51 = vpop.f32.mrf.mxu0  ;;  %vm1131_vm8 = vcmp.eq.f32.partialorder %v1130_v25, 8.507059e+37  ;;  %v1148_v23 = vor.u32 1.1754944e-38, %v1147_v10  ;;  %vm1146_vm10 = vcmp.eq.f32.partialorder %v1145_v13, 8.507059e+37  ;;  %v334_v13 = vld [vmem:[%s4971_s20 + $0xf0] sm:$0xff] }
  0xe1   : > { %v5312_v56 = vadd.f32 %v5055_v38, %v610_v51  ;;  %v2057_v57 = vpack.c.bf16 %v1996_v47, %v1995_v41  ;;  %v1124_v60 = vmul.f32 %v5297_v58, %v1123_v59  ;;  %v366_v41 = vld [vmem:[%s4971_s20 + $0x1f0] sm:$0xff] }
  0xe3   : > { %v4040_v8 = vmul.f32 -1.442695, %v5312_v56  ;;  %3992 = vmatmul.msk.f32.gmra.mxu0 %vm373_vm0, %v329_v53  ;;  %4026 = vmatmul.msk.f32.gmra.mxu3 %vm373_vm0, %v363_v54  ;;  %v1125_v2 = vadd.f32 %v5297_v58, %v1124_v60  ;;  %v333_v60 = vld [vmem:[%s4971_s20 + $0xe8] sm:$0xff] }
  0xe4   : > { %2173 = vmatmul.bf16.gmra.mxu1 %v2057_v57  ;;  %v4437_v32 = vpop.eup %4436 }
  0xe5   : > { %v1137_v63 = vmul.f32 %v4437_v32, %v974_v39  ;;  %4440 = vpow2.f32 %v4040_v8  ;;  %v4439_v7 = vpop.eup %4438  ;;  %vm1142_vm6 = vweird.f32 %v4437_v32  ;;  %v1129_v16 = vsel %vm5332_vm5, %v5297_v58, %v1125_v2 }
  0xe6   : > { %v5318_v61 = vpop.f32.mrf.mxu3  ;;  %v5339_v18 = vadd.f32 1.0, %v4439_v7  ;;  %vm1143_vm9 = vmor %vm1141_vm7, %vm1142_vm6  ;;  %v1134_v30 = vsel %vm1131_vm8, %v1133_v20, %v1129_v16 }
  0xe7   : > { %v1138_v12 = vsub.f32 1.0, %v1137_v63  ;;  %v1997_v37 = vmul.f32 %v1134_v30, %v5201_v27  ;;  %v367_v63 = vld [vmem:[%s4971_s20 + $0x1f8] sm:$0xff] }
  0xe8   : > { %v613_v1 = vpop.f32.mrf.mxu0  ;;  %4442 = vrcp.f32 %v5339_v18  ;;  %vm1156_vm13 = vweird.f32 %v5339_v18 }
  0xe9   : > { %v1139_v4 = vmul.f32 %v4437_v32, %v1138_v12  ;;  %v5326_v35 = vadd.f32 %v5055_v38, %v613_v1 }
  0xeb   : > { %3993 = vmatmul.msk.f32.gmra.mxu0 %vm373_vm0, %v330_v43  ;;  %4027 = vmatmul.msk.f32.gmra.mxu3 %vm373_vm0, %v364_v52  ;;  %v4441_v14 = vpop.eup %4440  ;;  %v1140_v9 = vadd.f32 %v4437_v32, %v1139_v4  ;;  %v4041_v22 = vmul.f32 -1.442695, %v5326_v35 }
  0xec   : > { %v5344_v17 = vadd.f32 1.0, %v4441_v14 }
  0xed   : > { %v1144_v31 = vsel %vm1143_vm9, %v4437_v32, %v1140_v9  ;;  %4444 = vpow2.f32 %v4041_v22  ;;  %v1162_v9 = vand.u32 2147483648, %v5339_v18 }
  0xee   : > { %v5341_v19 = vpop.f32.mrf.mxu3  ;;  %v1149_v48 = vsel %vm1146_vm10, %v1148_v23, %v1144_v31  ;;  %4446 = vrcp.f32 %v5344_v17  ;;  %v5360_v45 = vpop.eup %4442  ;;  %v1177_v22 = vand.u32 2147483648, %v5344_v17  ;;  %vm1171_vm15 = vweird.f32 %v5344_v17 }
  0xef   : > { %v1998_v58 = vmul.f32 %v1149_v48, %v5253_v62  ;;  %v332_v62 = vld [vmem:[%s4971_s20 + $0xe0] sm:$0xff]  ;;  %v1152_v55 = vmul.f32 %v5360_v45, %v5339_v18  ;;  %vm1157_vm11 = vweird.f32 %v5360_v45  ;;  %v1175_v30 = vand.u32 2147483647, %v5344_v17 }
  0xf0   : > { %v616_v24 = vpop.f32.mrf.mxu0  ;;  %vm5406_vm14 = vmor %vm1156_vm13, %vm1157_vm11 }
  0xf1   : > { %v5349_v34 = vadd.f32 %v5055_v38, %v616_v24  ;;  %v2058_v39 = vpack.c.bf16 %v1998_v58, %v1997_v37  ;;  %v1153_v52 = vsub.f32 1.0, %v1152_v55  ;;  %vm1176_vm3 = vcmp.eq.f32.partialorder %v1175_v30, 8.507059e+37  ;;  %v335_v55 = vld [vmem:[%s4971_s20 + $0xf8] sm:$0xff] }
  0xf3   : > { %v4042_v36 = vmul.f32 -1.442695, %v5349_v34  ;;  %3994 = vmatmul.msk.f32.gmra.mxu0 %vm373_vm0, %v331_v26  ;;  %4028 = vmatmul.msk.f32.gmra.mxu3 %vm373_vm0, %v365_v5  ;;  %v4445_v47 = vpop.eup %4444  ;;  %v1154_v3 = vmul.f32 %v5360_v45, %v1153_v52  ;;  %v1160_v5 = vand.u32 2147483647, %v5339_v18 }
  0xf4   : > { %2178 = vmatmul.bf16.gmra.mxu1 %v2058_v39  ;;  %v4447_v51 = vpop.eup %4446  ;;  %v5374_v59 = vadd.f32 1.0, %v4445_v47  ;;  %v1163_v39 = vor.u32 1.1754944e-38, %v1162_v9 }
  0xf5   : > { %4448 = vpow2.f32 %v4042_v36  ;;  %v1167_v57 = vmul.f32 %v4447_v51, %v5344_v17  ;;  %v1155_v16 = vadd.f32 %v5360_v45, %v1154_v3  ;;  %vm1172_vm12 = vweird.f32 %v4447_v51 }
  0xf6   : > { %v5358_v44 = vpop.f32.mrf.mxu3  ;;  %vm1173_vm1 = vmor %vm1171_vm15, %vm1172_vm12  ;;  %vm1161_vm2 = vcmp.eq.f32.partialorder %v1160_v5, 8.507059e+37  ;;  %vm1186_vm7 = vweird.f32 %v5374_v59  ;;  %v1190_v9 = vand.u32 2147483647, %v5374_v59 }
  0xf7   : > { %v1168_v12 = vsub.f32 1.0, %v1167_v57  ;;  %v1159_v36 = vsel %vm5406_vm14, %v5360_v45, %v1155_v16  ;;  %v336_v16 = vld [vmem:[%s4971_s20 + $0x100] sm:$0xff] }
  0xf8   : > { %v619_v42 = vpop.f32.mrf.mxu0  ;;  %v1164_v17 = vsel %vm1161_vm2, %v1163_v39, %v1159_v36  ;;  %vm1191_vm11 = vcmp.eq.f32.partialorder %v1190_v9, 8.507059e+37 }
  0xf9   : > { %v5369_v54 = vadd.f32 %v5055_v38, %v619_v42  ;;  %v1169_v4 = vmul.f32 %v4447_v51, %v1168_v12  ;;  %v1178_v42 = vor.u32 1.1754944e-38, %v1177_v22 }
  0xfb   : > { %v4449_v53 = vpop.eup %4448  ;;  %3995 = vmatmul.msk.f32.gmra.mxu0 %vm373_vm0, %v332_v62  ;;  %4029 = vmatmul.msk.f32.gmra.mxu3 %vm373_vm0, %v366_v41  ;;  %v4043_v1 = vmul.f32 -1.442695, %v5369_v54  ;;  %v1170_v20 = vadd.f32 %v4447_v51, %v1169_v4 }
  0xfc   : > { %v5366_v27 = vadd.f32 1.0, %v4449_v53 }
  0xfd   : > { %v1174_v37 = vsel %vm1173_vm1, %v4447_v51, %v1170_v20  ;;  %v1999_v51 = vmul.f32 %v1164_v17, %v5300_v40 }
  0xfe   : > { %v5376_v8 = vpop.f32.mrf.mxu3  ;;  %4450 = vrcp.f32 %v5366_v27  ;;  %v1179_v47 = vsel %vm1176_vm3, %v1178_v42, %v1174_v37  ;;  %v1207_v40 = vand.u32 2147483648, %v5366_v27  ;;  %vm1201_vm6 = vweird.f32 %v5366_v27 }
  0xff   : > { %4452 = vrcp.f32 %v5374_v59  ;;  %v1205_v3 = vand.u32 2147483647, %v5366_v27 }
 0x100   : > { %v622_v32 = vpop.f32.mrf.mxu0  ;;  %4454 = vpow2.f32 %v4043_v1 }
 0x101   : > { %v5383_v43 = vadd.f32 %v5055_v38, %v622_v32  ;;  %v2000_v32 = vmul.f32 %v1179_v47, %v5312_v56  ;;  %vm1206_vm10 = vcmp.eq.f32.partialorder %v1205_v3, 8.507059e+37 }
 0x103   : > { %3996 = vmatmul.msk.f32.gmra.mxu0 %vm373_vm0, %v333_v60  ;;  %4030 = vmatmul.msk.f32.gmra.mxu3 %vm373_vm0, %v367_v63  ;;  %v4044_v2 = vmul.f32 -1.442695, %v5383_v43  ;;  %v2059_v1 = vpack.c.bf16 %v2000_v32, %v1999_v51 }
 0x104   : > { %v5390_v7 = vpop.eup %4450 }
 0x105   : > { %4456 = vpow2.f32 %v4044_v2  ;;  %v5394_v10 = vpop.eup %4452  ;;  %v1197_v14 = vmul.f32 %v5390_v7, %v5366_v27  ;;  %vm1202_vm4 = vweird.f32 %v5390_v7  ;;  %2183 = vmatmul.bf16.gmra.mxu1 %v2059_v1 }
 0x106   : > { %v5392_v25 = vpop.f32.mrf.mxu3  ;;  %v4455_v23 = vpop.eup %4454  ;;  %v1182_v24 = vmul.f32 %v5394_v10, %v5374_v59  ;;  %vm1187_vm5 = vweird.f32 %v5394_v10  ;;  %vm5451_vm8 = vmor %vm1201_vm6, %vm1202_vm4 }
 0x107   : > { %v1198_v48 = vsub.f32 1.0, %v1197_v14  ;;  %v5421_v41 = vadd.f32 1.0, %v4455_v23  ;;  %vm1188_vm9 = vmor %vm1186_vm7, %vm1187_vm5  ;;  %v1208_v23 = vor.u32 1.1754944e-38, %v1207_v40 }
 0x108   : > { %v625_v0 = vpop.f32.mrf.mxu0  ;;  %v1183_v62 = vsub.f32 1.0, %v1182_v24 }
 0x109   : > { %v1199_v57 = vmul.f32 %v5390_v7, %v1198_v48  ;;  %v5432_v60 = vadd.f32 %v5055_v38, %v625_v0  ;;  %v1192_v0 = vand.u32 2147483648, %v5374_v59  ;;  %vm1216_vm15 = vweird.f32 %v5421_v41 }
 0x10a   : > { %v1184_v45 = vmul.f32 %v5394_v10, %v1183_v62  ;;  %v337_v62 = vld [vmem:[%s4971_s20 + $0x108] sm:$0xff] }
 0x10b   : > { %3997 = vmatmul.msk.f32.gmra.mxu0 %vm373_vm0, %v334_v13  ;;  %v4457_v31 = vpop.eup %4456  ;;  %v1200_v63 = vadd.f32 %v5390_v7, %v1199_v57  ;;  %v4045_v4 = vmul.f32 -1.442695, %v5432_v60  ;;  %v1193_v59 = vor.u32 1.1754944e-38, %v1192_v0  ;;  %v1220_v0 = vand.u32 2147483647, %v5421_v41 }
 0x10c   : > { %v5414_v58 = vadd.f32 1.0, %v4457_v31  ;;  %v1185_v2 = vadd.f32 %v5394_v10, %v1184_v45 }
 0x10d   : > { %v1204_v27 = vsel %vm5451_vm8, %v5390_v7, %v1200_v63  ;;  %vm1221_vm3 = vcmp.eq.f32.partialorder %v1220_v0, 8.507059e+37 }
 0x10e   : > { %v5419_v18 = vpop.f32.mrf.mxu3  ;;  %4458 = vrcp.f32 %v5414_v58  ;;  %v1189_v26 = vsel %vm1188_vm9, %v5394_v10, %v1185_v2  ;;  %v1209_v5 = vsel %vm1206_vm10, %v1208_v23, %v1204_v27  ;;  %vm1231_vm13 = vweird.f32 %v5414_v58 }
 0x10f   : > { %4460 = vrcp.f32 %v5421_v41  ;;  %v1194_v30 = vsel %vm1191_vm11, %v1193_v59, %v1189_v26  ;;  %v2002_v37 = vmul.f32 %v1209_v5, %v5349_v34  ;;  %v1237_v32 = vand.u32 2147483648, %v5414_v58 }
 0x110   : > { %v628_v53 = vpop.f32.mrf.mxu0  ;;  %4462 = vpow2.f32 %v4045_v4  ;;  %v2001_v47 = vmul.f32 %v1194_v30, %v5326_v35  ;;  %v1235_v40 = vand.u32 2147483647, %v5414_v58  ;;  %v1222_v4 = vand.u32 2147483648, %v5421_v41 }
 0x111   : > { %v5437_v52 = vadd.f32 %v5055_v38, %v628_v53 }
 0x112   : > { %vm1236_vm2 = vcmp.eq.f32.partialorder %v1235_v40, 8.507059e+37  ;;  %v1223_v27 = vor.u32 1.1754944e-38, %v1222_v4 }
 0x113   : > { %3998 = vmatmul.msk.f32.gmra.mxu0 %vm373_vm0, %v335_v55  ;;  %v4046_v22 = vmul.f32 -1.442695, %v5437_v52  ;;  %v2060_v55 = vpack.c.bf16 %v2002_v37, %v2001_v47 }
 0x114   : > { %v5443_v56 = vpop.eup %4458 }
 0x115   : > { %v5456_v20 = vpop.eup %4460  ;;  %v1227_v24 = vmul.f32 %v5443_v56, %v5414_v58  ;;  %4464 = vpow2.f32 %v4046_v22  ;;  %vm1232_vm12 = vweird.f32 %v5443_v56  ;;  %2188 = vmatmul.bf16.gmra.mxu1 %v2060_v55 }
 0x116   : > { %v5441_v12 = vpop.f32.mrf.mxu3  ;;  %v1212_v7 = vmul.f32 %v5456_v20, %v5421_v41  ;;  %v4463_v36 = vpop.eup %4462  ;;  %vm1233_vm14 = vmor %vm1231_vm13, %vm1232_vm12 }
 0x117   : > { %v1228_v31 = vsub.f32 1.0, %v1227_v24  ;;  %v5474_v10 = vadd.f32 1.0, %v4463_v36 }
 0x118   : > { %v631_v14 = vpop.f32.mrf.mxu0  ;;  %v1213_v39 = vsub.f32 1.0, %v1212_v7 }
 0x119   : > { %v1229_v53 = vmul.f32 %v5443_v56, %v1228_v31  ;;  %4466 = vrcp.f32 %v5474_v10  ;;  %v5485_v34 = vadd.f32 %v5055_v38, %v631_v14  ;;  %v1238_v14 = vor.u32 1.1754944e-38, %v1237_v32 }
 0x11a   : > { %v1214_v57 = vmul.f32 %v5456_v20, %v1213_v39  ;;  %v1252_v55 = vand.u32 2147483648, %v5474_v10  ;;  %vm1246_vm8 = vweird.f32 %v5474_v10 }
 0x11b   : > { %3999 = vmatmul.msk.f32.gmra.mxu0 %vm373_vm0, %v336_v16  ;;  %v4465_v17 = vpop.eup %4464  ;;  %v1230_v51 = vadd.f32 %v5443_v56, %v1229_v53  ;;  %v4047_v2 = vmul.f32 -1.442695, %v5485_v34 }
 0x11c   : > { %v5482_v45 = vadd.f32 1.0, %v4465_v17  ;;  %v1215_v1 = vadd.f32 %v5456_v20, %v1214_v57 }
 0x11d   : > { %v1234_v13 = vsel %vm1233_vm14, %v5443_v56, %v1230_v51 }
 0x11e   : > { %v5471_v48 = vpop.f32.mrf.mxu3  ;;  %4468 = vrcp.f32 %v5482_v45  ;;  %v1239_v22 = vsel %vm1236_vm2, %v1238_v14, %v1234_v13  ;;  %v1267_v47 = vand.u32 2147483648, %v5482_v45  ;;  %vm1261_vm6 = vweird.f32 %v5482_v45 }
 0x11f   : > { %8276 = vst [vmem:[#allocation9_spill] sm:$0xff] %v5471_v48  ;;  %v5494_v63 = vpop.eup %4466  ;;  %4470 = vpow2.f32 %v4047_v2  ;;  %v2004_v59 = vmul.f32 %v1239_v22, %v5383_v43  ;;  %v1265_v43 = vand.u32 2147483647, %v5482_v45  ;;  %v1253_v13 = vor.u32 1.1754944e-38, %v1252_v55 }
 0x120   : > { %v634_v42 = vpop.f32.mrf.mxu0  ;;  %v1242_v16 = vmul.f32 %v5494_v63, %v5474_v10  ;;  %vm1247_vm5 = vweird.f32 %v5494_v63  ;;  %v1268_v40 = vor.u32 1.1754944e-38, %v1267_v47 }
 0x121   : > { %v5509_v24 = vadd.f32 %v5055_v38, %v634_v42  ;;  %vm1248_vm9 = vmor %vm1246_vm8, %vm1247_vm5  ;;  %vm1266_vm10 = vcmp.eq.f32.partialorder %v1265_v43, 8.507059e+37  ;;  %v5567_v43 = vld [vmem:[%s8211_s2] ss:$0 sm:$0xff] }
 0x122   : > { %v1243_v56 = vsub.f32 1.0, %v1242_v16  ;;  %v5548_v16 = vld [vmem:[%s8213_s4] ss:$0 sm:$0xff] }
 0x123   : > { %4000 = vmatmul.msk.f32.gmra.mxu0 %vm373_vm0, %v337_v62  ;;  %vm1217_vm0 = vweird.f32 %v5456_v20  ;;  %v4048_v36 = vmul.f32 -1.442695, %v5509_v24 }
 0x124   : > { %vm1218_vm1 = vmor %vm1216_vm15, %vm1217_vm0  ;;  %v4469_v9 = vpop.eup %4468  ;;  %v1244_v37 = vmul.f32 %v5494_v63, %v1243_v56 }
 0x125   : > { %v1219_v58 = vsel %vm1218_vm1, %v5456_v20, %v1215_v1  ;;  %v1257_v23 = vmul.f32 %v4469_v9, %v5482_v45  ;;  %v4471_v20 = vpop.eup %4470  ;;  %4472 = vpow2.f32 %v4048_v36  ;;  %vm1262_vm4 = vweird.f32 %v4469_v9 }
 0x126   : > { %v5490_v35 = vpop.f32.mrf.mxu3  ;;  %v1224_v41 = vsel %vm1221_vm3, %v1223_v27, %v1219_v58  ;;  %v5517_v62 = vadd.f32 1.0, %v4471_v20  ;;  %v1245_v53 = vadd.f32 %v5494_v63, %v1244_v37  ;;  %vm5531_vm7 = vmor %vm1261_vm6, %vm1262_vm4  ;;  %v1250_v1 = vand.u32 2147483647, %v5474_v10 }
 0x127   : > { %8277 = vst [vmem:[#allocation10_spill] sm:$0xff] %v5490_v35  ;;  %v1258_v26 = vsub.f32 1.0, %v1257_v23  ;;  %v2003_v31 = vmul.f32 %v1224_v41, %v5369_v54 }
 0x128   : > { %v637_v3 = vpop.f32.mrf.mxu0  ;;  %4474 = vrcp.f32 %v5517_v62  ;;  %vm1251_vm11 = vcmp.eq.f32.partialorder %v1250_v1, 8.507059e+37  ;;  %vm1276_vm15 = vweird.f32 %v5517_v62 }
 0x129   : > { %v1259_v30 = vmul.f32 %v4469_v9, %v1258_v26  ;;  %v2061_v39 = vpack.c.bf16 %v2004_v59, %v2003_v31  ;;  %v5520_v17 = vadd.f32 %v5055_v38, %v637_v3  ;;  %v1249_v3 = vsel %vm1248_vm9, %v5494_v63, %v1245_v53 }
 0x12a   : > { %v1254_v10 = vsel %vm1251_vm11, %v1253_v13, %v1249_v3  ;;  %v1280_v3 = vand.u32 2147483647, %v5517_v62 }
 0x12b   : > { %v1260_v42 = vadd.f32 %v4469_v9, %v1259_v30  ;;  %2193 = vmatmul.bf16.gmra.mxu1 %v2061_v39  ;;  %v4049_v51 = vmul.f32 -1.442695, %v5520_v17  ;;  %v2005_v22 = vmul.f32 %v1254_v10, %v5432_v60 }
 0x12c   : > { %vm1281_vm3 = vcmp.eq.f32.partialorder %v1280_v3, 8.507059e+37 }
 0x12d   : > { %v1264_v45 = vsel %vm5531_vm7, %v4469_v9, %v1260_v42  ;;  %4476 = vpow2.f32 %v4049_v51 }
 0x12e   : > { %v5512_v5 = vpop.f32.mrf.mxu3  ;;  %v1269_v14 = vsel %vm1266_vm10, %v1268_v40, %v1264_v45  ;;  %v1282_v40 = vand.u32 2147483648, %v5517_v62 }
 0x12f   : > { %8278 = vst [vmem:[#allocation11_spill] sm:$0xff] %v5512_v5  ;;  %v2006_v58 = vmul.f32 %v1269_v14, %v5437_v52 }
 0x130   : > { %v640_v7 = vpop.f32.mrf.mxu0 }
 0x131   : > { %v5528_v54 = vadd.f32 %v5055_v38, %v640_v7  ;;  %v4473_v38 = vpop.eup %4472  ;;  %v2062_v7 = vpack.c.bf16 %v2006_v58, %v2005_v22  ;;  %v1283_v22 = vor.u32 1.1754944e-38, %v1282_v40 }
 0x132   : > { %v984_v4 = vadd.f32 1.0, %v4473_v38  ;;  %v4475_v9 = vpop.eup %4474 }
 0x133   : > { %v4050_v0 = vmul.f32 -1.442695, %v5528_v54  ;;  %v4477_v63 = vpop.eup %4476  ;;  %v1272_v41 = vmul.f32 %v4475_v9, %v5517_v62  ;;  %vm1277_vm13 = vweird.f32 %v4475_v9 }
 0x134   : > { %4478 = vrcp.f32 %v984_v4  ;;  %v5556_v59 = vadd.f32 1.0, %v4477_v63  ;;  %v1297_v51 = vand.u32 2147483648, %v984_v4  ;;  %vm1291_vm0 = vweird.f32 %v984_v4  ;;  %vm1278_vm1 = vmor %vm1276_vm15, %vm1277_vm13 }
 0x135   : > { %4480 = vpow2.f32 %v4050_v0  ;;  %v1273_v31 = vsub.f32 1.0, %v1272_v41  ;;  %v1295_v45 = vand.u32 2147483647, %v984_v4 }
 0x136   : > { %v5541_v2 = vpop.f32.mrf.mxu3  ;;  %4482 = vrcp.f32 %v5556_v59  ;;  %v1298_v10 = vor.u32 1.1754944e-38, %v1297_v51  ;;  %v1312_v3 = vand.u32 2147483648, %v5556_v59  ;;  %vm1306_vm8 = vweird.f32 %v5556_v59 }
 0x137   : > { %8281 = vst [vmem:[#allocation12_spill] sm:$0xff] %v5541_v2  ;;  %v1274_v42 = vmul.f32 %v4475_v9, %v1273_v31  ;;  %vm1296_vm2 = vcmp.eq.f32.partialorder %v1295_v45, 8.507059e+37 }
 0x138   : > { %v643_v32 = vpop.f32.mrf.mxu0 }
 0x139   : > { %v5570_v47 = vadd.f32 %v5567_v43, %v643_v32  ;;  %v1275_v1 = vadd.f32 %v4475_v9, %v1274_v42 }
 0x13a   : > { %v4479_v26 = vpop.eup %4478 }
 0x13b   : > { %v1287_v30 = vmul.f32 %v4479_v26, %v984_v4  ;;  %v4481_v52 = vpop.eup %4480  ;;  %2198 = vmatmul.bf16.gmra.mxu1 %v2062_v7  ;;  %vm1292_vm12 = vweird.f32 %v4479_v26  ;;  %v4051_v32 = vmul.f32 -1.442695, %v5570_v47  ;;  %v1279_v4 = vsel %vm1278_vm1, %v4475_v9, %v1275_v1 }
 0x13c   : > { %v5562_v37 = vadd.f32 1.0, %v4481_v52  ;;  %v5575_v57 = vpop.eup %4482  ;;  %vm1293_vm14 = vmor %vm1291_vm0, %vm1292_vm12  ;;  %v1284_v7 = vsel %vm1281_vm3, %v1283_v22, %v1279_v4 }
 0x13d   : > { %v1288_v36 = vsub.f32 1.0, %v1287_v30  ;;  %v1302_v13 = vmul.f32 %v5575_v57, %v5556_v59  ;;  %vm1307_vm5 = vweird.f32 %v5575_v57 }
 0x13e   : > { %v5558_v20 = vpop.f32.mrf.mxu3  ;;  %4484 = vrcp.f32 %v5562_v37  ;;  %v1327_v40 = vand.u32 2147483648, %v5562_v37  ;;  %vm1321_vm6 = vweird.f32 %v5562_v37  ;;  %vm5621_vm9 = vmor %vm1306_vm8, %vm1307_vm5 }
 0x13f   : > { %8282 = vst [vmem:[#allocation13_spill] sm:$0xff] %v5558_v20  ;;  %v1289_v60 = vmul.f32 %v4479_v26, %v1288_v36  ;;  %4486 = vpow2.f32 %v4051_v32  ;;  %v1303_v62 = vsub.f32 1.0, %v1302_v13  ;;  %v2007_v36 = vmul.f32 %v1284_v7, %v5485_v34 }
 0x140   : > { %v646_v27 = vpop.f32.mrf.mxu0  ;;  %v1328_v22 = vor.u32 1.1754944e-38, %v1327_v40 }
 0x141   : > { %v2164_v23 = vpop.f32.mrf.mxu1  ;;  %v1290_v55 = vadd.f32 %v4479_v26, %v1289_v60  ;;  %v5586_v63 = vadd.f32 %v5567_v43, %v646_v27  ;;  %v1304_v60 = vmul.f32 %v5575_v57, %v1303_v62 }
 0x142   : > { %v5554_v56 = vadd.f32 %v5548_v16, %v2164_v23 }
 0x143   : > { %v1294_v0 = vsel %vm1293_vm14, %v4479_v26, %v1290_v55  ;;  %v5591_v26 = vadd.f32 %v5567_v43, %v5102_v6  ;;  %v4052_v31 = vmul.f32 -1.442695, %v5586_v63  ;;  %v1305_v32 = vadd.f32 %v5575_v57, %v1304_v60 }
 0x144   : > { %2324 = vadd.xlane.f32.xlu0 %v5554_v56  ;;  %v4485_v58 = vpop.eup %4484  ;;  %v1299_v23 = vsel %vm1296_vm2, %v1298_v10, %v1294_v0  ;;  %v1310_v10 = vand.u32 2147483647, %v5556_v59 }
 0x145   : > { %v1317_v41 = vmul.f32 %v4485_v58, %v5562_v37  ;;  %v2008_v9 = vmul.f32 %v1299_v23, %v5509_v24  ;;  %v4487_v51 = vpop.eup %4486  ;;  %v4067_v6 = vmul.f32 -1.442695, %v5591_v26  ;;  %vm1322_vm4 = vweird.f32 %v4485_v58 }
 0x146   : > { %v5577_v38 = vpop.f32.mrf.mxu3  ;;  %4488 = vpow2.f32 %v4052_v31  ;;  %v1325_v24 = vand.u32 2147483647, %v5562_v37  ;;  %v5607_v34 = vadd.f32 1.0, %v4487_v51  ;;  %vm5610_vm7 = vmor %vm1321_vm6, %vm1322_vm4  ;;  %v1309_v59 = vsel %vm5621_vm9, %v5575_v57, %v1305_v32 }
 0x147   : > { %8283 = vst [vmem:[#allocation14_spill] sm:$0xff] %v5577_v38  ;;  %v1318_v30 = vsub.f32 1.0, %v1317_v41  ;;  %v2063_v45 = vpack.c.bf16 %v2008_v9, %v2007_v36  ;;  %4490 = vpow2.f32 %v4067_v6  ;;  %v1313_v9 = vor.u32 1.1754944e-38, %v1312_v3 }
 0x148   : > { %v649_v39 = vpop.f32.mrf.mxu0  ;;  %vm1326_vm10 = vcmp.eq.f32.partialorder %v1325_v24, 8.507059e+37  ;;  %4492 = vrcp.f32 %v5607_v34  ;;  %vm1311_vm11 = vcmp.eq.f32.partialorder %v1310_v10, 8.507059e+37  ;;  %v5661_v24 = vadd.f32 %v5567_v43, %v5149_v49 }
 0x149   : > { %v5572_v53 = vpop.f32.mrf.mxu1  ;;  %v1319_v27 = vmul.f32 %v4485_v58, %v1318_v30  ;;  %v5615_v13 = vadd.f32 %v5567_v43, %v649_v39  ;;  %vm1336_vm15 = vweird.f32 %v5607_v34 }
 0x14a   : > { %v5628_v39 = vadd.f32 %v5548_v16, %v5572_v53  ;;  %8290 = vst [vmem:[#allocation17_spill] sm:$0xff] %v5661_v24 }
 0x14b   : > { %v1320_v1 = vadd.f32 %v4485_v58, %v1319_v27  ;;  %2203 = vmatmul.bf16.gmra.mxu1 %v2063_v45  ;;  %v4053_v23 = vmul.f32 -1.442695, %v5615_v13 }
 0x14c   : > { %v4489_v62 = vpop.eup %4488  ;;  %2326 = vadd.xlane.f32.xlu0 %v5628_v39 }
 0x14d   : > { %v1324_v37 = vsel %vm5610_vm7, %v4485_v58, %v1320_v1  ;;  %v5642_v53 = vadd.f32 1.0, %v4489_v62  ;;  %4494 = vpow2.f32 %v4053_v23  ;;  %v4491_v36 = vpop.eup %4490  ;;  %v4069_v23 = vmul.f32 -1.442695, %v5661_v24 }
 0x14e   : > { %v5597_v42 = vpop.f32.mrf.mxu3  ;;  %v1329_v31 = vsel %vm1326_vm10, %v1328_v22, %v1324_v37  ;;  %v5655_v51 = vpop.eup %4492  ;;  %v5667_v3 = vadd.f32 1.0, %v4491_v36 }
 0x14f   : > { %8284 = vst [vmem:[#allocation15_spill] sm:$0xff] %v5597_v42  ;;  %4496 = vrcp.f32 %v5642_v53  ;;  %v2010_v60 = vmul.f32 %v1329_v31, %v5528_v54  ;;  %v5671_v54 = vadd.f32 %v5567_v43, %v5304_v46  ;;  %v5690_v46 = vadd.f32 %v5567_v43, %v5318_v61 }
 0x150   : > { %v652_v14 = vpop.f32.mrf.mxu0  ;;  %vm1337_vm13 = vweird.f32 %v5655_v51  ;;  %vm1351_vm0 = vweird.f32 %v5642_v53  ;;  %v5765_v42 = vadd.f32 %v5567_v43, %v5341_v19  ;;  %vm1576_vm4 = vweird.f32 %v5667_v3 }
 0x151   : > { %v2169_v52 = vpop.f32.mrf.mxu1  ;;  %v5635_v58 = vadd.f32 %v5567_v43, %v652_v14  ;;  %v5651_v14 = vadd.f32 %v5567_v43, %v5118_v21  ;;  %8291 = vst [vmem:[#allocation18_spill] sm:$0xff] %v5671_v54  ;;  %vm5744_vm1 = vmor %vm1336_vm15, %vm1337_vm13 }
 0x152   : > { %v5638_v7 = vadd.f32 %v5548_v16, %v2169_v52  ;;  %v1314_v52 = vsel %vm1311_vm11, %v1313_v9, %v1309_v59  ;;  %8293 = vst [vmem:[#allocation20_spill] sm:$0xff] %v5690_v46  ;;  %v4073_v9 = vmul.f32 -1.442695, %v5671_v54 }
 0x153   : > { %v4054_v57 = vmul.f32 -1.442695, %v5635_v58  ;;  %v2009_v6 = vmul.f32 %v1314_v52, %v5520_v17  ;;  %v4495_v1 = vpop.eup %4494  ;;  %v4068_v45 = vmul.f32 -1.442695, %v5651_v14  ;;  %v1332_v17 = vmul.f32 %v5655_v51, %v5607_v34  ;;  %8301 = vst [vmem:[#allocation24_spill] sm:$0xff] %v5765_v42 }
 0x154   : > { %2328 = vadd.xlane.f32.xlu1 %v5638_v7  ;;  %v5682_v37 = vadd.f32 1.0, %v4495_v1 }
 0x155   : > { %4498 = vpow2.f32 %v4054_v57  ;;  %v2064_v21 = vpack.c.bf16 %v2010_v60, %v2009_v6  ;;  %v5665_v32 = vpop.eup %4496  ;;  %v1333_v61 = vsub.f32 1.0, %v1332_v17  ;;  %v4074_v57 = vmul.f32 -1.442695, %v5690_v46 }
 0x156   : > { %v5647_v27 = vpop.f32.mrf.mxu3  ;;  %v1347_v49 = vmul.f32 %v5665_v32, %v5642_v53  ;;  %4500 = vpow2.f32 %v4068_v45  ;;  %vm1352_vm12 = vweird.f32 %v5665_v32  ;;  %vm1366_vm10 = vweird.f32 %v5682_v37 }
 0x157   : > { %8289 = vst [vmem:[#allocation16_spill] sm:$0xff] %v5647_v27  ;;  %4502 = vrcp.f32 %v5667_v3  ;;  %v1334_v6 = vmul.f32 %v5655_v51, %v1333_v61  ;;  %v1342_v61 = vand.u32 2147483648, %v5607_v34  ;;  %vm5729_vm14 = vmor %vm1351_vm0, %vm1352_vm12 }
 0x158   : > { %v5599_v55 = vpop.f32.mrf.mxu0  ;;  %v1348_v62 = vsub.f32 1.0, %v1347_v49  ;;  %4504 = vrcp.f32 %v5682_v37  ;;  %v1357_v49 = vand.u32 2147483648, %v5642_v53 }
 0x159   : > { %v2171_v41 = vpop.f32.mrf.mxu1  ;;  %v5686_v4 = vadd.f32 %v5567_v43, %v5599_v55  ;;  %v1343_v5 = vor.u32 1.1754944e-38, %v1342_v61 }
 0x15a   : > { %v5676_v0 = vadd.f32 %v5548_v16, %v2171_v41  ;;  %v5696_v41 = vadd.f32 %v5567_v43, %v5175_v11  ;;  %v1349_v11 = vmul.f32 %v5665_v32, %v1348_v62  ;;  %v1355_v62 = vand.u32 2147483647, %v5642_v53 }
 0x15b   : > { %v4499_v22 = vpop.eup %4498  ;;  %2208 = vmatmul.bf16.gmra.mxu1 %v2064_v21  ;;  %v4055_v31 = vmul.f32 -1.442695, %v5686_v4  ;;  %v1358_v27 = vor.u32 1.1754944e-38, %v1357_v49 }
 0x15c   : > { %8292 = vst [vmem:[#allocation19_spill] sm:$0xff] %v5676_v0  ;;  %2330 = vadd.xlane.f32.xlu1 %v5676_v0  ;;  %v5698_v59 = vadd.f32 1.0, %v4499_v22  ;;  %v4070_v52 = vmul.f32 -1.442695, %v5696_v41  ;;  %v4501_v60 = vpop.eup %4500  ;;  %v1350_v45 = vadd.f32 %v5665_v32, %v1349_v11  ;;  %vm1356_vm2 = vcmp.eq.f32.partialorder %v1355_v62, 8.507059e+37 }
 0x15d   : > { %8294 = vst [vmem:[#allocation21_spill] sm:$0xff] %v5696_v41  ;;  %v5713_v1 = vpop.eup %4502  ;;  %v5750_v38 = vadd.f32 1.0, %v4501_v60 }
 0x15e   : > { %v5700_v55 = vpop.f32.mrf.mxu3  ;;  %4506 = vrcp.f32 %v5698_v59  ;;  %v5719_v17 = vpop.eup %4504  ;;  %v1354_v53 = vsel %vm5729_vm14, %v5665_v32, %v1350_v45  ;;  %v1572_v49 = vmul.f32 %v5713_v1, %v5667_v3  ;;  %vm1381_vm7 = vweird.f32 %v5698_v59 }
 0x15f   : > { %8295 = vst [vmem:[#allocation22_spill] sm:$0xff] %v5700_v55  ;;  %4508 = vpow2.f32 %v4069_v23  ;;  %v1335_v23 = vadd.f32 %v5655_v51, %v1334_v6  ;;  %v1340_v6 = vand.u32 2147483647, %v5607_v34  ;;  %v1362_v33 = vmul.f32 %v5719_v17, %v5682_v37 }
 0x160   : > { %v5640_v30 = vpop.f32.mrf.mxu0  ;;  %4510 = vpow2.f32 %v4073_v9  ;;  %v1359_v2 = vsel %vm1356_vm2, %v1358_v27, %v1354_v53  ;;  %vm1367_vm6 = vweird.f32 %v5719_v17  ;;  %vm1577_vm9 = vweird.f32 %v5713_v1 }
 0x161   : > { %v5678_v10 = vpop.f32.mrf.mxu1  ;;  %4512 = vpow2.f32 %v4055_v31  ;;  %v1339_v34 = vsel %vm5744_vm1, %v5655_v51, %v1335_v23  ;;  %vm1341_vm3 = vcmp.eq.f32.partialorder %v1340_v6, 8.507059e+37  ;;  %v1363_v28 = vsub.f32 1.0, %v1362_v33  ;;  %vm5836_vm11 = vmor %vm1366_vm10, %vm1367_vm6 }
 0x162   : > { %4514 = vpow2.f32 %v4074_v57  ;;  %v1344_v51 = vsel %vm1341_vm3, %v1343_v5, %v1339_v34  ;;  %v5769_v23 = vadd.f32 %v5567_v43, %v5640_v30  ;;  %v2012_v33 = vmul.f32 %v1359_v2, %v5586_v63  ;;  %vm5873_vm0 = vmor %vm1576_vm4, %vm1577_vm9 }
 0x163   : > { %4516 = vpow2.f32 %v4070_v52  ;;  %v2011_v19 = vmul.f32 %v1344_v51, %v5570_v47  ;;  %v1364_v5 = vmul.f32 %v5719_v17, %v1363_v28  ;;  %v1573_v30 = vsub.f32 1.0, %v1572_v49 }
 0x164   : > { %v5722_v22 = vpop.eup %4506  ;;  %4518 = vrcp.f32 %v5750_v38  ;;  %v4075_v2 = vmul.f32 -1.442695, %v5765_v42  ;;  %v4056_v63 = vmul.f32 -1.442695, %v5769_v23  ;;  %v5792_v28 = vadd.f32 %v5548_v16, %v5678_v10 }
 0x165   : > { %v4509_v9 = vpop.eup %4508  ;;  %v1377_v57 = vmul.f32 %v5722_v22, %v5698_v59  ;;  %vm1382_vm5 = vweird.f32 %v5722_v22  ;;  %v2065_v47 = vpack.c.bf16 %v2012_v33, %v2011_v19  ;;  %v1574_v10 = vmul.f32 %v5713_v1, %v1573_v30 }
 0x166   : > { %v5735_v11 = vpop.f32.mrf.mxu3  ;;  %v4511_v52 = vpop.eup %4510  ;;  %v5774_v62 = vadd.f32 1.0, %v4509_v9  ;;  %8303 = vst [vmem:[#allocation26_spill] sm:$0xff] %v5792_v28  ;;  %2332 = vadd.xlane.f32.xlu2 %v5792_v28  ;;  %vm5814_vm8 = vmor %vm1381_vm7, %vm1382_vm5  ;;  %v1370_v33 = vand.u32 2147483647, %v5682_v37  ;;  %v5832_v30 = vadd.f32 %v5567_v43, %v5358_v44 }
 0x167   : > { %8298 = vst [vmem:[#allocation23_spill] sm:$0xff] %v5735_v11  ;;  %v4513_v55 = vpop.eup %4512  ;;  %v1378_v32 = vsub.f32 1.0, %v1377_v57  ;;  %v5755_v31 = vadd.f32 1.0, %v4511_v52  ;;  %v1387_v52 = vand.u32 2147483648, %v5698_v59 }
 0x168   : > { %v5663_v40 = vpop.f32.mrf.mxu0  ;;  %v4515_v11 = vpop.eup %4514  ;;  %v5757_v29 = vadd.f32 1.0, %v4513_v55  ;;  %8306 = vst [vmem:[#allocation27_spill] sm:$0xff] %v5832_v30  ;;  %vm1371_vm13 = vcmp.eq.f32.partialorder %v1370_v33, 8.507059e+37 }
 0x169   : > { %v5717_v21 = vpop.f32.mrf.mxu1  ;;  %v4517_v45 = vpop.eup %4516  ;;  %v5761_v60 = vadd.f32 1.0, %v4515_v11  ;;  %v1379_v27 = vmul.f32 %v5722_v22, %v1378_v32  ;;  %4520 = vrcp.f32 %v5755_v31  ;;  %v1385_v11 = vand.u32 2147483647, %v5698_v59 }
 0x16a   : > { %v5776_v61 = vadd.f32 1.0, %v4517_v45  ;;  %4522 = vrcp.f32 %v5757_v29  ;;  %v5798_v6 = vadd.f32 %v5567_v43, %v5663_v40  ;;  %v5802_v34 = vpop.eup %4518  ;;  %v1365_v32 = vadd.f32 %v5719_v17, %v1364_v5 }
 0x16b   : > { %4524 = vrcp.f32 %v5761_v60  ;;  %v1380_v9 = vadd.f32 %v5722_v22, %v1379_v27  ;;  %2213 = vmatmul.bf16.gmra.mxu1 %v2065_v47  ;;  %v1372_v40 = vand.u32 2147483648, %v5682_v37  ;;  %v1582_v59 = vand.u32 2147483648, %v5667_v3 }
 0x16c   : > { %4526 = vpow2.f32 %v4056_v63  ;;  %v4057_v19 = vmul.f32 -1.442695, %v5798_v6  ;;  %vm1386_vm12 = vcmp.eq.f32.partialorder %v1385_v11, 8.507059e+37  ;;  %v1388_v37 = vor.u32 1.1754944e-38, %v1387_v52 }
 0x16d   : > { %4528 = vpow2.f32 %v4075_v2  ;;  %v1384_v27 = vsel %vm5814_vm8, %v5722_v22, %v1380_v9  ;;  %v1369_v22 = vsel %vm5836_vm11, %v5719_v17, %v1365_v32  ;;  %v5849_v44 = vadd.f32 %v5548_v16, %v5717_v21 }
 0x16e   : > { %v5785_v57 = vpop.f32.mrf.mxu3  ;;  %4530 = vpow2.f32 %v4057_v19  ;;  %v1373_v11 = vor.u32 1.1754944e-38, %v1372_v40  ;;  %v1389_v52 = vsel %vm1386_vm12, %v1388_v37, %v1384_v27  ;;  %v1575_v21 = vadd.f32 %v5713_v1, %v1574_v10 }
 0x16f   : > { %8302 = vst [vmem:[#allocation25_spill] sm:$0xff] %v5785_v57  ;;  %v5809_v45 = vpop.eup %4520  ;;  %v1580_v17 = vand.u32 2147483647, %v5667_v3  ;;  %v4076_v37 = vmul.f32 -1.442695, %v5832_v30  ;;  %2334 = vadd.xlane.f32.xlu2 %v5849_v44  ;;  %vm1666_vm1 = vweird.f32 %v5755_v31  ;;  %vm1396_vm3 = vweird.f32 %v5757_v29 }
 0x170   : > { %v5710_v36 = vpop.f32.mrf.mxu0  ;;  %v5820_v51 = vpop.eup %4522  ;;  %8309 = vst [vmem:[#allocation28_spill] sm:$0xff] %v5849_v44  ;;  %v1662_v32 = vmul.f32 %v5809_v45, %v5755_v31  ;;  %v1374_v40 = vsel %vm1371_vm13, %v1373_v11, %v1369_v22  ;;  %v1672_v11 = vand.u32 2147483648, %v5755_v31  ;;  %vm1667_vm2 = vweird.f32 %v5809_v45 }
 0x171   : > { %v2179_v55 = vpop.f32.mrf.mxu1  ;;  %v5828_v5 = vpop.eup %4524  ;;  %v5842_v63 = vadd.f32 %v5567_v43, %v5710_v36  ;;  %v1392_v36 = vmul.f32 %v5820_v51, %v5757_v29  ;;  %vm1581_vm14 = vcmp.eq.f32.partialorder %v1580_v17, 8.507059e+37  ;;  %vm1397_vm15 = vweird.f32 %v5820_v51 }
 0x172   : > { %v5852_v9 = vadd.f32 %v5548_v16, %v2179_v55  ;;  %v4527_v49 = vpop.eup %4526  ;;  %v1677_v10 = vmul.f32 %v5828_v5, %v5761_v60  ;;  %v1402_v17 = vand.u32 2147483648, %v5757_v29  ;;  %vm5951_vm5 = vmor %vm1396_vm3, %vm1397_vm15  ;;  %vm1681_vm10 = vweird.f32 %v5761_v60 }
 0x173   : > { %v4058_v57 = vmul.f32 -1.442695, %v5842_v63  ;;  %v5857_v2 = vadd.f32 1.0, %v4527_v49  ;;  %v4529_v55 = vpop.eup %4528  ;;  %v1393_v22 = vsub.f32 1.0, %v1392_v36  ;;  %v5897_v36 = vmul.f32 %v5802_v34, %v5750_v38 }
 0x174   : > { %8310 = vst [vmem:[#allocation29_spill] sm:$0xff] %v5852_v9  ;;  %2336 = vadd.xlane.f32.xlu0 %v5852_v9  ;;  %v4531_v49 = vpop.eup %4530  ;;  %vm1682_vm13 = vweird.f32 %v5828_v5 }
 0x175   : > { %4532 = vpow2.f32 %v4058_v57  ;;  %v2014_v57 = vmul.f32 %v1389_v52, %v5635_v58  ;;  %v1579_v58 = vsel %vm5873_vm0, %v5713_v1, %v1575_v21  ;;  %v1663_v52 = vsub.f32 1.0, %v1662_v32  ;;  %vm6006_vm0 = vmor %vm1666_vm1, %vm1667_vm2 }
 0x176   : > { %v5864_v27 = vpop.f32.mrf.mxu3  ;;  %4534 = vrcp.f32 %v5857_v2  ;;  %v5893_v44 = vadd.f32 1.0, %v4531_v49  ;;  %v5906_v32 = vor.u32 1.1754944e-38, %v1672_v11  ;;  %v1415_v42 = vand.u32 2147483647, %v5857_v2  ;;  %vm6020_vm3 = vmor %vm1681_vm10, %vm1682_vm13 }
 0x177   : > { %8311 = vst [vmem:[#allocation30_spill] sm:$0xff] %v5864_v27  ;;  %4536 = vrcp.f32 %v5774_v62  ;;  %v2013_v27 = vmul.f32 %v1374_v40, %v5615_v13  ;;  %v1394_v40 = vmul.f32 %v5820_v51, %v1393_v22  ;;  %vm1411_vm6 = vweird.f32 %v5857_v2 }
 0x178   : > { %v5748_v20 = vpop.f32.mrf.mxu0  ;;  %4538 = vrcp.f32 %v5776_v61  ;;  %vm1416_vm8 = vcmp.eq.f32.partialorder %v1415_v42, 8.507059e+37  ;;  %v6107_v42 = vadd.f32 %v5567_v43, %v5419_v18  ;;  %vm1591_vm10 = vweird.f32 %v5750_v38 }
 0x179   : > { %v2181_v47 = vpop.f32.mrf.mxu1  ;;  %4540 = vpow2.f32 %v4076_v37  ;;  %v2066_v9 = vpack.c.bf16 %v2014_v57, %v2013_v27  ;;  %v1685_v27 = vand.u32 2147483647, %v5761_v60  ;;  %v1687_v37 = vand.u32 2147483648, %v5761_v60 }
 0x17a   : > { %v5867_v19 = vadd.f32 %v5548_v16, %v2181_v47  ;;  %v1583_v47 = vor.u32 1.1754944e-38, %v1582_v59  ;;  %v1678_v59 = vsub.f32 1.0, %v1677_v10  ;;  %4542 = vrcp.f32 %v5893_v44 }
 0x17b   : > { %v4533_v13 = vpop.eup %4532  ;;  %2218 = vmatmul.bf16.gmra.mxu1 %v2066_v9  ;;  %vm5991_vm12 = vcmp.eq.f32.partialorder %v1685_v27, 8.507059e+37 }
 0x17c   : > { %8312 = vst [vmem:[#allocation31_spill] sm:$0xff] %v5867_v19  ;;  %2338 = vadd.xlane.f32.xlu1 %v5867_v19  ;;  %v5899_v19 = vadd.f32 1.0, %v4529_v55  ;;  %v5903_v1 = vsel %vm1581_vm14, %v1583_v47, %v1579_v58  ;;  %v4535_v21 = vpop.eup %4534  ;;  %v5908_v33 = vadd.f32 1.0, %v4533_v13  ;;  %v5912_v55 = vadd.f32 %v5567_v43, %v5748_v20 }
 0x17d   : > { %v5914_v10 = vpop.eup %4536  ;;  %v1407_v57 = vmul.f32 %v4535_v21, %v5857_v2  ;;  %v1664_v47 = vmul.f32 %v5809_v45, %v1663_v52  ;;  %v1679_v49 = vmul.f32 %v5828_v5, %v1678_v59  ;;  %v5925_v20 = vadd.f32 %v5567_v43, %v5376_v8 }
 0x17e   : > { %4544 = vrcp.f32 %v5899_v19  ;;  %v5927_v11 = vpop.eup %4538  ;;  %v1395_v58 = vadd.f32 %v5820_v51, %v1394_v40  ;;  %v769_v22 = vpop.f32.mrf.mxu3  ;;  %v1417_v8 = vand.u32 2147483648, %v5857_v2  ;;  %v4059_v9 = vmul.f32 -1.442695, %v5912_v55 }
 0x17f   : > { %8315 = vst [vmem:[#allocation32_spill] sm:$0xff] %v5925_v20  ;;  %v1408_v13 = vsub.f32 1.0, %v1407_v57  ;;  %4546 = vrcp.f32 %v5908_v33  ;;  %v4541_v59 = vpop.eup %4540  ;;  %v5940_v40 = vadd.f32 %v5567_v43, %v769_v22  ;;  %vm1412_vm4 = vweird.f32 %v4535_v21 }
 0x180   : > { %v5800_v53 = vpop.f32.mrf.mxu0  ;;  %v5942_v57 = vpop.eup %4542  ;;  %v4077_v48 = vmul.f32 -1.442695, %v5925_v20  ;;  %v1400_v22 = vand.u32 2147483647, %v5757_v29  ;;  %v5962_v50 = vadd.f32 1.0, %v4541_v59  ;;  %v1399_v20 = vsel %vm5951_vm5, %v5820_v51, %v1395_v58  ;;  %vm1413_vm7 = vmor %vm1411_vm6, %vm1412_vm4 }
 0x181   : > { %v1409_v28 = vmul.f32 %v4535_v21, %v1408_v13  ;;  %v1422_v15 = vmul.f32 %v5942_v57, %v5893_v44  ;;  %v5960_v13 = vadd.f32 %v5567_v43, %v5800_v53  ;;  %v1418_v29 = vor.u32 1.1754944e-38, %v1417_v8 }
 0x182   : > { %v5932_v52 = vpop.f32.mrf.mxu1  ;;  %4548 = vpow2.f32 %v4059_v9  ;;  %v4093_v41 = vmul.f32 -1.442695, %v5940_v40  ;;  %v5975_v53 = vadd.f32 %v5567_v43, %v5392_v25  ;;  %v1403_v59 = vor.u32 1.1754944e-38, %v1402_v17 }
 0x183   : > { %v1410_v0 = vadd.f32 %v4535_v21, %v1409_v28  ;;  %v1423_v46 = vsub.f32 1.0, %v1422_v15  ;;  %vm1401_vm9 = vcmp.eq.f32.partialorder %v1400_v22, 8.507059e+37  ;;  %v4060_v2 = vmul.f32 -1.442695, %v5960_v13 }
 0x184   : > { %v5968_v54 = vpop.eup %4544  ;;  %4550 = vpow2.f32 %v4077_v48  ;;  %v1404_v15 = vsel %vm1401_vm9, %v1403_v59, %v1399_v20  ;;  %v1665_v25 = vadd.f32 %v5809_v45, %v1664_v47  ;;  %v1688_v17 = vor.u32 1.1754944e-38, %v1687_v37 }
 0x185   : > { %v5971_v24 = vpop.eup %4546  ;;  %v1414_v35 = vsel %vm1413_vm7, %v4535_v21, %v1410_v0  ;;  %v1424_v58 = vmul.f32 %v5942_v57, %v1423_v46  ;;  %v8318_v0 = vand.u32 2147483647, %v5755_v31  ;;  %4552 = vpow2.f32 %v4093_v41 }
 0x186   : > { %v1419_v28 = vsel %vm1416_vm8, %v1418_v29, %v1414_v35  ;;  %v1437_v51 = vmul.f32 %v5971_v24, %v5908_v33  ;;  %v1680_v48 = vadd.f32 %v5828_v5, %v1679_v49  ;;  %4554 = vrcp.f32 %v5962_v50  ;;  %v772_v29 = vpop.f32.mrf.mxu3 }
 0x187   : > { %vm5987_vm11 = vcmp.eq.f32.partialorder %v8318_v0, 8.507059e+37  ;;  %v2016_v46 = vmul.f32 %v1419_v28, %v5769_v23  ;;  %v4078_v20 = vmul.f32 -1.442695, %v5975_v53  ;;  %v2015_v22 = vmul.f32 %v1404_v15, %v5686_v4 }
 0x188   : > { %v5885_v3 = vpop.f32.mrf.mxu0  ;;  %v1438_v9 = vsub.f32 1.0, %v1437_v51  ;;  %v4549_v47 = vpop.eup %4548  ;;  %4556 = vpow2.f32 %v4060_v2  ;;  %v1425_v37 = vadd.f32 %v5942_v57, %v1424_v58  ;;  %vm1426_vm14 = vweird.f32 %v5893_v44 }
 0x189   : > { %vm1427_vm15 = vweird.f32 %v5942_v57  ;;  %v1432_v4 = vand.u32 2147483648, %v5893_v44  ;;  %vm1442_vm1 = vweird.f32 %v5971_v24  ;;  %v6026_v59 = vadd.f32 1.0, %v4549_v47 }
 0x18a   : > { %v5982_v8 = vpop.f32.mrf.mxu1  ;;  %v1439_v27 = vmul.f32 %v5971_v24, %v1438_v9  ;;  %v6030_v35 = vadd.f32 %v5548_v16, %v5932_v52  ;;  %v6032_v28 = vpop.eup %4550  ;;  %v1430_v51 = vand.u32 2147483647, %v5893_v44  ;;  %v1447_v60 = vand.u32 2147483648, %v5908_v33  ;;  %vm6046_vm2 = vmor %vm1426_vm14, %vm1427_vm15 }
 0x18b   : > { %v2067_v2 = vpack.c.bf16 %v2016_v46, %v2015_v22  ;;  %v6037_v15 = vadd.f32 %v5567_v43, %v772_v29  ;;  %v4553_v58 = vpop.eup %4552  ;;  %v1669_v0 = vsel %vm6006_vm0, %v5809_v45, %v1665_v25  ;;  %vm1441_vm4 = vweird.f32 %v5908_v33 }
 0x18c   : > { %v1440_v49 = vadd.f32 %v5971_v24, %v1439_v27  ;;  %v1445_v9 = vand.u32 2147483647, %v5908_v33  ;;  %4558 = vrcp.f32 %v6026_v59  ;;  %2340 = vadd.xlane.f32.xlu2 %v6030_v35  ;;  %v6054_v46 = vpop.eup %4554  ;;  %v1684_v45 = vsel %vm6020_vm3, %v5828_v5, %v1680_v48  ;;  %vm6068_vm5 = vmor %vm1441_vm4, %vm1442_vm1 }
 0x18d   : > { %v6061_v44 = vmul.f32 %v5968_v54, %v5899_v19  ;;  %4560 = vpow2.f32 %v4078_v20  ;;  %v1429_v25 = vsel %vm6046_vm2, %v5942_v57, %v1425_v37  ;;  %2223 = vmatmul.bf16.gmra.mxu1 %v2067_v2  ;;  %v1433_v27 = vor.u32 1.1754944e-38, %v1432_v4 }
 0x18e   : > { %v4557_v22 = vpop.eup %4556  ;;  %v1444_v5 = vsel %vm6068_vm5, %v5971_v24, %v1440_v49  ;;  %v6075_v48 = vadd.f32 1.0, %v4553_v58  ;;  %v4094_v20 = vmul.f32 -1.442695, %v6037_v15  ;;  %vm1431_vm6 = vcmp.eq.f32.partialorder %v1430_v51, 8.507059e+37 }
 0x18f   : > { %v1448_v57 = vor.u32 1.1754944e-38, %v1447_v60  ;;  %v6078_v29 = vadd.f32 1.0, %v4557_v22  ;;  %v8331_v41 = vsub.f32 1.0, %v5897_v36  ;;  %v1434_v31 = vsel %vm1431_vm6, %v1433_v27, %v1429_v25 }
 0x190   : > { %v5946_v30 = vpop.f32.mrf.mxu0  ;;  %vm1446_vm7 = vcmp.eq.f32.partialorder %v1445_v9, 8.507059e+37  ;;  %4562 = vrcp.f32 %v6075_v48  ;;  %v6086_v4 = vadd.f32 %v5567_v43, %v5885_v3  ;;  %v6091_v24 = vsel %vm5987_vm11, %v5906_v32, %v1669_v0 }
 0x191   : > { %v1589_v37 = vmul.f32 %v5802_v34, %v8331_v41  ;;  %v6095_v49 = vsel %vm5991_vm12, %v1688_v17, %v1684_v45  ;;  %v1449_v36 = vsel %vm1446_vm7, %v1448_v57, %v1444_v5  ;;  %4564 = vrcp.f32 %v6078_v29 }
 0x192   : > { %v2189_v47 = vpop.f32.mrf.mxu1  ;;  %v6098_v51 = vpop.eup %4558  ;;  %v6103_v3 = vmul.f32 %v6054_v46, %v5962_v50  ;;  %4566 = vpow2.f32 %v4094_v20  ;;  %v2017_v21 = vmul.f32 %v1434_v31, %v5798_v6  ;;  %vm1456_vm8 = vweird.f32 %v6026_v59 }
 0x193   : > { %v6109_v32 = vpop.eup %4560  ;;  %v1452_v17 = vmul.f32 %v6098_v51, %v6026_v59  ;;  %v6116_v58 = vadd.f32 %v5802_v34, %v1589_v37  ;;  %v2018_v0 = vmul.f32 %v1449_v36, %v5842_v63  ;;  %v1460_v52 = vand.u32 2147483647, %v6026_v59 }
 0x194   : > { %v4061_v18 = vmul.f32 -1.442695, %v6086_v4  ;;  %v6123_v9 = vadd.f32 %v5548_v16, %v5982_v8  ;;  %v1462_v45 = vand.u32 2147483648, %v6026_v59  ;;  %v6128_v25 = vadd.f32 %v5567_v43, %v5946_v30 }
 0x195   : > { %v1453_v6 = vsub.f32 1.0, %v1452_v17  ;;  %v6131_v33 = vadd.f32 %v5548_v16, %v2189_v47  ;;  %vm1966_vm9 = vweird.f32 %v6075_v48  ;;  %vm1592_vm11 = vweird.f32 %v5802_v34 }
 0x196   : > { %v6133_v63 = vpop.eup %4562  ;;  %4568 = vpow2.f32 %v4061_v18  ;;  %2342 = vadd.xlane.f32.xlu0 %v6123_v9  ;;  %v4062_v57 = vmul.f32 -1.442695, %v6128_v25  ;;  %vm1457_vm12 = vweird.f32 %v6098_v51  ;;  %v2068_v41 = vpack.c.bf16 %v2018_v0, %v2017_v21  ;;  %vm6220_vm6 = vmor %vm1591_vm10, %vm1592_vm11 }
 0x197   : > { %8332 = vst [vmem:[#allocation33_spill] sm:$0xff] %v6131_v33  ;;  %v4565_v30 = vpop.eup %4564  ;;  %v1454_v47 = vmul.f32 %v6098_v51, %v1453_v6  ;;  %v1962_v20 = vmul.f32 %v6133_v63, %v6075_v48  ;;  %2344 = vadd.xlane.f32.xlu1 %v6131_v33  ;;  %vm1967_vm13 = vweird.f32 %v6133_v63  ;;  %v1970_v21 = vand.u32 2147483647, %v6075_v48  ;;  %vm6171_vm0 = vmor %vm1456_vm8, %vm1457_vm12 }
 0x198   : > { %v6014_v23 = vpop.f32.mrf.mxu0  ;;  %4570 = vpow2.f32 %v4062_v57  ;;  %v1972_v0 = vand.u32 2147483648, %v6075_v48  ;;  %vm6175_vm14 = vcmp.eq.f32.partialorder %v1460_v52, 8.507059e+37  ;;  %vm1472_vm15 = vweird.f32 %v4565_v30  ;;  %vm6183_vm3 = vmor %vm1966_vm9, %vm1967_vm13 }
 0x199   : > { %v6138_v8 = vadd.f32 %v5567_v43, %v6014_v23  ;;  %v4567_v23 = vpop.eup %4566  ;;  %v1963_v31 = vsub.f32 1.0, %v1962_v20  ;;  %v1475_v59 = vand.u32 2147483647, %v6078_v29  ;;  %vm1471_vm1 = vweird.f32 %v6078_v29 }
 0x19a   : > { %v2191_v22 = vpop.f32.mrf.mxu1  ;;  %v6158_v36 = vadd.f32 1.0, %v4567_v23  ;;  %v1477_v23 = vand.u32 2147483648, %v6078_v29  ;;  %vm6197_vm2 = vcmp.eq.f32.partialorder %v1970_v21, 8.507059e+37  ;;  %vm1473_vm4 = vmor %vm1471_vm1, %vm1472_vm15 }
 0x19b   : > { %v6141_v27 = vadd.f32 %v5548_v16, %v2191_v22  ;;  %v4063_v37 = vmul.f32 -1.442695, %v6138_v8  ;;  %v1964_v6 = vmul.f32 %v6133_v63, %v1963_v31  ;;  %vm1476_vm5 = vcmp.eq.f32.partialorder %v1475_v59, 8.507059e+37 }
 0x19c   : > { %v4569_v22 = vpop.eup %4568  ;;  %vm1981_vm7 = vweird.f32 %v6158_v36 }
 0x19d   : > { %8333 = vst [vmem:[#allocation34_spill] sm:$0xff] %v6141_v27  ;;  %2346 = vadd.xlane.f32.xlu2 %v6141_v27  ;;  %4572 = vpow2.f32 %v4063_v37  ;;  %v6188_v31 = vadd.f32 1.0, %v4569_v22  ;;  %2228 = vmatmul.bf16.gmra.mxu1 %v2068_v41  ;;  %v1463_v27 = vor.u32 1.1754944e-38, %v1462_v45  ;;  %v1973_v22 = vor.u32 1.1754944e-38, %v1972_v0 }
 0x19e   : > { %4574 = vrcp.f32 %v6158_v36 }
 0x19f   : > { %vm1486_vm11 = vweird.f32 %v6188_v31 }
 0x1a0   : > { %v682_v2 = vpop.f32.mrf.mxu0 }
 0x1a1   : > { %v6144_v5 = vadd.f32 %v5567_v43, %v682_v2  ;;  %v1467_v43 = vmul.f32 %v4565_v30, %v6078_v29  ;;  %v1455_v2 = vadd.f32 %v6098_v51, %v1454_v47  ;;  %v1490_v47 = vand.u32 2147483647, %v6188_v31 }
 0x1a3   : > { %v4064_v17 = vmul.f32 -1.442695, %v6144_v5  ;;  %v1468_v18 = vsub.f32 1.0, %v1467_v43  ;;  %v1965_v43 = vadd.f32 %v6133_v63, %v1964_v6  ;;  %v4571_v6 = vpop.eup %4570  ;;  %vm6257_vm12 = vcmp.eq.f32.partialorder %v1490_v47, 8.507059e+37 }
 0x1a4   : > { %v4573_v41 = vpop.eup %4572 }
 0x1a5   : > { %v1469_v57 = vmul.f32 %v4565_v30, %v1468_v18  ;;  %4576 = vpow2.f32 %v4064_v17  ;;  %v1459_v18 = vsel %vm6171_vm0, %v6098_v51, %v1455_v2  ;;  %v1969_v51 = vsel %vm6183_vm3, %v6133_v63, %v1965_v43  ;;  %v4575_v45 = vpop.eup %4574 }
 0x1a6   : > { %4578 = vrcp.f32 %v6188_v31  ;;  %v1478_v17 = vor.u32 1.1754944e-38, %v1477_v23  ;;  %v1464_v2 = vsel %vm6175_vm14, %v1463_v27, %v1459_v18  ;;  %v6211_v21 = vadd.f32 1.0, %v4573_v41 }
 0x1a7   : > { %v1470_v60 = vadd.f32 %v4565_v30, %v1469_v57  ;;  %v1977_v20 = vmul.f32 %v4575_v45, %v6158_v36  ;;  %v1985_v57 = vand.u32 2147483647, %v6158_v36  ;;  %v1987_v63 = vand.u32 2147483648, %v6158_v36 }
 0x1a8   : > { %v2194_v52 = vpop.f32.mrf.mxu1  ;;  %v1974_v27 = vsel %vm6197_vm2, %v1973_v22, %v1969_v51  ;;  %vm1982_vm8 = vweird.f32 %v4575_v45  ;;  %v1492_v43 = vand.u32 2147483648, %v6188_v31  ;;  %v2019_v59 = vmul.f32 %v1464_v2, %v5912_v55 }
 0x1a9   : > { %v6195_v48 = vadd.f32 %v5548_v16, %v2194_v52  ;;  %v1474_v29 = vsel %vm1473_vm4, %v4565_v30, %v1470_v60  ;;  %v6206_v16 = vadd.f32 1.0, %v4571_v6  ;;  %v1978_v23 = vsub.f32 1.0, %v1977_v20  ;;  %vm6250_vm10 = vmor %vm1981_vm7, %vm1982_vm8 }
 0x1aa   : > { %v1479_v0 = vsel %vm1476_vm5, %v1478_v17, %v1474_v29  ;;  %vm6241_vm9 = vcmp.eq.f32.partialorder %v1985_v57, 8.507059e+37  ;;  %v1988_v51 = vor.u32 1.1754944e-38, %v1987_v63  ;;  %v2053_v55 = vmul.f32 %v1974_v27, %v5940_v40 }
 0x1ab   : > { %8340 = vst [vmem:[#allocation35_spill] sm:$0xff] %v6195_v48  ;;  %2348 = vadd.xlane.f32.xlu0 %v6195_v48  ;;  %v4577_v30 = vpop.eup %4576  ;;  %4580 = vrcp.f32 %v6206_v16  ;;  %v2020_v52 = vmul.f32 %v1479_v0, %v5960_v13  ;;  %v1979_v22 = vmul.f32 %v4575_v45, %v1978_v23  ;;  %v1505_v17 = vand.u32 2147483647, %v6206_v16 }
 0x1ac   : > { %4582 = vrcp.f32 %v6211_v21  ;;  %v6231_v37 = vpop.eup %4578  ;;  %v6235_v33 = vadd.f32 1.0, %v4577_v30  ;;  %v1493_v57 = vor.u32 1.1754944e-38, %v1492_v43  ;;  %vm1501_vm13 = vweird.f32 %v6206_v16  ;;  %v6266_v30 = vld [vmem:[%s8213_s4] ss:$0 sm:$0xff] }
 0x1ad   : > { %v1482_v29 = vmul.f32 %v6231_v37, %v6188_v31  ;;  %v1980_v2 = vadd.f32 %v4575_v45, %v1979_v22  ;;  %v1507_v36 = vand.u32 2147483648, %v6206_v16  ;;  %v2069_v63 = vpack.c.bf16 %v2020_v52, %v2019_v59 }
 0x1ae   : > { %4584 = vrcp.f32 %v6235_v33  ;;  %v4868_v23 = vmov 128.0   ;;  %vm1487_vm0 = vweird.f32 %v6231_v37  ;;  %vm6280_vm14 = vcmp.eq.f32.partialorder %v1505_v17, 8.507059e+37 }
 0x1af   : > { %v1483_v0 = vsub.f32 1.0, %v1482_v29  ;;  %4586 = vrcp.f32 %v4868_v23  ;;  %v1984_v43 = vsel %vm6250_vm10, %v4575_v45, %v1980_v2  ;;  %vm6295_vm15 = vmor %vm1486_vm11, %vm1487_vm0  ;;  %v1508_v17 = vor.u32 1.1754944e-38, %v1507_v36  ;;  %2233 = vmatmul.bf16.gmra.mxu1 %v2069_v63 }
 0x1b0   : > { %v2196_v18 = vpop.f32.mrf.mxu1  ;;  %v1989_v52 = vsel %vm6241_vm9, %v1988_v51, %v1984_v43  ;;  %v1597_v23 = vand.u32 2147483648, %v5750_v38  ;;  %vm1531_vm1 = vweird.f32 %v6235_v33  ;;  %v1535_v36 = vand.u32 2147483647, %v6235_v33 }
 0x1b1   : > { %v4581_v40 = vpop.eup %4580  ;;  %v6269_v27 = vadd.f32 %v6266_v30, %v2196_v18  ;;  %v1484_v22 = vmul.f32 %v6231_v37, %v1483_v0  ;;  %v2054_v45 = vmul.f32 %v1989_v52, %v6037_v15  ;;  %v1595_v0 = vand.u32 2147483647, %v5750_v38 }
 0x1b2   : > { %v6271_v47 = vpop.eup %4582  ;;  %v1497_v59 = vmul.f32 %v4581_v40, %v6206_v16  ;;  %vm1502_vm3 = vweird.f32 %v4581_v40  ;;  %v1602_v15 = vmul.f32 %v5914_v10, %v5774_v62  ;;  %vm1516_vm5 = vweird.f32 %v6211_v21 }
 0x1b3   : > { %8351 = vst [vmem:[#allocation36_spill] sm:$0xff] %v6269_v27  ;;  %v1512_v18 = vmul.f32 %v6271_v47, %v6211_v21  ;;  %2350 = vadd.xlane.f32.xlu1 %v6269_v27  ;;  %v1485_v13 = vadd.f32 %v6231_v37, %v1484_v22  ;;  %v2086_v22 = vpack.c.bf16 %v2054_v45, %v2053_v55  ;;  %vm1596_vm2 = vcmp.eq.f32.partialorder %v1595_v0, 8.507059e+37  ;;  %vm1503_vm4 = vmor %vm1501_vm13, %vm1502_vm3 }
 0x1b4   : > { %v1498_v2 = vsub.f32 1.0, %v1497_v59  ;;  %v6291_v41 = vpop.eup %4584  ;;  %v1598_v45 = vor.u32 1.1754944e-38, %v1597_v23  ;;  %v6323_v20 = vmul.f32 %v5903_v1, %v5591_v26  ;;  %vm1606_vm9 = vweird.f32 %v5774_v62 }
 0x1b5   : > { %v1489_v59 = vsel %vm6295_vm15, %v6231_v37, %v1485_v13  ;;  %v1527_v31 = vmul.f32 %v6291_v41, %v6235_v33  ;;  %v4587_v6 = vpop.eup %4586  ;;  %v1513_v27 = vsub.f32 1.0, %v1512_v18  ;;  %2318 = vmatmul.bf16.vlgmr.msrb.gmra.mxu3 %v2086_v22  ;;  %v1537_v18 = vand.u32 2147483648, %v6235_v33 }
 0x1b6   : > { %v1499_v52 = vmul.f32 %v4581_v40, %v1498_v2  ;;  %v2453_v55 = vmul.f32 128.0, %v4587_v6  ;;  %v1494_v37 = vsel %vm6257_vm12, %v1493_v57, %v1489_v59  ;;  %v1603_v13 = vsub.f32 1.0, %v1602_v15 }
 0x1b7   : > { %v1528_v48 = vsub.f32 1.0, %v1527_v31  ;;  %v1514_v57 = vmul.f32 %v6271_v47, %v1513_v27  ;;  %v2325_v0 = vpop.xlane.xlu0 %2324  ;;  %vm1532_vm7 = vweird.f32 %v6291_v41  ;;  %vm2457_vm8 = vweird.f32 %v4587_v6 }
 0x1b8   : > { %v2199_v43 = vpop.f32.mrf.mxu1  ;;  %v1500_v63 = vadd.f32 %v4581_v40, %v1499_v52  ;;  %v1604_v15 = vmul.f32 %v5914_v10, %v1603_v13  ;;  %vm1517_vm10 = vweird.f32 %v6271_v47  ;;  %vm6355_vm11 = vmor %vm1531_vm1, %vm1532_vm7  ;;  %v1610_v52 = vand.u32 2147483647, %v5774_v62 }
 0x1b9   : > { %v6310_v38 = vadd.f32 %v6266_v30, %v2199_v43  ;;  %v1529_v51 = vmul.f32 %v6291_v41, %v1528_v48  ;;  %v2454_v43 = vsub.f32 1.0, %v2453_v55  ;;  %v2021_v48 = vmul.f32 %v1494_v37, %v6086_v4  ;;  %vm6390_vm15 = vmor %vm1516_vm5, %vm1517_vm10 }
 0x1ba   : > { %v1504_v2 = vsel %vm1503_vm4, %v4581_v40, %v1500_v63  ;;  %v8356_v40 = vsel %vm6220_vm6, %v5802_v34, %v6116_v58  ;;  %vm1607_vm6 = vweird.f32 %v5914_v10  ;;  %v1515_v4 = vadd.f32 %v6271_v47, %v1514_v57 }
 0x1bb   : > { %2352 = vadd.xlane.f32.xlu2 %v6310_v38  ;;  %v1509_v16 = vsel %vm6280_vm14, %v1508_v17, %v1504_v2  ;;  %v1599_v23 = vsel %vm1596_vm2, %v1598_v45, %v8356_v40  ;;  %v2455_v26 = vmul.f32 %v4587_v6, %v2454_v43  ;;  %v1530_v1 = vadd.f32 %v6291_v41, %v1529_v51  ;;  %vm6379_vm13 = vmor %vm1606_vm9, %vm1607_vm6 }
 0x1bc   : > { %v2022_v22 = vmul.f32 %v1509_v16, %v6128_v25  ;;  %v6339_v29 = vmul.f32 %v1599_v23, %v5651_v14  ;;  %v1605_v17 = vadd.f32 %v5914_v10, %v1604_v15  ;;  %v1612_v31 = vand.u32 2147483648, %v5774_v62 }
 0x1bd   : > { %v2456_v58 = vadd.f32 %v4587_v6, %v2455_v26  ;;  %v1617_v63 = vmul.f32 %v5927_v11, %v5776_v61  ;;  %v1522_v55 = vand.u32 2147483648, %v6211_v21  ;;  %v1534_v33 = vsel %vm6355_vm11, %v6291_v41, %v1530_v1 }
 0x1be   : > { %v2070_v34 = vpack.c.bf16 %v2022_v22, %v2021_v48  ;;  %v2073_v25 = vpack.c.bf16 %v6339_v29, %v6323_v20  ;;  %vm6370_vm12 = vcmp.eq.f32.partialorder %v1535_v36, 8.507059e+37  ;;  %vm1621_vm0 = vweird.f32 %v5776_v61  ;;  %v8373_v36 = vld [vmem:[#allocation18_spill] sm:$0xff]  ;;  %v8402_v29 = vld [vmem:[#allocation28_spill] sm:$0xff] }
 0x1bf   : > { %v6359_v59 = vsel %vm2457_vm8, %v4587_v6, %v2456_v58  ;;  %v1618_v13 = vsub.f32 1.0, %v1617_v63  ;;  %vm1622_vm14 = vweird.f32 %v5927_v11  ;;  %v1625_v41 = vand.u32 2147483647, %v5776_v61  ;;  %v2327_v15 = vpop.xlane.xlu0 %2326 }
 0x1c0   : > { %v2201_v27 = vpop.f32.mrf.mxu1  ;;  %2238 = vmatmul.bf16.vlgmr.msra.gmra.mxu2 %v2070_v34  ;;  %v2459_v6 = vmul.f32 %v6359_v59, %v2325_v0  ;;  %v1538_v62 = vor.u32 1.1754944e-38, %v1537_v18  ;;  %v1613_v51 = vor.u32 1.1754944e-38, %v1612_v31  ;;  %v1627_v43 = vand.u32 2147483648, %v5776_v61  ;;  %vm6417_vm1 = vmor %vm1621_vm0, %vm1622_vm14 }
 0x1c1   : > { %v6343_v60 = vadd.f32 %v6266_v30, %v2201_v27  ;;  %v1519_v16 = vsel %vm6390_vm15, %v6271_v47, %v1515_v4  ;;  %v1609_v57 = vsel %vm6379_vm13, %v5914_v10, %v1605_v17  ;;  %vm6404_vm3 = vcmp.eq.f32.partialorder %v1610_v52, 8.507059e+37  ;;  %v6428_v27 = vld [vmem:[%s8211_s2] ss:$0 sm:$0xff] }
 0x1c2   : > { %v6395_v2 = vsub.f32 %v5554_v56, %v2459_v6  ;;  %v1619_v18 = vmul.f32 %v5927_v11, %v1618_v13  ;;  %v1523_v40 = vor.u32 1.1754944e-38, %v1522_v55  ;;  %v1539_v56 = vsel %vm6370_vm12, %v1538_v62, %v1534_v33  ;;  %v8371_v6 = vld [vmem:[#allocation21_spill] sm:$0xff] }
 0x1c3   : > { %2354 = vadd.xlane.f32.xlu0 %v6343_v60  ;;  %v1628_v47 = vor.u32 1.1754944e-38, %v1627_v43  ;;  %v8369_v48 = vand.u32 2147483647, %v6211_v21  ;;  %v2460_v22 = vmul.f32 %v6359_v59, %v2327_v15  ;;  %vm1626_vm4 = vcmp.eq.f32.partialorder %v1625_v41, 8.507059e+37 }
 0x1c4   : > { %v2587_v23 = vmul.f32 %v6395_v2, %v6395_v2  ;;  %v1620_v1 = vadd.f32 %v5927_v11, %v1619_v18  ;;  %v6432_v61 = vadd.f32 %v6428_v27, %v5441_v12  ;;  %v1614_v58 = vsel %vm6404_vm3, %v1613_v51, %v1609_v57 }
 0x1c5   : > { %vm1521_vm2 = vcmp.eq.f32.partialorder %v8369_v48, 8.507059e+37  ;;  %v6438_v4 = vadd.f32 1.0, %v6109_v32  ;;  %v2024_v17 = vmul.f32 %v1539_v56, %v6144_v5  ;;  %v6442_v14 = vsub.f32 %v5628_v39, %v2460_v22  ;;  %v8370_v5 = vld [vmem:[#allocation17_spill] sm:$0xff] }
 0x1c6   : > { %v1524_v34 = vsel %vm1521_vm2, %v1523_v40, %v1519_v16  ;;  %2651 = vadd.xlane.f32.xlu1 %v2587_v23  ;;  %v1624_v12 = vsel %vm6417_vm1, %v5927_v11, %v1620_v1  ;;  %v1708_v52 = vsub.f32 1.0, %v6103_v3  ;;  %v6449_v31 = vadd.f32 1.0, %v6032_v28  ;;  %v8372_v3 = vld [vmem:[#allocation20_spill] sm:$0xff] }
 0x1c7   : > { %v2329_v26 = vpop.xlane.xlu1 %2328  ;;  %v1629_v55 = vsel %vm1626_vm4, %v1628_v47, %v1624_v12  ;;  %v2023_v32 = vmul.f32 %v1524_v34, %v6138_v8  ;;  %v2588_v39 = vmul.f32 %v6442_v14, %v6442_v14  ;;  %v6458_v37 = vmul.f32 %v1614_v58, %v8370_v5  ;;  %v8377_v47 = vld [vmem:[#allocation19_spill] sm:$0xff] }
 0x1c8   : > { %v2461_v21 = vmul.f32 %v6359_v59, %v2329_v26  ;;  %v2204_v33 = vpop.f32.mrf.mxu1  ;;  %v6461_v11 = vmul.f32 %v1629_v55, %v8371_v6  ;;  %v6465_v28 = vmul.f32 %v6095_v49, %v8372_v3  ;;  %4588 = vrcp.f32 %v6438_v4  ;;  %v8378_v26 = vld [vmem:[#allocation5_spill] sm:$0xff] }
 0x1c9   : > { %v4079_v8 = vmul.f32 -1.442695, %v6107_v42  ;;  %v2071_v13 = vpack.c.bf16 %v2024_v17, %v2023_v32  ;;  %2653 = vadd.xlane.f32.xlu2 %v2588_v39  ;;  %v6476_v62 = vmul.f32 %v6091_v24, %v8373_v36  ;;  %v1709_v49 = vmul.f32 %v6054_v46, %v1708_v52  ;;  %v8383_v36 = vld [vmem:[#allocation9_spill] sm:$0xff] }
 0x1ca   : > { %v6452_v63 = vsub.f32 %v5638_v7, %v2461_v21  ;;  %v4080_v7 = vmul.f32 -1.442695, %v6432_v61  ;;  %4590 = vrcp.f32 %v6449_v31  ;;  %v6481_v51 = vadd.f32 %v6266_v30, %v2204_v33  ;;  %v8381_v33 = vld [vmem:[#allocation6_spill] sm:$0xff] }
 0x1cb   : > { %v8374_v43 = vsub.f32 1.0, %v6061_v44  ;;  %vm1711_vm5 = vweird.f32 %v5962_v50  ;;  %vm1712_vm7 = vweird.f32 %v6054_v46  ;;  %v1717_v0 = vand.u32 2147483648, %v5962_v50 }
 0x1cc   : > { %v2589_v45 = vmul.f32 %v6452_v63, %v6452_v63  ;;  %4592 = vpow2.f32 %v4080_v7  ;;  %vm1696_vm8 = vweird.f32 %v5899_v19  ;;  %vm1697_vm9 = vweird.f32 %v5968_v54  ;;  %vm6504_vm6 = vmor %vm1711_vm5, %vm1712_vm7  ;;  %v8382_v7 = vld [vmem:[#allocation10_spill] sm:$0xff] }
 0x1cd   : > { %v1694_v16 = vmul.f32 %v5968_v54, %v8374_v43  ;;  %4594 = vpow2.f32 %v4079_v8  ;;  %v1710_v44 = vadd.f32 %v6054_v46, %v1709_v49  ;;  %v1715_v40 = vand.u32 2147483647, %v5962_v50  ;;  %vm6522_vm10 = vmor %vm1696_vm8, %vm1697_vm9 }
 0x1ce   : > { %2655 = vadd.xlane.f32.xlu0 %v2589_v45  ;;  %2356 = vadd.xlane.f32.xlu1 %v6481_v51  ;;  %v6497_v56 = vpop.eup %4588  ;;  %v1702_v23 = vand.u32 2147483648, %v5899_v19  ;;  %v6515_v1 = vadd.f32 %v6428_v27, %v8378_v26  ;;  %v1700_v21 = vand.u32 2147483647, %v5899_v19  ;;  %v1718_v17 = vor.u32 1.1754944e-38, %v1717_v0 }
 0x1cf   : > { %v2331_v24 = vpop.xlane.xlu1 %2330  ;;  %v1695_v34 = vadd.f32 %v5968_v54, %v1694_v16  ;;  %v1714_v55 = vsel %vm6504_vm6, %v6054_v46, %v1710_v44  ;;  %vm1716_vm11 = vcmp.eq.f32.partialorder %v1715_v40, 8.507059e+37  ;;  %v1737_v19 = vmul.f32 %v6497_v56, %v6438_v4  ;;  %v8384_v44 = vld [vmem:[#allocation27_spill] sm:$0xff] }
 0x1d0   : > { %2243 = vmatmul.bf16.gmra.mxu2 %v2071_v13  ;;  %v2462_v18 = vmul.f32 %v6359_v59, %v2331_v24  ;;  %v2206_v10 = vpop.f32.mrf.mxu1  ;;  %v6511_v22 = vpop.eup %4590  ;;  %v6536_v39 = vadd.f32 %v6428_v27, %v8381_v33  ;;  %v1703_v5 = vor.u32 1.1754944e-38, %v1702_v23  ;;  %v4071_v3 = vmul.f32 -1.442695, %v6515_v1 }
 0x1d1   : > { %v6520_v50 = vadd.f32 %v6266_v30, %v2206_v10  ;;  %v1722_v6 = vmul.f32 %v6511_v22, %v6449_v31  ;;  %v1699_v46 = vsel %vm6522_vm10, %v5968_v54, %v1695_v34  ;;  %vm1701_vm12 = vcmp.eq.f32.partialorder %v1700_v21, 8.507059e+37 }
 0x1d2   : > { %v6509_v48 = vsub.f32 %v8377_v47, %v2462_v18  ;;  %v4593_v52 = vpop.eup %4592  ;;  %v6546_v45 = vadd.f32 %v6428_v27, %v8382_v7  ;;  %v1719_v8 = vsel %vm1716_vm11, %v1718_v17, %v1714_v55  ;;  %v6552_v49 = vadd.f32 %v6428_v27, %v8383_v36  ;;  %v8385_v47 = vld [vmem:[#allocation24_spill] sm:$0xff] }
 0x1d3   : > { %2358 = vadd.xlane.f32.xlu2 %v6520_v50  ;;  %v4595_v32 = vpop.eup %4594  ;;  %v6548_v13 = vadd.f32 1.0, %v4593_v52  ;;  %v1738_v43 = vsub.f32 1.0, %v1737_v19  ;;  %v4072_v24 = vmul.f32 -1.442695, %v6536_v39  ;;  %v1704_v0 = vsel %vm1701_vm12, %v1703_v5, %v1699_v46  ;;  %v8387_v52 = vld [vmem:[#allocation7_spill] sm:$0xff] }
 0x1d4   : > { %v2590_v12 = vmul.f32 %v6509_v48, %v6509_v48  ;;  %v6554_v16 = vadd.f32 1.0, %v4595_v32  ;;  %v1723_v54 = vsub.f32 1.0, %v1722_v6  ;;  %4596 = vpow2.f32 %v4071_v3 }
 0x1d5   : > { %v6558_v40 = vmul.f32 %v1719_v8, %v8384_v44  ;;  %v4082_v23 = vmul.f32 -1.442695, %v6546_v45  ;;  %4598 = vrcp.f32 %v6548_v13  ;;  %v4081_v10 = vmul.f32 -1.442695, %v6552_v49 }
 0x1d6   : > { %2657 = vadd.xlane.f32.xlu1 %v2590_v12  ;;  %v6567_v26 = vmul.f32 %v1704_v0, %v8385_v47  ;;  %v1739_v34 = vmul.f32 %v6497_v56, %v1738_v43  ;;  %4600 = vrcp.f32 %v6554_v16  ;;  %v1724_v21 = vmul.f32 %v6511_v22, %v1723_v54  ;;  %v8386_v12 = vld [vmem:[#allocation8_spill] sm:$0xff] }
 0x1d7   : > { %4602 = vpow2.f32 %v4072_v24  ;;  %vm1741_vm13 = vweird.f32 %v6438_v4  ;;  %vm1742_vm0 = vweird.f32 %v6497_v56  ;;  %v1747_v17 = vand.u32 2147483648, %v6438_v4 }
 0x1d8   : > { %v2209_v18 = vpop.f32.mrf.mxu1  ;;  %4604 = vpow2.f32 %v4082_v23  ;;  %v8388_v55 = vpack.c.bf16 %v8386_v12, %v8387_v52  ;;  %vm1726_vm14 = vweird.f32 %v6449_v31  ;;  %vm1727_vm15 = vweird.f32 %v6511_v22  ;;  %vm6588_vm3 = vmor %vm1741_vm13, %vm1742_vm0 }
 0x1d9   : > { %v6562_v15 = vadd.f32 %v6266_v30, %v2209_v18  ;;  %4606 = vpow2.f32 %v4081_v10  ;;  %v1740_v32 = vadd.f32 %v6497_v56, %v1739_v34  ;;  %v1745_v33 = vand.u32 2147483647, %v6438_v4  ;;  %vm6599_vm1 = vmor %vm1726_vm14, %vm1727_vm15  ;;  %v2333_v12 = vpop.xlane.xlu2 %2332 }
 0x1da   : > { %v4597_v19 = vpop.eup %4596  ;;  %v1732_v6 = vand.u32 2147483648, %v6449_v31  ;;  %v1725_v8 = vadd.f32 %v6511_v22, %v1724_v21  ;;  %v1730_v36 = vand.u32 2147483647, %v6449_v31  ;;  %v1748_v0 = vor.u32 1.1754944e-38, %v1747_v17 }
 0x1db   : > { %2360 = vadd.xlane.f32.xlu0 %v6562_v15  ;;  %v6585_v5 = vpop.eup %4598  ;;  %v1744_v18 = vsel %vm6588_vm3, %v6497_v56, %v1740_v32  ;;  %vm1746_vm2 = vcmp.eq.f32.partialorder %v1745_v33, 8.507059e+37  ;;  %v6609_v23 = vadd.f32 1.0, %v4597_v19  ;;  %v8393_v56 = vld [vmem:[#allocation12_spill] sm:$0xff]  ;;  %v2463_v19 = vmul.f32 %v6359_v59, %v2333_v12 }
 0x1dc   : > { %v6592_v7 = vpop.eup %4600  ;;  %v1767_v44 = vmul.f32 %v6585_v5, %v6548_v13  ;;  %v1733_v10 = vor.u32 1.1754944e-38, %v1732_v6  ;;  %v1729_v21 = vsel %vm6599_vm1, %v6511_v22, %v1725_v8  ;;  %vm1731_vm4 = vcmp.eq.f32.partialorder %v1730_v36, 8.507059e+37  ;;  %v8394_v6 = vld [vmem:[#allocation11_spill] sm:$0xff]  ;;  %v8395_v8 = vld [vmem:[#allocation26_spill] sm:$0xff] }
 0x1dd   : > { %v4603_v24 = vpop.eup %4602  ;;  %v1752_v47 = vmul.f32 %v6592_v7, %v6554_v16  ;;  %v6620_v17 = vadd.f32 %v6428_v27, %v8393_v56  ;;  %v1749_v52 = vsel %vm1746_vm2, %v1748_v0, %v1744_v18  ;;  %v6629_v3 = vadd.f32 %v6428_v27, %v8394_v6  ;;  %v8398_v6 = vld [vmem:[#allocation29_spill] sm:$0xff] }
 0x1de   : > { %v4605_v54 = vpop.eup %4604  ;;  %v6613_v34 = vadd.f32 1.0, %v4603_v24  ;;  %v1768_v32 = vsub.f32 1.0, %v1767_v44  ;;  %4608 = vrcp.f32 %v6609_v23  ;;  %v1734_v22 = vsel %vm1731_vm4, %v1733_v10, %v1729_v21 }
 0x1df   : > { %v4607_v31 = vpop.eup %4606  ;;  %v6633_v36 = vsub.f32 %v8395_v8, %v2463_v19  ;;  %v6637_v24 = vmul.f32 %v1749_v52, %v5975_v53  ;;  %v4084_v4 = vmul.f32 -1.442695, %v6620_v17  ;;  %vm1756_vm5 = vweird.f32 %v6554_v16 }
 0x1e0   : > { %2248 = vmatmul.bf16.gmra.mxu2 %v8388_v55  ;;  %v2211_v46 = vpop.f32.mrf.mxu1  ;;  %v6622_v55 = vadd.f32 1.0, %v4605_v54  ;;  %v6625_v33 = vadd.f32 1.0, %v4607_v31  ;;  %4610 = vrcp.f32 %v6613_v34  ;;  %v8397_v54 = vld [vmem:[#allocation32_spill] sm:$0xff]  ;;  %v1769_v44 = vmul.f32 %v6585_v5, %v1768_v32 }
 0x1e1   : > { %v6597_v43 = vadd.f32 %v6266_v30, %v2211_v46  ;;  %v1753_v46 = vsub.f32 1.0, %v1752_v47  ;;  %8396 = vst [vmem:[#allocation17_spill] sm:$0xff] %v6633_v36  ;;  %v2591_v0 = vmul.f32 %v6633_v36, %v6633_v36  ;;  %v6644_v18 = vmul.f32 %v1734_v22, %v8397_v54 }
 0x1e2   : > { %4612 = vrcp.f32 %v6622_v55  ;;  %v4083_v31 = vmul.f32 -1.442695, %v6629_v3  ;;  %v1760_v47 = vand.u32 2147483647, %v6554_v16  ;;  %vm1771_vm7 = vweird.f32 %v6548_v13  ;;  %v2335_v56 = vpop.xlane.xlu2 %2334 }
 0x1e3   : > { %2362 = vadd.xlane.f32.xlu1 %v6597_v43  ;;  %4614 = vrcp.f32 %v6625_v33  ;;  %v1754_v53 = vmul.f32 %v6592_v7, %v1753_v46  ;;  %2659 = vadd.xlane.f32.xlu2 %v2591_v0  ;;  %vm1772_vm8 = vweird.f32 %v6585_v5  ;;  %vm1757_vm9 = vweird.f32 %v6592_v7 }
 0x1e4   : > { %4616 = vpow2.f32 %v4084_v4  ;;  %v6657_v52 = vpop.eup %4608  ;;  %v1777_v19 = vand.u32 2147483648, %v6548_v13  ;;  %v2464_v32 = vmul.f32 %v6359_v59, %v2335_v56  ;;  %v1762_v4 = vand.u32 2147483648, %v6554_v16  ;;  %vm6680_vm6 = vmor %vm1771_vm7, %vm1772_vm8 }
 0x1e5   : > { %v1770_v0 = vadd.f32 %v6585_v5, %v1769_v44  ;;  %v1775_v54 = vand.u32 2147483647, %v6548_v13  ;;  %4618 = vpow2.f32 %v4083_v31  ;;  %v1755_v56 = vadd.f32 %v6592_v7, %v1754_v53  ;;  %vm6698_vm10 = vmor %vm1756_vm5, %vm1757_vm9 }
 0x1e6   : > { %v6668_v8 = vpop.eup %4610  ;;  %v1632_v53 = vmul.f32 %v6657_v52, %v6609_v23  ;;  %v1763_v57 = vor.u32 1.1754944e-38, %v1762_v4  ;;  %vm1761_vm12 = vcmp.eq.f32.partialorder %v1760_v47, 8.507059e+37  ;;  %v8406_v4 = vld [vmem:[#allocation31_spill] sm:$0xff]  ;;  %vm1636_vm13 = vweird.f32 %v6609_v23 }
 0x1e7   : > { %v2337_v10 = vpop.xlane.xlu0 %2336  ;;  %v1774_v16 = vsel %vm6680_vm6, %v6585_v5, %v1770_v0  ;;  %vm1776_vm11 = vcmp.eq.f32.partialorder %v1775_v54, 8.507059e+37  ;;  %v8408_v0 = vld [vmem:[#allocation14_spill] sm:$0xff]  ;;  %vm1637_vm0 = vweird.f32 %v6657_v52  ;;  %vm1786_vm14 = vweird.f32 %v6625_v33 }
 0x1e8   : > { %v2465_v21 = vmul.f32 %v6359_v59, %v2337_v10  ;;  %v2214_v10 = vpop.f32.mrf.mxu1  ;;  %v6673_v12 = vpop.eup %4612  ;;  %v1633_v5 = vsub.f32 1.0, %v1632_v53  ;;  %v6725_v54 = vadd.f32 %v6428_v27, %v8408_v0  ;;  %v1642_v53 = vand.u32 2147483648, %v6609_v23  ;;  %vm6771_vm4 = vmor %vm1636_vm13, %vm1637_vm0 }
 0x1e9   : > { %vm1801_vm15 = vweird.f32 %v6622_v55  ;;  %vm1651_vm3 = vweird.f32 %v6613_v34  ;;  %vm1652_vm1 = vweird.f32 %v6668_v8  ;;  %vm1802_vm2 = vweird.f32 %v6673_v12 }
 0x1ea   : > { %v6666_v22 = vsub.f32 %v8398_v6, %v2465_v21  ;;  %v6690_v21 = vpop.eup %4614  ;;  %v6703_v6 = vadd.f32 %v6266_v30, %v2214_v10  ;;  %v1759_v10 = vsel %vm6698_vm10, %v6592_v7, %v1755_v56  ;;  %vm6789_vm7 = vmor %vm1651_vm3, %vm1652_vm1  ;;  %v1643_v56 = vor.u32 1.1754944e-38, %v1642_v53 }
 0x1eb   : > { %v4617_v58 = vpop.eup %4616  ;;  %vm1787_vm5 = vweird.f32 %v6690_v21  ;;  %vm6802_vm8 = vmor %vm1801_vm15, %vm1802_vm2 }
 0x1ec   : > { %8399 = vst [vmem:[#allocation21_spill] sm:$0xff] %v6666_v22  ;;  %v2593_v44 = vmul.f32 %v6666_v22, %v6666_v22  ;;  %2364 = vadd.xlane.f32.xlu2 %v6703_v6  ;;  %v4619_v20 = vpop.eup %4618  ;;  %v6728_v7 = vadd.f32 1.0, %v4617_v58  ;;  %v1634_v58 = vmul.f32 %v6657_v52, %v1633_v5  ;;  %v8413_v5 = vpack.c.bf16 %v6461_v11, %v6458_v37  ;;  %vm6813_vm9 = vmor %vm1786_vm14, %vm1787_vm5 }
 0x1ed   : > { %v6736_v0 = vadd.f32 1.0, %v4619_v20  ;;  %v1807_v20 = vand.u32 2147483648, %v6622_v55 }
 0x1ee   : > { %2663 = vadd.xlane.f32.xlu1 %v2593_v44  ;;  %v1782_v44 = vmul.f32 %v6690_v21, %v6625_v33  ;;  %4620 = vrcp.f32 %v6728_v7  ;;  %v1635_v11 = vadd.f32 %v6657_v52, %v1634_v58  ;;  %vm1831_vm13 = vweird.f32 %v6728_v7 }
 0x1ef   : > { %v2339_v46 = vpop.xlane.xlu1 %2338  ;;  %4622 = vrcp.f32 %v6736_v0  ;;  %vm1816_vm14 = vweird.f32 %v6736_v0 }
 0x1f0   : > { %2253 = vmatmul.bf16.gmra.mxu2 %v2073_v25  ;;  %v6685_v25 = vsub.f32 %v8402_v29, %v2464_v32  ;;  %v2466_v31 = vmul.f32 %v6359_v59, %v2339_v46  ;;  %v1778_v32 = vor.u32 1.1754944e-38, %v1777_v19  ;;  %v1647_v29 = vmul.f32 %v6668_v8, %v6613_v34 }
 0x1f1   : > { %v1797_v19 = vmul.f32 %v6673_v12, %v6622_v55  ;;  %v1783_v36 = vsub.f32 1.0, %v1782_v44  ;;  %v1639_v53 = vsel %vm6771_vm4, %v6657_v52, %v1635_v11 }
 0x1f2   : > { %8403 = vst [vmem:[#allocation20_spill] sm:$0xff] %v6685_v25  ;;  %v2592_v46 = vmul.f32 %v6685_v25, %v6685_v25  ;;  %v6721_v41 = vsub.f32 %v8406_v4, %v2466_v31  ;;  %v1779_v13 = vsel %vm1776_vm11, %v1778_v32, %v1774_v16  ;;  %v1648_v47 = vsub.f32 1.0, %v1647_v29  ;;  %v8409_v25 = vld [vmem:[#allocation13_spill] sm:$0xff]  ;;  %v2216_v4 = vpop.f32.mrf.mxu1 }
 0x1f3   : > { %v1798_v22 = vsub.f32 1.0, %v1797_v19  ;;  %v6733_v31 = vadd.f32 %v6428_v27, %v8409_v25  ;;  %v4086_v29 = vmul.f32 -1.442695, %v6725_v54  ;;  %v6751_v16 = vadd.f32 %v6266_v30, %v2216_v4 }
 0x1f4   : > { %2661 = vadd.xlane.f32.xlu0 %v2592_v46  ;;  %8407 = vst [vmem:[#allocation18_spill] sm:$0xff] %v6721_v41  ;;  %v1764_v46 = vsel %vm1761_vm12, %v1763_v57, %v1759_v10  ;;  %v2594_v32 = vmul.f32 %v6721_v41, %v6721_v41  ;;  %v6743_v57 = vmul.f32 %v1779_v13, %v6432_v61  ;;  %v6793_v37 = vpop.eup %4620 }
 0x1f5   : > { %v6747_v25 = vmul.f32 %v1764_v46, %v6107_v42  ;;  %8410 = vst [vmem:[#allocation19_spill] sm:$0xff] %v6751_v16  ;;  %v1649_v19 = vmul.f32 %v6668_v8, %v1648_v47  ;;  %v1799_v10 = vmul.f32 %v6673_v12, %v1798_v22  ;;  %v4085_v61 = vmul.f32 -1.442695, %v6733_v31 }
 0x1f6   : > { %v1784_v44 = vmul.f32 %v6690_v21, %v1783_v36  ;;  %2665 = vadd.xlane.f32.xlu2 %v2594_v32  ;;  %4624 = vpow2.f32 %v4086_v29  ;;  %v1657_v42 = vand.u32 2147483648, %v6613_v34  ;;  %v1655_v47 = vand.u32 2147483647, %v6613_v34 }
 0x1f7   : > { %v1650_v13 = vadd.f32 %v6668_v8, %v1649_v19  ;;  %v1792_v46 = vand.u32 2147483648, %v6625_v33  ;;  %v1800_v4 = vadd.f32 %v6673_v12, %v1799_v10  ;;  %v1805_v32 = vand.u32 2147483647, %v6622_v55 }
 0x1f8   : > { %4626 = vpow2.f32 %v4085_v61  ;;  %v1785_v19 = vadd.f32 %v6690_v21, %v1784_v44  ;;  %v1790_v10 = vand.u32 2147483647, %v6625_v33  ;;  %v1658_v44 = vor.u32 1.1754944e-38, %v1657_v42 }
 0x1f9   : > { %v1808_v55 = vor.u32 1.1754944e-38, %v1807_v20  ;;  %vm1656_vm6 = vcmp.eq.f32.partialorder %v1655_v47, 8.507059e+37  ;;  %v1804_v33 = vsel %vm6802_vm8, %v6673_v12, %v1800_v4  ;;  %vm1806_vm10 = vcmp.eq.f32.partialorder %v1805_v32, 8.507059e+37 }
 0x1fa   : > { %v2219_v29 = vpop.f32.mrf.mxu1  ;;  %v1827_v42 = vmul.f32 %v6793_v37, %v6728_v7  ;;  %v8420_v20 = vand.u32 2147483647, %v6609_v23  ;;  %vm1791_vm12 = vcmp.eq.f32.partialorder %v1790_v10, 8.507059e+37  ;;  %v8422_v23 = vld [vmem:[#allocation15_spill] sm:$0xff]  ;;  %vm1832_vm0 = vweird.f32 %v6793_v37 }
 0x1fb   : > { %v6807_v34 = vadd.f32 %v6266_v30, %v2219_v29  ;;  %v1654_v29 = vsel %vm6789_vm7, %v6668_v8, %v1650_v13  ;;  %v1789_v8 = vsel %vm6813_vm9, %v6690_v21, %v1785_v19  ;;  %v8421_v13 = vld [vmem:[#allocation16_spill] sm:$0xff]  ;;  %v1809_v36 = vsel %vm1806_vm10, %v1808_v55, %v1804_v33  ;;  %vm6889_vm3 = vmor %vm1831_vm13, %vm1832_vm0 }
 0x1fc   : > { %2366 = vadd.xlane.f32.xlu0 %v6751_v16  ;;  %v1793_v16 = vor.u32 1.1754944e-38, %v1792_v46  ;;  %vm1641_vm11 = vcmp.eq.f32.partialorder %v8420_v20, 8.507059e+37  ;;  %v6840_v47 = vadd.f32 %v6428_v27, %v8421_v13  ;;  %v1659_v4 = vsel %vm1656_vm6, %v1658_v44, %v1654_v29 }
 0x1fd   : > { %2368 = vadd.xlane.f32.xlu1 %v6807_v34  ;;  %v6846_v32 = vadd.f32 %v6428_v27, %v8422_v23  ;;  %v1644_v11 = vsel %vm1641_vm11, %v1643_v56, %v1639_v53  ;;  %v1828_v10 = vsub.f32 1.0, %v1827_v42  ;;  %v6859_v55 = vmul.f32 %v1809_v36, %v6546_v45  ;;  %v8433_v36 = vld [vmem:[#allocation34_spill] sm:$0xff] }
 0x1fe   : > { %v1794_v19 = vsel %vm1791_vm12, %v1793_v16, %v1789_v8  ;;  %v4088_v33 = vmul.f32 -1.442695, %v6840_v47  ;;  %v2031_v56 = vmul.f32 %v1644_v11, %v6515_v1  ;;  %v1820_v45 = vand.u32 2147483647, %v6736_v0 }
 0x1ff   : > { %v2341_v46 = vpop.xlane.xlu2 %2340  ;;  %v4087_v16 = vmul.f32 -1.442695, %v6846_v32  ;;  %v6869_v42 = vmul.f32 %v1794_v19, %v6552_v49  ;;  %v1837_v49 = vand.u32 2147483648, %v6728_v7 }
 0x200   : > { %2258 = vmatmul.bf16.gmra.mxu2 %v8413_v5  ;;  %v6817_v5 = vpop.eup %4622  ;;  %v2467_v21 = vmul.f32 %v6359_v59, %v2341_v46  ;;  %vm6895_vm1 = vcmp.eq.f32.partialorder %v1820_v45, 8.507059e+37 }
 0x201   : > { %v4625_v41 = vpop.eup %4624  ;;  %v1812_v12 = vmul.f32 %v6817_v5, %v6736_v0  ;;  %vm1817_vm15 = vweird.f32 %v6817_v5 }
 0x202   : > { %v4627_v22 = vpop.eup %4626  ;;  %v6842_v52 = vadd.f32 1.0, %v4625_v41  ;;  %v2221_v61 = vpop.f32.mrf.mxu1  ;;  %v6852_v20 = vsub.f32 %v6030_v35, %v2467_v21  ;;  %v2032_v41 = vmul.f32 %v1659_v4, %v6536_v39  ;;  %v1829_v39 = vmul.f32 %v6793_v37, %v1828_v10  ;;  %vm6910_vm2 = vmor %vm1816_vm14, %vm1817_vm15 }
 0x203   : > { %v6849_v58 = vadd.f32 1.0, %v4627_v22  ;;  %v6855_v44 = vadd.f32 %v6266_v30, %v2221_v61  ;;  %v1813_v29 = vsub.f32 1.0, %v1812_v12  ;;  %v1835_v12 = vand.u32 2147483647, %v6728_v7  ;;  %v8427_v61 = vld [vmem:[#allocation22_spill] sm:$0xff] }
 0x204   : > { %4628 = vrcp.f32 %v6842_v52  ;;  %v2595_v35 = vmul.f32 %v6852_v20, %v6852_v20  ;;  %v2075_v1 = vpack.c.bf16 %v2032_v41, %v2031_v56  ;;  %v1830_v22 = vadd.f32 %v6793_v37, %v1829_v39 }
 0x205   : > { %2370 = vadd.xlane.f32.xlu2 %v6855_v44  ;;  %4630 = vrcp.f32 %v6849_v58  ;;  %v1814_v53 = vmul.f32 %v6817_v5, %v1813_v29  ;;  %v1822_v4 = vand.u32 2147483648, %v6736_v0  ;;  %v6901_v41 = vadd.f32 %v6428_v27, %v8427_v61 }
 0x206   : > { %2667 = vadd.xlane.f32.xlu0 %v2595_v35  ;;  %4632 = vpow2.f32 %v4088_v33  ;;  %vm1836_vm4 = vcmp.eq.f32.partialorder %v1835_v12, 8.507059e+37  ;;  %vm1861_vm5 = vweird.f32 %v6842_v52  ;;  %vm1846_vm8 = vweird.f32 %v6849_v58 }
 0x207   : > { %4634 = vpow2.f32 %v4087_v16  ;;  %v1815_v19 = vadd.f32 %v6817_v5, %v1814_v53  ;;  %v1838_v16 = vor.u32 1.1754944e-38, %v1837_v49  ;;  %v1834_v53 = vsel %vm6889_vm3, %v6793_v37, %v1830_v22 }
 0x209   : > { %v2343_v13 = vpop.xlane.xlu0 %2342  ;;  %v1819_v22 = vsel %vm6910_vm2, %v6817_v5, %v1815_v19 }
 0x20a   : > { %v6884_v46 = vpop.eup %4628  ;;  %v2468_v23 = vmul.f32 %v6359_v59, %v2343_v13  ;;  %v2224_v21 = vpop.f32.mrf.mxu1  ;;  %v8430_v13 = vld [vmem:[#allocation33_spill] sm:$0xff] }
 0x20b   : > { %v2345_v11 = vpop.xlane.xlu1 %2344  ;;  %v6904_v33 = vpop.eup %4630  ;;  %v6918_v39 = vadd.f32 %v6266_v30, %v2224_v21  ;;  %v1857_v0 = vmul.f32 %v6884_v46, %v6842_v52  ;;  %vm1862_vm7 = vweird.f32 %v6884_v46 }
 0x20c   : > { %v2469_v7 = vmul.f32 %v6359_v59, %v2345_v11  ;;  %v6915_v35 = vsub.f32 %v6123_v9, %v2468_v23  ;;  %v1823_v9 = vor.u32 1.1754944e-38, %v1822_v4  ;;  %v8432_v23 = vld [vmem:[#allocation23_spill] sm:$0xff]  ;;  %v1842_v12 = vmul.f32 %v6904_v33, %v6849_v58  ;;  %vm6989_vm6 = vmor %vm1861_vm5, %vm1862_vm7 }
 0x20d   : > { %v6931_v21 = vadd.f32 %v6428_v27, %v8432_v23  ;;  %v4089_v4 = vmul.f32 -1.442695, %v6901_v41  ;;  %v1858_v23 = vsub.f32 1.0, %v1857_v0  ;;  %vm1847_vm9 = vweird.f32 %v6904_v33 }
 0x20e   : > { %v6927_v11 = vsub.f32 %v8430_v13, %v2469_v7  ;;  %2372 = vadd.xlane.f32.xlu0 %v6918_v39  ;;  %v2596_v61 = vmul.f32 %v6915_v35, %v6915_v35  ;;  %v1824_v56 = vsel %vm6895_vm1, %v1823_v9, %v1819_v22  ;;  %v8435_v22 = vpack.c.bf16 %v6465_v28, %v6476_v62  ;;  %vm7000_vm10 = vmor %vm1846_vm8, %vm1847_vm9 }
 0x20f   : > { %v4090_v5 = vmul.f32 -1.442695, %v6931_v21  ;;  %4636 = vpow2.f32 %v4089_v4  ;;  %v6962_v0 = vmul.f32 %v1824_v56, %v6629_v3  ;;  %v1859_v10 = vmul.f32 %v6884_v46, %v1858_v23 }
 0x210   : > { %2263 = vmatmul.bf16.gmra.mxu2 %v2075_v1  ;;  %v2347_v29 = vpop.xlane.xlu2 %2346  ;;  %v4633_v1 = vpop.eup %4632  ;;  %8431 = vst [vmem:[#allocation5_spill] sm:$0xff] %v6927_v11  ;;  %v2597_v7 = vmul.f32 %v6927_v11, %v6927_v11  ;;  %2669 = vadd.xlane.f32.xlu1 %v2596_v61  ;;  %v1865_v3 = vand.u32 2147483647, %v6842_v52  ;;  %v1867_v61 = vand.u32 2147483648, %v6842_v52  ;;  %v1852_v52 = vand.u32 2147483648, %v6849_v58 }
 0x211   : > { %v2470_v45 = vmul.f32 %v6359_v59, %v2347_v29  ;;  %v4635_v49 = vpop.eup %4634  ;;  %v1839_v29 = vsel %vm1836_vm4, %v1838_v16, %v1834_v53  ;;  %v6947_v13 = vadd.f32 1.0, %v4633_v1  ;;  %v1843_v16 = vsub.f32 1.0, %v1842_v12  ;;  %v8436_v12 = vld [vmem:[#allocation35_spill] sm:$0xff] }
 0x212   : > { %v6949_v8 = vadd.f32 1.0, %v4635_v49  ;;  %2671 = vadd.xlane.f32.xlu2 %v2597_v7  ;;  %v2226_v19 = vpop.f32.mrf.mxu1  ;;  %vm7004_vm11 = vcmp.eq.f32.partialorder %v1865_v3, 8.507059e+37  ;;  %v8445_v3 = vld [vmem:[#allocation30_spill] sm:$0xff] }
 0x213   : > { %v6937_v37 = vsub.f32 %v8433_v36, %v2470_v45  ;;  %v6957_v36 = vmul.f32 %v1839_v29, %v6620_v17  ;;  %4638 = vrcp.f32 %v6947_v13  ;;  %v6967_v49 = vadd.f32 %v6266_v30, %v2226_v19 }
 0x214   : > { %4640 = vrcp.f32 %v6949_v8  ;;  %v1844_v17 = vmul.f32 %v6904_v33, %v1843_v16  ;;  %v1860_v29 = vadd.f32 %v6884_v46, %v1859_v10  ;;  %v1850_v19 = vand.u32 2147483647, %v6849_v58 }
 0x215   : > { %8434 = vst [vmem:[#allocation6_spill] sm:$0xff] %v6937_v37  ;;  %v2598_v45 = vmul.f32 %v6937_v37, %v6937_v37  ;;  %4642 = vpow2.f32 %v4090_v5  ;;  %v4637_v7 = vpop.eup %4636  ;;  %v1868_v10 = vor.u32 1.1754944e-38, %v1867_v61  ;;  %v7023_v9 = vadd.f32 %v6428_v27, %v8445_v3  ;;  %v8446_v37 = vld [vmem:[#allocation36_spill] sm:$0xff] }
 0x216   : > { %v1845_v5 = vadd.f32 %v6904_v33, %v1844_v17  ;;  %v1853_v61 = vor.u32 1.1754944e-38, %v1852_v52  ;;  %vm1851_vm12 = vcmp.eq.f32.partialorder %v1850_v19, 8.507059e+37  ;;  %vm1891_vm13 = vweird.f32 %v6947_v13 }
 0x217   : > { %2673 = vadd.xlane.f32.xlu0 %v2598_v45  ;;  %v4092_v3 = vmul.f32 -1.442695, %v7023_v9  ;;  %vm1876_vm14 = vweird.f32 %v6949_v8 }
 0x218   : > { %2374 = vadd.xlane.f32.xlu1 %v6967_v49 }
 0x219   : > { %v6986_v23 = vpop.eup %4638 }
 0x21a   : > { %v2229_v28 = vpop.f32.mrf.mxu1  ;;  %v6993_v62 = vpop.eup %4640  ;;  %v1887_v17 = vmul.f32 %v6986_v23, %v6947_v13  ;;  %vm1892_vm0 = vweird.f32 %v6986_v23 }
 0x21b   : > { %v6998_v45 = vadd.f32 %v6266_v30, %v2229_v28  ;;  %v4643_v16 = vpop.eup %4642  ;;  %v1864_v30 = vsel %vm6989_vm6, %v6884_v46, %v1860_v29  ;;  %v7019_v28 = vadd.f32 1.0, %v4637_v7  ;;  %v1849_v46 = vsel %vm7000_vm10, %v6904_v33, %v1845_v5  ;;  %vm7087_vm3 = vmor %vm1891_vm13, %vm1892_vm0 }
 0x21c   : > { %v7031_v29 = vadd.f32 1.0, %v4643_v16  ;;  %v1888_v52 = vsub.f32 1.0, %v1887_v17  ;;  %v1854_v33 = vsel %vm1851_vm12, %v1853_v61, %v1849_v46  ;;  %v8449_v46 = vpack.c.bf16 %v6558_v40, %v6567_v26 }
 0x21d   : > { %2376 = vadd.xlane.f32.xlu2 %v6998_v45  ;;  %4644 = vrcp.f32 %v7019_v28  ;;  %vm1877_vm15 = vweird.f32 %v6993_v62  ;;  %vm1906_vm5 = vweird.f32 %v7019_v28 }
 0x21e   : > { %v2349_v1 = vpop.xlane.xlu0 %2348  ;;  %4646 = vrcp.f32 %v7031_v29  ;;  %vm7100_vm1 = vmor %vm1876_vm14, %vm1877_vm15  ;;  %vm1921_vm8 = vweird.f32 %v7031_v29 }
 0x21f   : > { %v2471_v53 = vmul.f32 %v6359_v59, %v2349_v1 }
 0x220   : > { %2268 = vmatmul.bf16.gmra.mxu2 %v8435_v22  ;;  %v8444_v22 = vld [vmem:[#allocation25_spill] sm:$0xff] }
 0x221   : > { %v6981_v4 = vsub.f32 %v8436_v12, %v2471_v53  ;;  %v7010_v12 = vadd.f32 %v6428_v27, %v8444_v22  ;;  %v1872_v22 = vmul.f32 %v6993_v62, %v6949_v8  ;;  %v1869_v27 = vsel %vm7004_vm11, %v1868_v10, %v1864_v30 }
 0x222   : > { %v2231_v19 = vpop.f32.mrf.mxu1  ;;  %v7043_v16 = vmul.f32 %v1869_v27, %v6725_v54  ;;  %v7057_v10 = vmul.f32 %v1854_v33, %v6733_v31  ;;  %v1889_v54 = vmul.f32 %v6986_v23, %v1888_v52 }
 0x223   : > { %8437 = vst [vmem:[#allocation10_spill] sm:$0xff] %v6981_v4  ;;  %v2599_v58 = vmul.f32 %v6981_v4, %v6981_v4  ;;  %v4091_v56 = vmul.f32 -1.442695, %v7010_v12  ;;  %v1873_v5 = vsub.f32 1.0, %v1872_v22  ;;  %v7063_v30 = vpop.eup %4644  ;;  %v1897_v22 = vand.u32 2147483648, %v6947_v13 }
 0x224   : > { %v1890_v27 = vadd.f32 %v6986_v23, %v1889_v54  ;;  %v1902_v40 = vmul.f32 %v7063_v30, %v7019_v28  ;;  %vm1907_vm7 = vweird.f32 %v7063_v30 }
 0x225   : > { %2675 = vadd.xlane.f32.xlu1 %v2599_v58  ;;  %4648 = vpow2.f32 %v4091_v56  ;;  %v1874_v17 = vmul.f32 %v6993_v62, %v1873_v5  ;;  %vm7150_vm6 = vmor %vm1906_vm5, %vm1907_vm7 }
 0x226   : > { %v2351_v4 = vpop.xlane.xlu1 %2350  ;;  %4650 = vpow2.f32 %v4092_v3  ;;  %v1882_v3 = vand.u32 2147483648, %v6949_v8 }
 0x227   : > { %v2472_v7 = vmul.f32 %v6359_v59, %v2351_v4  ;;  %v7049_v4 = vld [vmem:[%s8213_s4] ss:$0 sm:$0xff] }
 0x228   : > { %v7052_v1 = vadd.f32 %v7049_v4, %v2231_v19  ;;  %v1875_v19 = vadd.f32 %v6993_v62, %v1874_v17  ;;  %v1894_v17 = vsel %vm7087_vm3, %v6986_v23, %v1890_v27 }
 0x229   : > { %v7040_v11 = vsub.f32 %v8446_v37, %v2472_v7  ;;  %v7077_v7 = vpop.eup %4646 }
 0x22a   : > { %2378 = vadd.xlane.f32.xlu0 %v7052_v1  ;;  %vm1922_vm9 = vweird.f32 %v7077_v7 }
 0x22b   : > { %8447 = vst [vmem:[#allocation9_spill] sm:$0xff] %v7040_v11  ;;  %v2600_v37 = vmul.f32 %v7040_v11, %v7040_v11  ;;  %v4649_v52 = vpop.eup %4648  ;;  %vm7173_vm11 = vmor %vm1921_vm8, %vm1922_vm9 }
 0x22c   : > { %v2234_v26 = vpop.f32.mrf.mxu1  ;;  %v4651_v5 = vpop.eup %4650 }
 0x22d   : > { %2677 = vadd.xlane.f32.xlu2 %v2600_v37  ;;  %v1880_v37 = vand.u32 2147483647, %v6949_v8  ;;  %v1883_v8 = vor.u32 1.1754944e-38, %v1882_v3  ;;  %v7113_v11 = vadd.f32 1.0, %v4651_v5 }
 0x22e   : > { %v2353_v53 = vpop.xlane.xlu2 %2352 }
 0x22f   : > { %v2473_v58 = vmul.f32 %v6359_v59, %v2353_v53  ;;  %v7096_v53 = vadd.f32 %v7049_v4, %v2234_v26  ;;  %v7110_v26 = vadd.f32 1.0, %v4649_v52  ;;  %vm1881_vm4 = vcmp.eq.f32.partialorder %v1880_v37, 8.507059e+37 }
 0x230   : > { %2273 = vmatmul.bf16.gmra.mxu2 %v8449_v46  ;;  %v1917_v46 = vmul.f32 %v7077_v7, %v7031_v29  ;;  %vm1951_vm0 = vweird.f32 %v7113_v11 }
 0x231   : > { %v7068_v61 = vsub.f32 %v6310_v38, %v2473_v58  ;;  %v1895_v38 = vand.u32 2147483647, %v6947_v13  ;;  %v1898_v58 = vor.u32 1.1754944e-38, %v1897_v22  ;;  %2380 = vadd.xlane.f32.xlu1 %v7096_v53  ;;  %4652 = vrcp.f32 %v7110_v26 }
 0x232   : > { %v1918_v23 = vsub.f32 1.0, %v1917_v46  ;;  %4654 = vrcp.f32 %v7113_v11  ;;  %vm1936_vm13 = vweird.f32 %v7110_v26 }
 0x233   : > { %8448 = vst [vmem:[#allocation27_spill] sm:$0xff] %v7068_v61  ;;  %v2601_v56 = vmul.f32 %v7068_v61, %v7068_v61  ;;  %vm1896_vm2 = vcmp.eq.f32.partialorder %v1895_v38, 8.507059e+37  ;;  %v1903_v61 = vsub.f32 1.0, %v1902_v40 }
 0x234   : > { %v1899_v33 = vsel %vm1896_vm2, %v1898_v58, %v1894_v17  ;;  %v2236_v52 = vpop.f32.mrf.mxu1  ;;  %v1919_v5 = vmul.f32 %v7077_v7, %v1918_v23  ;;  %v1927_v58 = vand.u32 2147483648, %v7031_v29  ;;  %v8457_v23 = vpack.c.bf16 %v6637_v24, %v6644_v18 }
 0x235   : > { %2679 = vadd.xlane.f32.xlu0 %v2601_v56  ;;  %v1904_v56 = vmul.f32 %v7063_v30, %v1903_v61 }
 0x236   : > { %v2355_v54 = vpop.xlane.xlu0 %2354  ;;  %v1928_v18 = vor.u32 1.1754944e-38, %v1927_v58 }
 0x237   : > { %v2474_v31 = vmul.f32 %v6359_v59, %v2355_v54  ;;  %v1879_v54 = vsel %vm7100_vm1, %v6993_v62, %v1875_v19  ;;  %v7130_v62 = vadd.f32 %v7049_v4, %v2236_v52  ;;  %v1910_v19 = vand.u32 2147483647, %v7019_v28  ;;  %v7148_v46 = vpop.eup %4652 }
 0x238   : > { %v1884_v38 = vsel %vm1881_vm4, %v1883_v8, %v1879_v54  ;;  %v2319_v3 = vpop.f32.mrf.mxu3  ;;  %v1905_v13 = vadd.f32 %v7063_v30, %v1904_v56  ;;  %v7157_v8 = vpop.eup %4654  ;;  %v1920_v54 = vadd.f32 %v7077_v7, %v1919_v5  ;;  %v1932_v5 = vmul.f32 %v7148_v46, %v7110_v26 }
 0x239   : > { %v7116_v22 = vsub.f32 %v6343_v60, %v2474_v31  ;;  %v2652_v60 = vpop.xlane.xlu1 %2651  ;;  %v7127_v31 = vmul.f32 %v1899_v33, %v6840_v47  ;;  %v7137_v61 = vmul.f32 %v1884_v38, %v6846_v32  ;;  %v1912_v47 = vand.u32 2147483648, %v7019_v28  ;;  %2382 = vadd.xlane.f32.xlu2 %v7130_v62 }
 0x23a   : > { %v2779_v40 = vmul.f32 %v2652_v60, %v6359_v59  ;;  %v1925_v33 = vand.u32 2147483647, %v7031_v29  ;;  %vm7165_vm10 = vcmp.eq.f32.partialorder %v1910_v19, 8.507059e+37  ;;  %v1909_v24 = vsel %vm7150_vm6, %v7063_v30, %v1905_v13 }
 0x23b   : > { %8454 = vst [vmem:[#allocation24_spill] sm:$0xff] %v7116_v22  ;;  %v2602_v27 = vmul.f32 %v7116_v22, %v7116_v22  ;;  %v1913_v52 = vor.u32 1.1754944e-38, %v1912_v47  ;;  %v1947_v29 = vmul.f32 %v7157_v8, %v7113_v11  ;;  %v1924_v30 = vsel %vm7173_vm11, %v7077_v7, %v1920_v54 }
 0x23c   : > { %v7142_v37 = vadd.f32 1e-05, %v2779_v40  ;;  %v2654_v28 = vpop.xlane.xlu2 %2653  ;;  %vm1926_vm12 = vcmp.eq.f32.partialorder %v1925_v33, 8.507059e+37  ;;  %v1940_v56 = vand.u32 2147483647, %v7110_v26  ;;  %vm1937_vm15 = vweird.f32 %v7148_v46 }
 0x23d   : > { %2681 = vadd.xlane.f32.xlu1 %v2602_v27  ;;  %v2780_v27 = vmul.f32 %v2654_v28, %v6359_v59  ;;  %v7188_v28 = vadd.f32 %v7049_v4, %v2319_v3  ;;  %v1914_v3 = vsel %vm7165_vm10, %v1913_v52, %v1909_v24  ;;  %v1929_v54 = vsel %vm1926_vm12, %v1928_v18, %v1924_v30  ;;  %vm7266_vm4 = vmor %vm1936_vm13, %vm1937_vm15 }
 0x23e   : > { %4656 = vrsqrt.f32 %v7142_v37  ;;  %v1948_v33 = vsub.f32 1.0, %v1947_v29  ;;  %v7210_v60 = vmul.f32 %v1914_v3, %v6901_v41  ;;  %v1955_v24 = vand.u32 2147483647, %v7113_v11 }
 0x23f   : > { %v7183_v47 = vadd.f32 1e-05, %v2780_v27  ;;  %8462 = vst [vmem:[#allocation8_spill] sm:$0xff] %v7188_v28  ;;  %v1933_v27 = vsub.f32 1.0, %v1932_v5  ;;  %v7222_v41 = vmul.f32 %v1929_v54, %v6931_v21  ;;  %vm2913_vm3 = vweird.f32 %v7142_v37 }
 0x240   : > { %2278 = vmatmul.bf16.gmra.mxu2 %v8457_v23  ;;  %v2321_v23 = vpop.f32.mrf.mxu3  ;;  %v1949_v3 = vmul.f32 %v7157_v8, %v1948_v33  ;;  %v1957_v33 = vand.u32 2147483648, %v7113_v11  ;;  %vm1952_vm1 = vweird.f32 %v7157_v8  ;;  %vm7278_vm7 = vcmp.eq.f32.partialorder %v1940_v56, 8.507059e+37 }
 0x241   : > { %v2656_v38 = vpop.xlane.xlu0 %2655  ;;  %v2357_v19 = vpop.xlane.xlu1 %2356  ;;  %v7197_v13 = vadd.f32 %v7049_v4, %v2321_v23  ;;  %4658 = vrsqrt.f32 %v7183_v47  ;;  %2448 = vadd.xlane.f32.xlu2 %v7188_v28  ;;  %vm7286_vm8 = vmor %vm1951_vm0, %vm1952_vm1  ;;  %vm2923_vm9 = vweird.f32 %v7183_v47  ;;  %vm7300_vm6 = vcmp.eq.f32.partialorder %v1955_v24, 8.507059e+37 }
 0x242   : > { %v2781_v40 = vmul.f32 %v2656_v38, %v6359_v59  ;;  %v2475_v38 = vmul.f32 %v6359_v59, %v2357_v19  ;;  %v1934_v19 = vmul.f32 %v7148_v46, %v1933_v27 }
 0x243   : > { %v2239_v17 = vpop.f32.mrf.mxu2  ;;  %8463 = vst [vmem:[#allocation7_spill] sm:$0xff] %v7197_v13  ;;  %2450 = vadd.xlane.f32.xlu0 %v7197_v13 }
 0x244   : > { %v7191_v22 = vadd.f32 1e-05, %v2781_v40  ;;  %v4657_v58 = vpop.eup %4656  ;;  %v7204_v32 = vsub.f32 %v6481_v51, %v2475_v38  ;;  %v1942_v51 = vand.u32 2147483648, %v7110_v26 }
 0x245   : > { %v2908_v7 = vmul.f32 %v4657_v58, %v7142_v37  ;;  %vm2914_vm14 = vweird.f32 %v4657_v58  ;;  %v1935_v37 = vadd.f32 %v7148_v46, %v1934_v19  ;;  %v7273_v19 = vld [vmem:[%s8214_s5] ss:$0 sm:$0xff] }
 0x246   : > { %8464 = vst [vmem:[#allocation12_spill] sm:$0xff] %v7204_v32  ;;  %4660 = vrsqrt.f32 %v7191_v22  ;;  %v2359_v40 = vpop.xlane.xlu2 %2358  ;;  %v2603_v5 = vmul.f32 %v7204_v32, %v7204_v32  ;;  %vm2915_vm2 = vmor %vm2913_vm3, %vm2914_vm14  ;;  %vm2933_vm12 = vweird.f32 %v7191_v22 }
 0x247   : > { %v2909_v52 = vmul.f32 %v4657_v58, %v2908_v7  ;;  %v7219_v18 = vpop.eup %4658  ;;  %v2476_v23 = vmul.f32 %v6359_v59, %v2359_v40  ;;  %v7230_v7 = vadd.f32 %v7049_v4, %v2239_v17  ;;  %v1939_v11 = vsel %vm7266_vm4, %v7148_v46, %v1935_v37 }
 0x248   : > { %v2918_v13 = vmul.f32 %v7219_v18, %v7183_v47  ;;  %vm2924_vm5 = vweird.f32 %v7219_v18 }
 0x249   : > { %v2910_v29 = vmul.f32 0.5, %v2909_v52  ;;  %v2658_v38 = vpop.xlane.xlu1 %2657  ;;  %2683 = vadd.xlane.f32.xlu2 %v2603_v5  ;;  %v2084_v5 = vpack.c.bf16 %v7222_v41, %v7210_v60  ;;  %vm2925_vm10 = vmor %vm2923_vm9, %vm2924_vm5 }
 0x24a   : > { %v2782_v21 = vmul.f32 %v2658_v38, %v6359_v59  ;;  %v2919_v17 = vmul.f32 %v7219_v18, %v2918_v13  ;;  %v1950_v38 = vadd.f32 %v7157_v8, %v1949_v3 }
 0x24b   : > { %v2241_v28 = vpop.f32.mrf.mxu2  ;;  %v2911_v54 = vsub.f32 1.5, %v2910_v29  ;;  %2384 = vadd.xlane.f32.xlu0 %v7230_v7  ;;  %v7248_v29 = vsub.f32 %v6520_v50, %v2476_v23 }
 0x24c   : > { %v7226_v30 = vpop.eup %4660  ;;  %v7238_v52 = vadd.f32 %v7049_v4, %v2241_v28  ;;  %v7243_v40 = vadd.f32 1e-05, %v2782_v21  ;;  %v2920_v13 = vmul.f32 0.5, %v2919_v17  ;;  %v8465_v21 = vpack.c.bf16 %v6743_v57, %v6747_v25 }
 0x24d   : > { %v2928_v27 = vmul.f32 %v7226_v30, %v7191_v22  ;;  %v2912_v32 = vmul.f32 %v4657_v58, %v2911_v54  ;;  %v1943_v17 = vor.u32 1.1754944e-38, %v1942_v51  ;;  %vm2934_vm11 = vweird.f32 %v7226_v30 }
 0x24e   : > { %2386 = vadd.xlane.f32.xlu1 %v7238_v52  ;;  %4662 = vrsqrt.f32 %v7243_v40  ;;  %v2361_v54 = vpop.xlane.xlu0 %2360  ;;  %vm2935_vm13 = vmor %vm2933_vm12, %vm2934_vm11  ;;  %vm2943_vm14 = vweird.f32 %v7243_v40 }
 0x24f   : > { %v2929_v28 = vmul.f32 %v7226_v30, %v2928_v27  ;;  %v2916_v50 = vsel %vm2915_vm2, %v4657_v58, %v2912_v32  ;;  %v2921_v32 = vsub.f32 1.5, %v2920_v13  ;;  %v2477_v57 = vmul.f32 %v6359_v59, %v2361_v54 }
 0x250   : > { %2283 = vmatmul.bf16.gmra.mxu2 %v8465_v21  ;;  %v3547_v58 = vmul.f32 %v2916_v50, %v6395_v2  ;;  %v2604_v2 = vmul.f32 %v7248_v29, %v7248_v29 }
 0x251   : > { %v2930_v23 = vmul.f32 0.5, %v2929_v28  ;;  %v2922_v28 = vmul.f32 %v7219_v18, %v2921_v32  ;;  %v7295_v13 = vsub.f32 %v6562_v15, %v2477_v57  ;;  %v1954_v15 = vsel %vm7286_vm8, %v7157_v8, %v1950_v38 }
 0x252   : > { %v3615_v47 = vmul.f32 %v7273_v19, %v3547_v58  ;;  %v1944_v58 = vsel %vm7278_vm7, %v1943_v17, %v1939_v11 }
 0x253   : > { %v2931_v3 = vsub.f32 1.5, %v2930_v23  ;;  %v2244_v56 = vpop.f32.mrf.mxu2  ;;  %v1958_v23 = vor.u32 1.1754944e-38, %v1957_v33  ;;  %v2926_v46 = vsel %vm2925_vm10, %v7219_v18, %v2922_v28  ;;  %v2605_v24 = vmul.f32 %v7295_v13, %v7295_v13  ;;  %v7318_v33 = vld [vmem:[%s8215_s6] ss:$0 sm:$0xff]  ;;  %2685 = vadd.xlane.f32.xlu0 %v2604_v2 }
 0x254   : > { %v7305_v51 = vadd.f32 %v7049_v4, %v2244_v56  ;;  %v4663_v21 = vpop.eup %4662  ;;  %v3548_v37 = vmul.f32 %v2926_v46, %v6442_v14  ;;  %v3683_v57 = vadd.f32 %v7318_v33, %v3615_v47  ;;  %v7347_v11 = vmul.f32 %v1944_v58, %v7010_v12 }
 0x255   : > { %v2932_v54 = vmul.f32 %v7226_v30, %v2931_v3  ;;  %v2938_v8 = vmul.f32 %v4663_v21, %v7243_v40  ;;  %v1959_v18 = vsel %vm7300_vm6, %v1958_v23, %v1954_v15  ;;  %vm2944_vm0 = vweird.f32 %v4663_v21 }
 0x256   : > { %2388 = vadd.xlane.f32.xlu2 %v7305_v51  ;;  %2687 = vadd.xlane.f32.xlu1 %v2605_v24  ;;  %v3616_v38 = vmul.f32 %v7273_v19, %v3548_v37  ;;  %v2363_v27 = vpop.xlane.xlu1 %2362  ;;  %v7338_v28 = vmul.f32 %v1959_v18, %v7023_v9  ;;  %vm2945_vm15 = vmor %vm2943_vm14, %vm2944_vm0  ;;  %v2660_v46 = vpop.xlane.xlu2 %2659 }
 0x257   : > { %v2939_v14 = vmul.f32 %v4663_v21, %v2938_v8  ;;  %v2478_v32 = vmul.f32 %v6359_v59, %v2363_v27  ;;  %v2936_v3 = vsel %vm2935_vm13, %v7226_v30, %v2932_v54  ;;  %v2783_v40 = vmul.f32 %v2660_v46, %v6359_v59 }
 0x258   : > { %v3684_v26 = vadd.f32 %v7318_v33, %v3616_v38  ;;  %v3549_v23 = vmul.f32 %v2936_v3, %v6452_v63  ;;  %v2085_v9 = vpack.c.bf16 %v7338_v28, %v7347_v11  ;;  %v8474_v63 = vpack.c.bf16 %v6859_v55, %v6869_v42 }
 0x259   : > { %v2940_v2 = vmul.f32 0.5, %v2939_v14  ;;  %v7341_v22 = vsub.f32 %v6597_v43, %v2478_v32  ;;  %v2847_v54 = vadd.f32 1e-05, %v2783_v40 }
 0x25a   : > { %v4148_v50 = vpack.c.bf16 %v3684_v26, %v3683_v57  ;;  %v3617_v15 = vmul.f32 %v7273_v19, %v3549_v23 }
 0x25b   : > { %v2246_v56 = vpop.f32.mrf.mxu2  ;;  %v2941_v25 = vsub.f32 1.5, %v2940_v2  ;;  %v2606_v30 = vmul.f32 %v7341_v22, %v7341_v22  ;;  %4664 = vrsqrt.f32 %v2847_v54  ;;  %vm2953_vm1 = vweird.f32 %v2847_v54 }
 0x25c   : > { %v7344_v17 = vadd.f32 %v7049_v4, %v2246_v56  ;;  %4149 = vst [vmem:[%s7352_s16] sm:$0xff] %v4148_v50  }
 0x25d   : > { %v2942_v43 = vmul.f32 %v4663_v21, %v2941_v25 }
 0x25e   : > { %2390 = vadd.xlane.f32.xlu0 %v7344_v17  ;;  %2689 = vadd.xlane.f32.xlu2 %v2606_v30  ;;  %v8475_v30 = vpack.c.bf16 %v6957_v36, %v6962_v0 }
 0x25f   : > { %v2946_v12 = vsel %vm2945_vm15, %v4663_v21, %v2942_v43  ;;  %v3685_v21 = vadd.f32 %v7318_v33, %v3617_v15 }
 0x260   : > { %2288 = vmatmul.bf16.gmra.mxu2 %v8474_v63  ;;  %v3550_v47 = vmul.f32 %v2946_v12, %v6509_v48  ;;  %v2365_v48 = vpop.xlane.xlu2 %2364 }
 0x261   : > { %v2664_v18 = vpop.xlane.xlu1 %2663  ;;  %v2479_v27 = vmul.f32 %v6359_v59, %v2365_v48  ;;  %v4665_v26 = vpop.eup %4664 }
 0x262   : > { %v3618_v24 = vmul.f32 %v7273_v19, %v3550_v47  ;;  %v2785_v14 = vmul.f32 %v2664_v18, %v6359_v59  ;;  %v2948_v50 = vmul.f32 %v4665_v26, %v2847_v54  ;;  %vm2954_vm3 = vweird.f32 %v4665_v26 }
 0x263   : > { %v2249_v37 = vpop.f32.mrf.mxu2  ;;  %v7379_v3 = vsub.f32 %v6703_v6, %v2479_v27  ;;  %vm2955_vm2 = vmor %vm2953_vm1, %vm2954_vm3 }
 0x264   : > { %v7367_v8 = vadd.f32 %v7049_v4, %v2249_v37  ;;  %v3686_v55 = vadd.f32 %v7318_v33, %v3618_v24  ;;  %v7376_v57 = vadd.f32 1e-05, %v2785_v14  ;;  %v2949_v23 = vmul.f32 %v4665_v26, %v2948_v50 }
 0x265   : > { %v2607_v25 = vmul.f32 %v7379_v3, %v7379_v3 }
 0x266   : > { %2392 = vadd.xlane.f32.xlu1 %v7367_v8  ;;  %v4153_v42 = vpack.c.bf16 %v3686_v55, %v3685_v21  ;;  %4666 = vrsqrt.f32 %v7376_v57  ;;  %v2950_v6 = vmul.f32 0.5, %v2949_v23  ;;  %v8476_v21 = vld [vmem:[#allocation19_spill] sm:$0xff]  ;;  %vm2973_vm9 = vweird.f32 %v7376_v57 }
 0x267   : > { %v2662_v38 = vpop.xlane.xlu0 %2661  ;;  %2691 = vadd.xlane.f32.xlu0 %v2607_v25 }
 0x268   : > { %4305 = vst [vmem:[%s7352_s16 + $0x8] sm:$0xff] %v4153_v42   ;;  %v2784_v58 = vmul.f32 %v2662_v38, %v6359_v59  ;;  %v2951_v46 = vsub.f32 1.5, %v2950_v6 }
 0x269   : > { %v2666_v12 = vpop.xlane.xlu2 %2665 }
 0x26a   : > { %v2848_v2 = vadd.f32 1e-05, %v2784_v58  ;;  %v2786_v15 = vmul.f32 %v2666_v12, %v6359_v59  ;;  %v2952_v0 = vmul.f32 %v4665_v26, %v2951_v46 }
 0x26b   : > { %v2251_v32 = vpop.f32.mrf.mxu2 }
 0x26c   : > { %v7382_v56 = vadd.f32 %v7049_v4, %v2251_v32  ;;  %4668 = vrsqrt.f32 %v2848_v2  ;;  %v7393_v47 = vpop.eup %4666  ;;  %v2850_v18 = vadd.f32 1e-05, %v2786_v15  ;;  %v2956_v58 = vsel %vm2955_vm2, %v4665_v26, %v2952_v0 }
 0x26d   : > { %v2968_v37 = vmul.f32 %v7393_v47, %v7376_v57  ;;  %vm2963_vm5 = vweird.f32 %v2848_v2  ;;  %vm2974_vm7 = vweird.f32 %v7393_v47 }
 0x26e   : > { %2394 = vadd.xlane.f32.xlu2 %v7382_v56  ;;  %4670 = vrsqrt.f32 %v2850_v18  ;;  %vm7422_vm6 = vmor %vm2973_vm9, %vm2974_vm7  ;;  %vm2983_vm11 = vweird.f32 %v2850_v18 }
 0x26f   : > { %v2367_v43 = vpop.xlane.xlu0 %2366  ;;  %v2969_v48 = vmul.f32 %v7393_v47, %v2968_v37 }
 0x270   : > { %2293 = vmatmul.bf16.gmra.mxu2 %v8475_v30  ;;  %v2480_v63 = vmul.f32 %v6359_v59, %v2367_v43  ;;  %v2369_v27 = vpop.xlane.xlu1 %2368  ;;  %v8477_v30 = vld [vmem:[#allocation17_spill] sm:$0xff] }
 0x271   : > { %v2970_v32 = vmul.f32 0.5, %v2969_v48  ;;  %v2481_v50 = vmul.f32 %v6359_v59, %v2369_v27  ;;  %v3551_v6 = vmul.f32 %v2956_v58, %v8477_v30  ;;  %v8481_v27 = vpack.c.bf16 %v7043_v16, %v7057_v10 }
 0x272   : > { %v4669_v24 = vpop.eup %4668  ;;  %v7398_v55 = vsub.f32 %v8476_v21, %v2480_v63 }
 0x273   : > { %v2254_v40 = vpop.f32.mrf.mxu2  ;;  %v2958_v42 = vmul.f32 %v4669_v24, %v2848_v2  ;;  %v2971_v23 = vsub.f32 1.5, %v2970_v32  ;;  %v7409_v54 = vsub.f32 %v6807_v34, %v2481_v50  ;;  %vm2964_vm4 = vweird.f32 %v4669_v24 }
 0x274   : > { %v7401_v36 = vadd.f32 %v7049_v4, %v2254_v40  ;;  %v2608_v38 = vmul.f32 %v7398_v55, %v7398_v55  ;;  %v4671_v15 = vpop.eup %4670  ;;  %vm2965_vm8 = vmor %vm2963_vm5, %vm2964_vm4  ;;  %v3619_v37 = vmul.f32 %v7273_v19, %v3551_v6 }
 0x275   : > { %v2959_v14 = vmul.f32 %v4669_v24, %v2958_v42  ;;  %v2609_v63 = vmul.f32 %v7409_v54, %v7409_v54  ;;  %v2972_v40 = vmul.f32 %v7393_v47, %v2971_v23  ;;  %v2978_v34 = vmul.f32 %v4671_v15, %v2850_v18  ;;  %v8478_v42 = vld [vmem:[#allocation20_spill] sm:$0xff] }
 0x276   : > { %2693 = vadd.xlane.f32.xlu1 %v2608_v38  ;;  %2396 = vadd.xlane.f32.xlu0 %v7401_v36  ;;  %v3687_v23 = vadd.f32 %v7318_v33, %v3619_v37  ;;  %vm2984_vm10 = vweird.f32 %v4671_v15  ;;  %v8483_v37 = vld [vmem:[#allocation18_spill] sm:$0xff] }
 0x277   : > { %v2960_v25 = vmul.f32 0.5, %v2959_v14  ;;  %2695 = vadd.xlane.f32.xlu2 %v2609_v63  ;;  %v2979_v2 = vmul.f32 %v4671_v15, %v2978_v34  ;;  %v2976_v57 = vsel %vm7422_vm6, %v7393_v47, %v2972_v40  ;;  %vm2985_vm12 = vmor %vm2983_vm11, %vm2984_vm10 }
 0x278   : > { %v2371_v0 = vpop.xlane.xlu2 %2370 }
 0x279   : > { %v2961_v43 = vsub.f32 1.5, %v2960_v25  ;;  %v2482_v14 = vmul.f32 %v6359_v59, %v2371_v0  ;;  %v2980_v32 = vmul.f32 0.5, %v2979_v2 }
 0x27b   : > { %v2256_v12 = vpop.f32.mrf.mxu2  ;;  %v2962_v46 = vmul.f32 %v4669_v24, %v2961_v43  ;;  %v7436_v50 = vsub.f32 %v6855_v44, %v2482_v14  ;;  %v2981_v10 = vsub.f32 1.5, %v2980_v32  ;;  %v8482_v43 = vld [vmem:[#allocation21_spill] sm:$0xff] }
 0x27c   : > { %v7415_v26 = vadd.f32 %v7049_v4, %v2256_v12  ;;  %v3553_v12 = vmul.f32 %v2976_v57, %v8482_v43 }
 0x27d   : > { %v2966_v21 = vsel %vm2965_vm8, %v4669_v24, %v2962_v46  ;;  %v2668_v24 = vpop.xlane.xlu0 %2667  ;;  %v2610_v44 = vmul.f32 %v7436_v50, %v7436_v50  ;;  %v2982_v46 = vmul.f32 %v4671_v15, %v2981_v10 }
 0x27e   : > { %v3552_v48 = vmul.f32 %v2966_v21, %v8478_v42  ;;  %2398 = vadd.xlane.f32.xlu1 %v7415_v26  ;;  %v2787_v25 = vmul.f32 %v2668_v24, %v6359_v59  ;;  %v3621_v34 = vmul.f32 %v7273_v19, %v3553_v12  ;;  %v8484_v12 = vpack.c.bf16 %v7127_v31, %v7137_v61 }
 0x27f   : > { %2697 = vadd.xlane.f32.xlu0 %v2610_v44  ;;  %v2986_v40 = vsel %vm2985_vm12, %v4671_v15, %v2982_v46 }
 0x280   : > { %2298 = vmatmul.bf16.gmra.mxu2 %v8481_v27  ;;  %v3620_v58 = vmul.f32 %v7273_v19, %v3552_v48  ;;  %v7441_v6 = vadd.f32 1e-05, %v2787_v25  ;;  %v3554_v21 = vmul.f32 %v2986_v40, %v8483_v37  ;;  %v3689_v15 = vadd.f32 %v7318_v33, %v3621_v34 }
 0x282   : > { %v3688_v16 = vadd.f32 %v7318_v33, %v3620_v58  ;;  %4672 = vrsqrt.f32 %v7441_v6  ;;  %v3622_v42 = vmul.f32 %v7273_v19, %v3554_v21  ;;  %vm2993_vm0 = vweird.f32 %v7441_v6 }
 0x283   : > { %v2259_v30 = vpop.f32.mrf.mxu2  ;;  %v2670_v48 = vpop.xlane.xlu1 %2669 }
 0x284   : > { %v7444_v47 = vadd.f32 %v7049_v4, %v2259_v30  ;;  %v4158_v63 = vpack.c.bf16 %v3688_v16, %v3687_v23  ;;  %v2788_v14 = vmul.f32 %v2670_v48, %v6359_v59  ;;  %v3690_v24 = vadd.f32 %v7318_v33, %v3622_v42 }
 0x285   : > { %v2373_v0 = vpop.xlane.xlu0 %2372  ;;  %v2672_v57 = vpop.xlane.xlu2 %2671 }
 0x286   : > { %2400 = vadd.xlane.f32.xlu2 %v7444_v47  ;;  %4306 = vst [vmem:[%s7352_s16 + $0x10] sm:$0xff] %v4158_v63   ;;  %v2483_v38 = vmul.f32 %v6359_v59, %v2373_v0  ;;  %v2852_v25 = vadd.f32 1e-05, %v2788_v14  ;;  %v2789_v23 = vmul.f32 %v2672_v57, %v6359_v59  ;;  %v4163_v30 = vpack.c.bf16 %v3690_v24, %v3689_v15 }
 0x288   : > { %v4673_v18 = vpop.eup %4672  ;;  %v7464_v32 = vsub.f32 %v6918_v39, %v2483_v38  ;;  %4674 = vrsqrt.f32 %v2852_v25  ;;  %v7470_v43 = vadd.f32 1e-05, %v2789_v23  ;;  %4307 = vst [vmem:[%s7352_s16 + $0x18] sm:$0xff] %v4163_v30   ;;  %vm3003_vm3 = vweird.f32 %v2852_v25 }
 0x289   : > { %v2988_v58 = vmul.f32 %v4673_v18, %v7441_v6  ;;  %vm2994_vm13 = vweird.f32 %v4673_v18 }
 0x28a   : > { %v2611_v10 = vmul.f32 %v7464_v32, %v7464_v32  ;;  %4676 = vrsqrt.f32 %v7470_v43  ;;  %vm2995_vm14 = vmor %vm2993_vm0, %vm2994_vm13  ;;  %vm3013_vm4 = vweird.f32 %v7470_v43 }
 0x28b   : > { %v2261_v2 = vpop.f32.mrf.mxu2  ;;  %v2989_v16 = vmul.f32 %v4673_v18, %v2988_v58  ;;  %v2375_v46 = vpop.xlane.xlu1 %2374 }
 0x28c   : > { %v7458_v27 = vadd.f32 %v7049_v4, %v2261_v2  ;;  %2699 = vadd.xlane.f32.xlu1 %v2611_v10  ;;  %v2484_v37 = vmul.f32 %v6359_v59, %v2375_v46 }
 0x28d   : > { %v2990_v39 = vmul.f32 0.5, %v2989_v16  ;;  %v2674_v44 = vpop.xlane.xlu0 %2673 }
 0x28e   : > { %2402 = vadd.xlane.f32.xlu0 %v7458_v27  ;;  %v2790_v34 = vmul.f32 %v2674_v44, %v6359_v59  ;;  %v4675_v31 = vpop.eup %4674  ;;  %v7485_v61 = vsub.f32 %v6967_v49, %v2484_v37 }
 0x28f   : > { %v2991_v63 = vsub.f32 1.5, %v2990_v39  ;;  %v2998_v48 = vmul.f32 %v4675_v31, %v2852_v25  ;;  %vm3004_vm15 = vweird.f32 %v4675_v31 }
 0x290   : > { %2303 = vmatmul.bf16.gmra.mxu2 %v8484_v12  ;;  %v7482_v0 = vadd.f32 1e-05, %v2790_v34  ;;  %v4677_v38 = vpop.eup %4676  ;;  %v2612_v2 = vmul.f32 %v7485_v61, %v7485_v61  ;;  %v2377_v14 = vpop.xlane.xlu2 %2376  ;;  %vm3005_vm2 = vmor %vm3003_vm3, %vm3004_vm15 }
 0x291   : > { %v2992_v42 = vmul.f32 %v4673_v18, %v2991_v63  ;;  %v2999_v57 = vmul.f32 %v4675_v31, %v2998_v48  ;;  %v3008_v15 = vmul.f32 %v4677_v38, %v7470_v43  ;;  %v2485_v24 = vmul.f32 %v6359_v59, %v2377_v14 }
 0x292   : > { %4678 = vrsqrt.f32 %v7482_v0  ;;  %2701 = vadd.xlane.f32.xlu2 %v2612_v2  ;;  %vm3014_vm1 = vweird.f32 %v4677_v38  ;;  %vm3023_vm8 = vweird.f32 %v7482_v0 }
 0x293   : > { %v2264_v40 = vpop.f32.mrf.mxu2  ;;  %v2996_v49 = vsel %vm2995_vm14, %v4673_v18, %v2992_v42  ;;  %v3000_v58 = vmul.f32 0.5, %v2999_v57  ;;  %v3009_v23 = vmul.f32 %v4677_v38, %v3008_v15  ;;  %v7495_v30 = vsub.f32 %v6998_v45, %v2485_v24  ;;  %vm3015_vm5 = vmor %vm3013_vm4, %vm3014_vm1 }
 0x294   : > { %v7480_v21 = vadd.f32 %v7049_v4, %v2264_v40  ;;  %v3555_v46 = vmul.f32 %v2996_v49, %v6852_v20 }
 0x295   : > { %v3001_v39 = vsub.f32 1.5, %v3000_v58  ;;  %v3010_v44 = vmul.f32 0.5, %v3009_v23  ;;  %v2613_v63 = vmul.f32 %v7495_v30, %v7495_v30  ;;  %v8485_v58 = vld [vmem:[#allocation5_spill] sm:$0xff] }
 0x296   : > { %2404 = vadd.xlane.f32.xlu1 %v7480_v21  ;;  %v3623_v15 = vmul.f32 %v7273_v19, %v3555_v46 }
 0x297   : > { %v3002_v34 = vmul.f32 %v4675_v31, %v3001_v39  ;;  %v3011_v37 = vsub.f32 1.5, %v3010_v44  ;;  %2703 = vadd.xlane.f32.xlu0 %v2613_v63 }
 0x298   : > { %v2676_v10 = vpop.xlane.xlu1 %2675  ;;  %v4679_v6 = vpop.eup %4678 }
 0x299   : > { %v2791_v12 = vmul.f32 %v2676_v10, %v6359_v59  ;;  %v3018_v18 = vmul.f32 %v4679_v6, %v7482_v0  ;;  %v3006_v2 = vsel %vm3005_vm2, %v4675_v31, %v3002_v34  ;;  %v3012_v14 = vmul.f32 %v4677_v38, %v3011_v37 }
 0x29a   : > { %v3556_v24 = vmul.f32 %v3006_v2, %v6915_v35  ;;  %vm3024_vm7 = vweird.f32 %v4679_v6 }
 0x29b   : > { %v2266_v16 = vpop.f32.mrf.mxu2  ;;  %v7505_v45 = vadd.f32 1e-05, %v2791_v12  ;;  %v3019_v42 = vmul.f32 %v4679_v6, %v3018_v18  ;;  %v3016_v49 = vsel %vm3015_vm5, %v4677_v38, %v3012_v14  ;;  %vm3025_vm9 = vmor %vm3023_vm8, %vm3024_vm7 }
 0x29c   : > { %v7503_v40 = vadd.f32 %v7049_v4, %v2266_v16  ;;  %v3624_v31 = vmul.f32 %v7273_v19, %v3556_v24  ;;  %v3557_v23 = vmul.f32 %v3016_v49, %v8485_v58 }
 0x29d   : > { %4680 = vrsqrt.f32 %v7505_v45  ;;  %v2379_v48 = vpop.xlane.xlu0 %2378  ;;  %v3020_v43 = vmul.f32 0.5, %v3019_v42  ;;  %v8486_v42 = vld [vmem:[#allocation6_spill] sm:$0xff]  ;;  %vm3033_vm10 = vweird.f32 %v7505_v45 }
 0x29e   : > { %v2486_v57 = vmul.f32 %v6359_v59, %v2379_v48  ;;  %2406 = vadd.xlane.f32.xlu2 %v7503_v40  ;;  %v3692_v12 = vadd.f32 %v7318_v33, %v3624_v31  ;;  %v3625_v46 = vmul.f32 %v7273_v19, %v3557_v23 }
 0x29f   : > { %v3021_v16 = vsub.f32 1.5, %v3020_v43 }
 0x2a0   : > { %2308 = vmatmul.bf16.gmra.mxu2 %v2084_v5  ;;  %v2678_v20 = vpop.xlane.xlu2 %2677  ;;  %v7519_v60 = vsub.f32 %v7052_v1, %v2486_v57  ;;  %v3691_v1 = vadd.f32 %v7318_v33, %v3623_v15 }
 0x2a1   : > { %v2792_v25 = vmul.f32 %v2678_v20, %v6359_v59  ;;  %v3022_v39 = vmul.f32 %v4679_v6, %v3021_v16 }
 0x2a2   : > { %v2614_v10 = vmul.f32 %v7519_v60, %v7519_v60  ;;  %v4168_v63 = vpack.c.bf16 %v3692_v12, %v3691_v1 }
 0x2a3   : > { %v2269_v41 = vpop.f32.mrf.mxu2  ;;  %v7521_v5 = vadd.f32 1e-05, %v2792_v25  ;;  %v4681_v38 = vpop.eup %4680  ;;  %v3026_v18 = vsel %vm3025_vm9, %v4679_v6, %v3022_v39  ;;  %v3693_v6 = vadd.f32 %v7318_v33, %v3625_v46 }
 0x2a4   : > { %v7526_v35 = vadd.f32 %v7049_v4, %v2269_v41  ;;  %v3028_v44 = vmul.f32 %v4681_v38, %v7505_v45  ;;  %2705 = vadd.xlane.f32.xlu1 %v2614_v10  ;;  %v2381_v34 = vpop.xlane.xlu1 %2380  ;;  %v3558_v48 = vmul.f32 %v3026_v18, %v8486_v42  ;;  %4308 = vst [vmem:[%s7352_s16 + $0x20] sm:$0xff] %v4168_v63   ;;  %vm3034_vm6 = vweird.f32 %v4681_v38 }
 0x2a5   : > { %4682 = vrsqrt.f32 %v7521_v5  ;;  %v2487_v2 = vmul.f32 %v6359_v59, %v2381_v34  ;;  %vm3035_vm11 = vmor %vm3033_vm10, %vm3034_vm6  ;;  %v8487_v34 = vld [vmem:[#allocation10_spill] sm:$0xff]  ;;  %vm3043_vm13 = vweird.f32 %v7521_v5 }
 0x2a6   : > { %2408 = vadd.xlane.f32.xlu0 %v7526_v35  ;;  %v3029_v20 = vmul.f32 %v4681_v38, %v3028_v44  ;;  %v3626_v57 = vmul.f32 %v7273_v19, %v3558_v48 }
 0x2a7   : > { %v7544_v15 = vsub.f32 %v7096_v53, %v2487_v2 }
 0x2a8   : > { %v2680_v37 = vpop.xlane.xlu0 %2679  ;;  %v3030_v25 = vmul.f32 0.5, %v3029_v20  ;;  %v3694_v31 = vadd.f32 %v7318_v33, %v3626_v57 }
 0x2a9   : > { %v2793_v0 = vmul.f32 %v2680_v37, %v6359_v59  ;;  %v2615_v23 = vmul.f32 %v7544_v15, %v7544_v15 }
 0x2aa   : > { %v3031_v58 = vsub.f32 1.5, %v3030_v25  ;;  %v4173_v16 = vpack.c.bf16 %v3694_v31, %v3693_v6 }
 0x2ab   : > { %v4683_v14 = vpop.eup %4682  ;;  %v2271_v24 = vpop.f32.mrf.mxu2  ;;  %v2857_v43 = vadd.f32 1e-05, %v2793_v0  ;;  %2707 = vadd.xlane.f32.xlu2 %v2615_v23 }
 0x2ac   : > { %v3038_v49 = vmul.f32 %v4683_v14, %v7521_v5  ;;  %v7549_v41 = vadd.f32 %v7049_v4, %v2271_v24  ;;  %v3032_v10 = vmul.f32 %v4681_v38, %v3031_v58  ;;  %v2383_v12 = vpop.xlane.xlu2 %2382  ;;  %4309 = vst [vmem:[%s7352_s16 + $0x28] sm:$0xff] %v4173_v16   ;;  %vm3044_vm12 = vweird.f32 %v4683_v14 }
 0x2ad   : > { %4684 = vrsqrt.f32 %v2857_v43  ;;  %v2488_v63 = vmul.f32 %v6359_v59, %v2383_v12  ;;  %vm3045_vm0 = vmor %vm3043_vm13, %vm3044_vm12  ;;  %vm3053_vm15 = vweird.f32 %v2857_v43 }
 0x2ae   : > { %v3039_v53 = vmul.f32 %v4683_v14, %v3038_v49  ;;  %2410 = vadd.xlane.f32.xlu1 %v7549_v41  ;;  %v3036_v44 = vsel %vm3035_vm11, %v4681_v38, %v3032_v10 }
 0x2af   : > { %v3559_v37 = vmul.f32 %v3036_v44, %v8487_v34  ;;  %v7564_v42 = vsub.f32 %v7130_v62, %v2488_v63  ;;  %v8488_v62 = vld [vmem:[#allocation9_spill] sm:$0xff] }
 0x2b0   : > { %v3040_v1 = vmul.f32 0.5, %v3039_v53  ;;  %2313 = vmatmul.bf16.gmra.mxu2 %v2085_v9  ;;  %v2682_v39 = vpop.xlane.xlu1 %2681 }
 0x2b1   : > { %v2794_v46 = vmul.f32 %v2682_v39, %v6359_v59  ;;  %v2616_v9 = vmul.f32 %v7564_v42, %v7564_v42  ;;  %v3627_v57 = vmul.f32 %v7273_v19, %v3559_v37 }
 0x2b2   : > { %v3041_v18 = vsub.f32 1.5, %v3040_v1  ;;  %v7585_v1 = vld [vmem:[%s8213_s4] ss:$0 sm:$0xff] }
 0x2b3   : > { %v4685_v45 = vpop.eup %4684  ;;  %v2274_v48 = vpop.f32.mrf.mxu2  ;;  %v2858_v20 = vadd.f32 1e-05, %v2794_v46  ;;  %2709 = vadd.xlane.f32.xlu0 %v2616_v9  ;;  %v8489_v9 = vld [vmem:[#allocation27_spill] sm:$0xff] }
 0x2b4   : > { %v3042_v2 = vmul.f32 %v4683_v14, %v3041_v18  ;;  %v3048_v28 = vmul.f32 %v4685_v45, %v2857_v43  ;;  %v7568_v11 = vadd.f32 %v7049_v4, %v2274_v48  ;;  %v7575_v5 = vpop.xlane.xlu2 %2448  ;;  %vm3054_vm14 = vweird.f32 %v4685_v45 }
 0x2b5   : > { %4686 = vrsqrt.f32 %v2858_v20  ;;  %vm3055_vm3 = vmor %vm3053_vm15, %vm3054_vm14  ;;  %vm3063_vm2 = vweird.f32 %v2858_v20 }
 0x2b6   : > { %v3046_v38 = vsel %vm3045_vm0, %v4683_v14, %v3042_v2  ;;  %v3049_v0 = vmul.f32 %v4685_v45, %v3048_v28  ;;  %2412 = vadd.xlane.f32.xlu2 %v7568_v11  ;;  %v7578_v6 = vpop.xlane.xlu0 %2450  ;;  %v3695_v14 = vadd.f32 %v7318_v33, %v3627_v57 }
 0x2b7   : > { %v3560_v25 = vmul.f32 %v3046_v38, %v8488_v62 }
 0x2b8   : > { %v3050_v24 = vmul.f32 0.5, %v3049_v0 }
 0x2b9   : > { %v3628_v4 = vmul.f32 %v7273_v19, %v3560_v25 }
 0x2ba   : > { %v3051_v49 = vsub.f32 1.5, %v3050_v24 }
 0x2bb   : > { %v4687_v31 = vpop.eup %4686  ;;  %v3696_v58 = vadd.f32 %v7318_v33, %v3628_v4  ;;  %v2276_v23 = vpop.f32.mrf.mxu2 }
 0x2bc   : > { %v3052_v53 = vmul.f32 %v4685_v45, %v3051_v49  ;;  %v3058_v16 = vmul.f32 %v4687_v31, %v2858_v20  ;;  %v7588_v12 = vadd.f32 %v7585_v1, %v2276_v23  ;;  %v2684_v46 = vpop.xlane.xlu2 %2683  ;;  %vm3064_vm1 = vweird.f32 %v4687_v31  ;;  %v8490_v49 = vld [vmem:[#allocation24_spill] sm:$0xff] }
 0x2bd   : > { %v4178_v10 = vpack.c.bf16 %v3696_v58, %v3695_v14  ;;  %v2795_v18 = vmul.f32 %v2684_v46, %v6359_v59  ;;  %vm3065_vm4 = vmor %vm3063_vm2, %vm3064_vm1 }
 0x2be   : > { %v3059_v39 = vmul.f32 %v4687_v31, %v3058_v16  ;;  %2414 = vadd.xlane.f32.xlu0 %v7588_v12  ;;  %v3056_v44 = vsel %vm3055_vm3, %v4685_v45, %v3052_v53  ;;  %v2385_v34 = vpop.xlane.xlu0 %2384 }
 0x2bf   : > { %4310 = vst [vmem:[%s7352_s16 + $0x30] sm:$0xff] %v4178_v10   ;;  %v2489_v2 = vmul.f32 %v6359_v59, %v2385_v34  ;;  %v3561_v43 = vmul.f32 %v3056_v44, %v8489_v9  ;;  %v2859_v38 = vadd.f32 1e-05, %v2795_v18 }
 0x2c0   : > { %v3060_v63 = vmul.f32 0.5, %v3059_v39 }
 0x2c1   : > { %v2387_v37 = vpop.xlane.xlu1 %2386  ;;  %v7597_v45 = vsub.f32 %v7230_v7, %v2489_v2  ;;  %4688 = vrsqrt.f32 %v2859_v38  ;;  %v3629_v4 = vmul.f32 %v7273_v19, %v3561_v43  ;;  %vm3073_vm7 = vweird.f32 %v2859_v38 }
 0x2c2   : > { %v3061_v48 = vsub.f32 1.5, %v3060_v63  ;;  %v2490_v28 = vmul.f32 %v6359_v59, %v2387_v37 }
 0x2c3   : > { %v2279_v0 = vpop.f32.mrf.mxu2  ;;  %v2617_v24 = vmul.f32 %v7597_v45, %v7597_v45  ;;  %v3697_v10 = vadd.f32 %v7318_v33, %v3629_v4 }
 0x2c4   : > { %v3062_v57 = vmul.f32 %v4687_v31, %v3061_v48  ;;  %v7600_v62 = vsub.f32 %v7238_v52, %v2490_v28  ;;  %v7618_v28 = vadd.f32 %v7585_v1, %v2279_v0 }
 0x2c5   : > { %2711 = vadd.xlane.f32.xlu1 %v2617_v24 }
 0x2c6   : > { %v3066_v25 = vsel %vm3065_vm4, %v4687_v31, %v3062_v57  ;;  %v2618_v20 = vmul.f32 %v7600_v62, %v7600_v62  ;;  %v2686_v58 = vpop.xlane.xlu0 %2685 }
 0x2c7   : > { %v3562_v14 = vmul.f32 %v3066_v25, %v8490_v49  ;;  %v2796_v52 = vmul.f32 %v2686_v58, %v6359_v59  ;;  %v4689_v16 = vpop.eup %4688 }
 0x2c8   : > { %2713 = vadd.xlane.f32.xlu2 %v2618_v20  ;;  %v3068_v46 = vmul.f32 %v4689_v16, %v2859_v38  ;;  %vm3074_vm5 = vweird.f32 %v4689_v16 }
 0x2c9   : > { %v3630_v7 = vmul.f32 %v7273_v19, %v3562_v14  ;;  %v2389_v23 = vpop.xlane.xlu2 %2388  ;;  %v2688_v53 = vpop.xlane.xlu1 %2687  ;;  %v2860_v18 = vadd.f32 1e-05, %v2796_v52  ;;  %vm3075_vm8 = vmor %vm3073_vm7, %vm3074_vm5 }
 0x2ca   : > { %v2491_v31 = vmul.f32 %v6359_v59, %v2389_v23  ;;  %v2797_v63 = vmul.f32 %v2688_v53, %v6359_v59  ;;  %v3069_v2 = vmul.f32 %v4689_v16, %v3068_v46 }
 0x2cb   : > { %v3698_v39 = vadd.f32 %v7318_v33, %v3630_v7  ;;  %v2281_v44 = vpop.f32.mrf.mxu2  ;;  %4690 = vrsqrt.f32 %v2860_v18  ;;  %vm3083_vm6 = vweird.f32 %v2860_v18 }
 0x2cc   : > { %v7615_v34 = vsub.f32 %v7305_v51, %v2491_v31  ;;  %v2861_v48 = vadd.f32 1e-05, %v2797_v63  ;;  %v3070_v43 = vmul.f32 0.5, %v3069_v2  ;;  %v7624_v57 = vadd.f32 %v7585_v1, %v2281_v44  ;;  %v8491_v2 = vld [vmem:[#allocation12_spill] sm:$0xff] }
 0x2cd   : > { %v4183_v37 = vpack.c.bf16 %v3698_v39, %v3697_v10  ;;  %2416 = vadd.xlane.f32.xlu1 %v7618_v28 }
 0x2ce   : > { %v2619_v9 = vmul.f32 %v7615_v34, %v7615_v34  ;;  %4692 = vrsqrt.f32 %v2861_v48  ;;  %v3071_v25 = vsub.f32 1.5, %v3070_v43  ;;  %vm3093_vm12 = vweird.f32 %v2861_v48 }
 0x2cf   : > { %4311 = vst [vmem:[%s7352_s16 + $0x38] sm:$0xff] %v4183_v37  }
 0x2d0   : > { %2715 = vadd.xlane.f32.xlu0 %v2619_v9  ;;  %2418 = vadd.xlane.f32.xlu2 %v7624_v57  ;;  %v3072_v20 = vmul.f32 %v4689_v16, %v3071_v25 }
 0x2d1   : > { %v2391_v51 = vpop.xlane.xlu0 %2390  ;;  %v2690_v24 = vpop.xlane.xlu2 %2689 }
 0x2d2   : > { %v2492_v0 = vmul.f32 %v6359_v59, %v2391_v51  ;;  %v2798_v49 = vmul.f32 %v2690_v24, %v6359_v59  ;;  %v4691_v14 = vpop.eup %4690  ;;  %v3076_v44 = vsel %vm3075_vm8, %v4689_v16, %v3072_v20 }
 0x2d3   : > { %v2284_v4 = vpop.f32.mrf.mxu2  ;;  %v3078_v23 = vmul.f32 %v4691_v14, %v2860_v18  ;;  %v3563_v9 = vmul.f32 %v3076_v44, %v8491_v2  ;;  %vm3084_vm9 = vweird.f32 %v4691_v14 }
 0x2d4   : > { %v7631_v7 = vsub.f32 %v7344_v17, %v2492_v0  ;;  %v4693_v58 = vpop.eup %4692  ;;  %v2862_v52 = vadd.f32 1e-05, %v2798_v49  ;;  %v7634_v53 = vadd.f32 %v7585_v1, %v2284_v4  ;;  %vm3085_vm11 = vmor %vm3083_vm6, %vm3084_vm9 }
 0x2d5   : > { %v3088_v31 = vmul.f32 %v4693_v58, %v2861_v48  ;;  %v3079_v39 = vmul.f32 %v4691_v14, %v3078_v23  ;;  %vm3094_vm10 = vweird.f32 %v4693_v58 }
 0x2d6   : > { %v2620_v10 = vmul.f32 %v7631_v7, %v7631_v7  ;;  %4694 = vrsqrt.f32 %v2862_v52  ;;  %vm3095_vm13 = vmor %vm3093_vm12, %vm3094_vm10  ;;  %vm3103_vm14 = vweird.f32 %v2862_v52 }
 0x2d7   : > { %v3089_v63 = vmul.f32 %v4693_v58, %v3088_v31  ;;  %v3080_v17 = vmul.f32 0.5, %v3079_v39  ;;  %v3631_v31 = vmul.f32 %v7273_v19, %v3563_v9 }
 0x2d8   : > { %2420 = vadd.xlane.f32.xlu0 %v7634_v53  ;;  %2717 = vadd.xlane.f32.xlu1 %v2620_v10 }
 0x2d9   : > { %v2393_v46 = vpop.xlane.xlu1 %2392  ;;  %v3090_v37 = vmul.f32 0.5, %v3089_v63  ;;  %v3081_v43 = vsub.f32 1.5, %v3080_v17 }
 0x2da   : > { %v2493_v38 = vmul.f32 %v6359_v59, %v2393_v46 }
 0x2db   : > { %v2286_v51 = vpop.f32.mrf.mxu2  ;;  %v3091_v25 = vsub.f32 1.5, %v3090_v37  ;;  %v3082_v16 = vmul.f32 %v4691_v14, %v3081_v43  ;;  %v3699_v37 = vadd.f32 %v7318_v33, %v3631_v31 }
 0x2dc   : > { %v7642_v0 = vsub.f32 %v7367_v8, %v2493_v38  ;;  %v4695_v24 = vpop.eup %4694  ;;  %v7645_v20 = vadd.f32 %v7585_v1, %v2286_v51  ;;  %v2692_v38 = vpop.xlane.xlu0 %2691 }
 0x2dd   : > { %v3092_v4 = vmul.f32 %v4693_v58, %v3091_v25  ;;  %v3098_v49 = vmul.f32 %v4695_v24, %v2862_v52  ;;  %v3086_v10 = vsel %vm3085_vm11, %v4691_v14, %v3082_v16  ;;  %vm3104_vm0 = vweird.f32 %v4695_v24 }
 0x2de   : > { %v2621_v23 = vmul.f32 %v7642_v0, %v7642_v0  ;;  %v3564_v39 = vmul.f32 %v3086_v10, %v7248_v29  ;;  %v2799_v2 = vmul.f32 %v2692_v38, %v6359_v59  ;;  %vm3105_vm15 = vmor %vm3103_vm14, %vm3104_vm0 }
 0x2df   : > { %v3099_v8 = vmul.f32 %v4695_v24, %v3098_v49  ;;  %v3096_v63 = vsel %vm3095_vm13, %v4693_v58, %v3092_v4 }
 0x2e0   : > { %2719 = vadd.xlane.f32.xlu2 %v2621_v23  ;;  %2422 = vadd.xlane.f32.xlu1 %v7645_v20  ;;  %v3632_v44 = vmul.f32 %v7273_v19, %v3564_v39  ;;  %v3565_v9 = vmul.f32 %v3096_v63, %v7295_v13  ;;  %v2863_v25 = vadd.f32 1e-05, %v2799_v2 }
 0x2e1   : > { %v2395_v18 = vpop.xlane.xlu2 %2394  ;;  %v3100_v17 = vmul.f32 0.5, %v3099_v8 }
 0x2e2   : > { %v2494_v46 = vmul.f32 %v6359_v59, %v2395_v18  ;;  %v3700_v29 = vadd.f32 %v7318_v33, %v3632_v44  ;;  %4696 = vrsqrt.f32 %v2863_v25  ;;  %v3633_v49 = vmul.f32 %v7273_v19, %v3565_v9 }
 0x2e3   : > { %v2289_v14 = vpop.f32.mrf.mxu2  ;;  %v3101_v48 = vsub.f32 1.5, %v3100_v17  ;;  %vm3113_vm1 = vweird.f32 %v2863_v25 }
 0x2e4   : > { %v7659_v43 = vsub.f32 %v7382_v56, %v2494_v46  ;;  %v4188_v58 = vpack.c.bf16 %v3700_v29, %v3699_v37  ;;  %v7662_v16 = vadd.f32 %v7585_v1, %v2289_v14  ;;  %v3701_v8 = vadd.f32 %v7318_v33, %v3633_v49 }
 0x2e5   : > { %v3102_v51 = vmul.f32 %v4695_v24, %v3101_v48 }
 0x2e6   : > { %4312 = vst [vmem:[%s7352_s16 + $0x40] sm:$0xff] %v4188_v58   ;;  %v2622_v56 = vmul.f32 %v7659_v43, %v7659_v43 }
 0x2e7   : > { %v3106_v4 = vsel %vm3105_vm15, %v4695_v24, %v3102_v51 }
 0x2e8   : > { %2424 = vadd.xlane.f32.xlu2 %v7662_v16  ;;  %v3566_v13 = vmul.f32 %v3106_v4, %v7341_v22  ;;  %2721 = vadd.xlane.f32.xlu0 %v2622_v56  ;;  %v4697_v44 = vpop.eup %4696 }
 0x2e9   : > { %v2694_v23 = vpop.xlane.xlu1 %2693  ;;  %v2397_v31 = vpop.xlane.xlu0 %2396  ;;  %vm3114_vm3 = vweird.f32 %v4697_v44 }
 0x2ea   : > { %v3634_v52 = vmul.f32 %v7273_v19, %v3566_v13  ;;  %v2800_v10 = vmul.f32 %v2694_v23, %v6359_v59  ;;  %v2495_v24 = vmul.f32 %v6359_v59, %v2397_v31  ;;  %v3108_v19 = vmul.f32 %v4697_v44, %v2863_v25  ;;  %v2696_v38 = vpop.xlane.xlu2 %2695  ;;  %vm3115_vm2 = vmor %vm3113_vm1, %vm3114_vm3 }
 0x2eb   : > { %v2291_v39 = vpop.f32.mrf.mxu2  ;;  %v2801_v29 = vmul.f32 %v2696_v38, %v6359_v59 }
 0x2ec   : > { %v3702_v18 = vadd.f32 %v7318_v33, %v3634_v52  ;;  %v2864_v22 = vadd.f32 1e-05, %v2800_v10  ;;  %v7676_v63 = vsub.f32 %v7401_v36, %v2495_v24  ;;  %v3109_v37 = vmul.f32 %v4697_v44, %v3108_v19 }
 0x2ed   : > { %v7682_v14 = vadd.f32 %v7585_v1, %v2291_v39  ;;  %v7685_v2 = vadd.f32 1e-05, %v2801_v29 }
 0x2ee   : > { %v4193_v17 = vpack.c.bf16 %v3702_v18, %v3701_v8  ;;  %4698 = vrsqrt.f32 %v2864_v22  ;;  %v2623_v46 = vmul.f32 %v7676_v63, %v7676_v63  ;;  %v3110_v33 = vmul.f32 0.5, %v3109_v37 }
 0x2ef   : > { %4700 = vrsqrt.f32 %v7685_v2  ;;  %vm3123_vm5 = vweird.f32 %v2864_v22  ;;  %vm3133_vm9 = vweird.f32 %v7685_v2 }
 0x2f0   : > { %4313 = vst [vmem:[%s7352_s16 + $0x48] sm:$0xff] %v4193_v17   ;;  %2723 = vadd.xlane.f32.xlu1 %v2623_v46  ;;  %2426 = vadd.xlane.f32.xlu0 %v7682_v14  ;;  %v3111_v58 = vsub.f32 1.5, %v3110_v33 }
 0x2f1   : > { %v2399_v48 = vpop.xlane.xlu1 %2398 }
 0x2f2   : > { %v2496_v36 = vmul.f32 %v6359_v59, %v2399_v48  ;;  %v3112_v49 = vmul.f32 %v4697_v44, %v3111_v58  ;;  %v2698_v10 = vpop.xlane.xlu0 %2697 }
 0x2f3   : > { %v2294_v9 = vpop.f32.mrf.mxu2  ;;  %v2802_v8 = vmul.f32 %v2698_v10, %v6359_v59 }
 0x2f4   : > { %v4699_v51 = vpop.eup %4698  ;;  %v7691_v4 = vsub.f32 %v7415_v26, %v2496_v36  ;;  %v7694_v56 = vadd.f32 %v7585_v1, %v2294_v9  ;;  %v3116_v26 = vsel %vm3115_vm2, %v4697_v44, %v3112_v49  ;;  %v7714_v9 = vld [vmem:[%s8214_s5] ss:$0 sm:$0xff] }
 0x2f5   : > { %v3118_v13 = vmul.f32 %v4699_v51, %v2864_v22  ;;  %v4701_v18 = vpop.eup %4700  ;;  %vm3124_vm4 = vweird.f32 %v4699_v51  ;;  %v2866_v37 = vadd.f32 1e-05, %v2802_v8  ;;  %v3567_v38 = vmul.f32 %v3116_v26, %v7379_v3 }
 0x2f6   : > { %v2624_v23 = vmul.f32 %v7691_v4, %v7691_v4  ;;  %v3128_v46 = vmul.f32 %v4701_v18, %v7685_v2  ;;  %vm3125_vm7 = vmor %vm3123_vm5, %vm3124_vm4  ;;  %vm3134_vm8 = vweird.f32 %v4701_v18 }
 0x2f7   : > { %v3119_v52 = vmul.f32 %v4699_v51, %v3118_v13  ;;  %4702 = vrsqrt.f32 %v2866_v37  ;;  %v3635_v3 = vmul.f32 %v7714_v9, %v3567_v38  ;;  %vm3135_vm6 = vmor %vm3133_vm9, %vm3134_vm8  ;;  %vm3143_vm11 = vweird.f32 %v2866_v37 }
 0x2f8   : > { %2428 = vadd.xlane.f32.xlu1 %v7694_v56  ;;  %2725 = vadd.xlane.f32.xlu2 %v2624_v23  ;;  %v3129_v33 = vmul.f32 %v4701_v18, %v3128_v46 }
 0x2f9   : > { %v2401_v31 = vpop.xlane.xlu2 %2400  ;;  %v3120_v39 = vmul.f32 0.5, %v3119_v52 }
 0x2fa   : > { %v2497_v24 = vmul.f32 %v6359_v59, %v2401_v31  ;;  %v3130_v36 = vmul.f32 0.5, %v3129_v33 }
 0x2fb   : > { %v2296_v25 = vpop.f32.mrf.mxu2  ;;  %v3121_v19 = vsub.f32 1.5, %v3120_v39 }
 0x2fc   : > { %v7702_v17 = vsub.f32 %v7444_v47, %v2497_v24  ;;  %v7709_v47 = vadd.f32 %v7585_v1, %v2296_v25  ;;  %v3131_v49 = vsub.f32 1.5, %v3130_v36 }
 0x2fd   : > { %v3122_v29 = vmul.f32 %v4699_v51, %v3121_v19  ;;  %v4703_v31 = vpop.eup %4702 }
 0x2fe   : > { %v2625_v44 = vmul.f32 %v7702_v17, %v7702_v17  ;;  %v3132_v39 = vmul.f32 %v4701_v18, %v3131_v49  ;;  %v3138_v8 = vmul.f32 %v4703_v31, %v2866_v37  ;;  %vm3144_vm10 = vweird.f32 %v4703_v31 }
 0x2ff   : > { %v3126_v48 = vsel %vm3125_vm7, %v4699_v51, %v3122_v29  ;;  %v2700_v13 = vpop.xlane.xlu1 %2699  ;;  %vm3145_vm12 = vmor %vm3143_vm11, %vm3144_vm10 }
 0x300   : > { %v3568_v22 = vmul.f32 %v3126_v48, %v7398_v55  ;;  %2727 = vadd.xlane.f32.xlu0 %v2625_v44  ;;  %2430 = vadd.xlane.f32.xlu2 %v7709_v47  ;;  %v2803_v10 = vmul.f32 %v2700_v13, %v6359_v59  ;;  %v7725_v55 = vld [vmem:[%s8215_s6] ss:$0 sm:$0xff]  ;;  %v3139_v46 = vmul.f32 %v4703_v31, %v3138_v8 }
 0x301   : > { %v2403_v58 = vpop.xlane.xlu0 %2402  ;;  %v3703_v24 = vadd.f32 %v7725_v55, %v3635_v3  ;;  %v3136_v33 = vsel %vm3135_vm6, %v4701_v18, %v3132_v39 }
 0x302   : > { %v3636_v51 = vmul.f32 %v7714_v9, %v3568_v22  ;;  %v2498_v52 = vmul.f32 %v6359_v59, %v2403_v58  ;;  %v7730_v25 = vadd.f32 1e-05, %v2803_v10  ;;  %v3140_v44 = vmul.f32 0.5, %v3139_v46 }
 0x303   : > { %v2299_v23 = vpop.f32.mrf.mxu2 }
 0x304   : > { %v3704_v26 = vadd.f32 %v7725_v55, %v3636_v51  ;;  %v7733_v38 = vsub.f32 %v7458_v27, %v2498_v52  ;;  %v7736_v29 = vadd.f32 %v7585_v1, %v2299_v23  ;;  %4704 = vrsqrt.f32 %v7730_v25 }
 0x305   : > { %v3141_v48 = vsub.f32 1.5, %v3140_v44  ;;  %v3569_v27 = vmul.f32 %v3136_v33, %v7409_v54  ;;  %v2702_v22 = vpop.xlane.xlu2 %2701  ;;  %vm3153_vm0 = vweird.f32 %v7730_v25 }
 0x306   : > { %v4198_v19 = vpack.c.bf16 %v3704_v26, %v3703_v24  ;;  %v2626_v2 = vmul.f32 %v7733_v38, %v7733_v38  ;;  %v2804_v51 = vmul.f32 %v2702_v22, %v6359_v59 }
 0x307   : > { %v3142_v49 = vmul.f32 %v4703_v31, %v3141_v48  ;;  %v3637_v24 = vmul.f32 %v7714_v9, %v3569_v27 }
 0x308   : > { %4314 = vst [vmem:[%s7352_s16 + $0x50] sm:$0xff] %v4198_v19   ;;  %2432 = vadd.xlane.f32.xlu0 %v7736_v29  ;;  %2729 = vadd.xlane.f32.xlu1 %v2626_v2  ;;  %v2868_v10 = vadd.f32 1e-05, %v2804_v51 }
 0x309   : > { %v2405_v36 = vpop.xlane.xlu1 %2404  ;;  %v3146_v52 = vsel %vm3145_vm12, %v4703_v31, %v3142_v49  ;;  %v3705_v33 = vadd.f32 %v7725_v55, %v3637_v24 }
 0x30a   : > { %v2499_v58 = vmul.f32 %v6359_v59, %v2405_v36  ;;  %v4705_v18 = vpop.eup %4704  ;;  %v3570_v54 = vmul.f32 %v3146_v52, %v7436_v50  ;;  %4706 = vrsqrt.f32 %v2868_v10  ;;  %v2704_v39 = vpop.xlane.xlu0 %2703  ;;  %vm3163_vm3 = vweird.f32 %v2868_v10 }
 0x30b   : > { %v2301_v3 = vpop.f32.mrf.mxu2  ;;  %v3148_v23 = vmul.f32 %v4705_v18, %v7730_v25  ;;  %v2805_v19 = vmul.f32 %v2704_v39, %v6359_v59  ;;  %vm3154_vm13 = vweird.f32 %v4705_v18 }
 0x30c   : > { %v7747_v13 = vsub.f32 %v7480_v21, %v2499_v58  ;;  %v3638_v8 = vmul.f32 %v7714_v9, %v3570_v54  ;;  %v7757_v31 = vadd.f32 %v7585_v1, %v2301_v3  ;;  %vm3155_vm14 = vmor %vm3153_vm0, %vm3154_vm13 }
 0x30d   : > { %v3149_v37 = vmul.f32 %v4705_v18, %v3148_v23  ;;  %v7761_v44 = vadd.f32 1e-05, %v2805_v19 }
 0x30e   : > { %v2627_v26 = vmul.f32 %v7747_v13, %v7747_v13  ;;  %v3706_v50 = vadd.f32 %v7725_v55, %v3638_v8 }
 0x30f   : > { %v3150_v21 = vmul.f32 0.5, %v3149_v37  ;;  %4708 = vrsqrt.f32 %v7761_v44  ;;  %vm3173_vm4 = vweird.f32 %v7761_v44 }
 0x310   : > { %2731 = vadd.xlane.f32.xlu2 %v2627_v26  ;;  %2434 = vadd.xlane.f32.xlu1 %v7757_v31  ;;  %v4203_v27 = vpack.c.bf16 %v3706_v50, %v3705_v33  ;;  %v4707_v22 = vpop.eup %4706 }
 0x311   : > { %v2407_v48 = vpop.xlane.xlu2 %2406  ;;  %v3151_v2 = vsub.f32 1.5, %v3150_v21  ;;  %v3158_v49 = vmul.f32 %v4707_v22, %v2868_v10  ;;  %vm3164_vm15 = vweird.f32 %v4707_v22 }
 0x312   : > { %v2500_v36 = vmul.f32 %v6359_v59, %v2407_v48  ;;  %4315 = vst [vmem:[%s7352_s16 + $0x58] sm:$0xff] %v4203_v27   ;;  %vm3165_vm1 = vmor %vm3163_vm3, %vm3164_vm15 }
 0x313   : > { %v2304_v46 = vpop.f32.mrf.mxu2  ;;  %v3152_v58 = vmul.f32 %v4705_v18, %v3151_v2  ;;  %v3159_v54 = vmul.f32 %v4707_v22, %v3158_v49 }
 0x314   : > { %v7767_v3 = vsub.f32 %v7503_v40, %v2500_v36  ;;  %v7771_v51 = vadd.f32 %v7585_v1, %v2304_v46 }
 0x315   : > { %v4709_v39 = vpop.eup %4708  ;;  %v3156_v8 = vsel %vm3155_vm14, %v4705_v18, %v3152_v58  ;;  %v3160_v19 = vmul.f32 0.5, %v3159_v54 }
 0x316   : > { %v2628_v23 = vmul.f32 %v7767_v3, %v7767_v3  ;;  %v3168_v33 = vmul.f32 %v4709_v39, %v7761_v44  ;;  %v3571_v50 = vmul.f32 %v3156_v8, %v7464_v32  ;;  %vm3174_vm2 = vweird.f32 %v4709_v39 }
 0x317   : > { %v2706_v52 = vpop.xlane.xlu1 %2705  ;;  %v3161_v25 = vsub.f32 1.5, %v3160_v19  ;;  %vm7807_vm5 = vmor %vm3173_vm4, %vm3174_vm2 }
 0x318   : > { %v2806_v26 = vmul.f32 %v2706_v52, %v6359_v59  ;;  %2436 = vadd.xlane.f32.xlu2 %v7771_v51  ;;  %2733 = vadd.xlane.f32.xlu0 %v2628_v23  ;;  %v3169_v48 = vmul.f32 %v4709_v39, %v3168_v33  ;;  %v3639_v32 = vmul.f32 %v7714_v9, %v3571_v50 }
 0x319   : > { %v2409_v24 = vpop.xlane.xlu0 %2408  ;;  %v3162_v36 = vmul.f32 %v4707_v22, %v3161_v25 }
 0x31a   : > { %v2501_v40 = vmul.f32 %v6359_v59, %v2409_v24  ;;  %v2870_v21 = vadd.f32 1e-05, %v2806_v26  ;;  %v3170_v18 = vmul.f32 0.5, %v3169_v48 }
 0x31b   : > { %v2306_v37 = vpop.f32.mrf.mxu2  ;;  %v3166_v49 = vsel %vm3165_vm1, %v4707_v22, %v3162_v36 }
 0x31c   : > { %v7780_v46 = vsub.f32 %v7526_v35, %v2501_v40  ;;  %4710 = vrsqrt.f32 %v2870_v21  ;;  %v7787_v27 = vadd.f32 %v7585_v1, %v2306_v37  ;;  %v3572_v24 = vmul.f32 %v3166_v49, %v7485_v61 }
 0x31d   : > { %v3171_v54 = vsub.f32 1.5, %v3170_v18  ;;  %v3707_v61 = vadd.f32 %v7725_v55, %v3639_v32  ;;  %vm3183_vm8 = vweird.f32 %v2870_v21 }
 0x31e   : > { %v2629_v2 = vmul.f32 %v7780_v46, %v7780_v46  ;;  %v2708_v35 = vpop.xlane.xlu2 %2707  ;;  %v3640_v22 = vmul.f32 %v7714_v9, %v3572_v24 }
 0x31f   : > { %v2807_v52 = vmul.f32 %v2708_v35, %v6359_v59  ;;  %v3172_v8 = vmul.f32 %v4709_v39, %v3171_v54 }
 0x320   : > { %2735 = vadd.xlane.f32.xlu1 %v2629_v2  ;;  %2438 = vadd.xlane.f32.xlu0 %v7787_v27  ;;  %v3708_v33 = vadd.f32 %v7725_v55, %v3640_v22 }
 0x321   : > { %v2411_v58 = vpop.xlane.xlu1 %2410  ;;  %v7794_v40 = vadd.f32 1e-05, %v2807_v52  ;;  %v3176_v44 = vsel %vm7807_vm5, %v4709_v39, %v3172_v8 }
 0x322   : > { %v2502_v23 = vmul.f32 %v6359_v59, %v2411_v58  ;;  %v4711_v26 = vpop.eup %4710  ;;  %v4208_v2 = vpack.c.bf16 %v3708_v33, %v3707_v61  ;;  %v3573_v24 = vmul.f32 %v3176_v44, %v7495_v30 }
 0x323   : > { %v2309_v10 = vpop.f32.mrf.mxu2  ;;  %v3178_v19 = vmul.f32 %v4711_v26, %v2870_v21  ;;  %4712 = vrsqrt.f32 %v7794_v40  ;;  %vm3184_vm7 = vweird.f32 %v4711_v26  ;;  %vm3193_vm10 = vweird.f32 %v7794_v40 }
 0x324   : > { %v7797_v37 = vsub.f32 %v7549_v41, %v2502_v23  ;;  %v7805_v50 = vadd.f32 %v7585_v1, %v2309_v10  ;;  %4316 = vst [vmem:[%s7352_s16 + $0x60] sm:$0xff] %v4208_v2   ;;  %vm3185_vm9 = vmor %vm3183_vm8, %vm3184_vm7  ;;  %v3641_v33 = vmul.f32 %v7714_v9, %v3573_v24 }
 0x325   : > { %v3179_v25 = vmul.f32 %v4711_v26, %v3178_v19 }
 0x326   : > { %v2630_v48 = vmul.f32 %v7797_v37, %v7797_v37  ;;  %v2710_v18 = vpop.xlane.xlu0 %2709 }
 0x327   : > { %v3180_v36 = vmul.f32 0.5, %v3179_v25  ;;  %v2808_v58 = vmul.f32 %v2710_v18, %v6359_v59 }
 0x328   : > { %2440 = vadd.xlane.f32.xlu1 %v7805_v50  ;;  %2737 = vadd.xlane.f32.xlu2 %v2630_v48 }
 0x329   : > { %v2413_v35 = vpop.xlane.xlu2 %2412  ;;  %v3181_v52 = vsub.f32 1.5, %v3180_v36  ;;  %v4713_v32 = vpop.eup %4712  ;;  %v2872_v54 = vadd.f32 1e-05, %v2808_v58  ;;  %v3709_v36 = vadd.f32 %v7725_v55, %v3641_v33 }
 0x32a   : > { %v2503_v49 = vmul.f32 %v6359_v59, %v2413_v35  ;;  %v3188_v22 = vmul.f32 %v4713_v32, %v7794_v40  ;;  %vm3194_vm6 = vweird.f32 %v4713_v32 }
 0x32b   : > { %v2311_v23 = vpop.f32.mrf.mxu2  ;;  %v3182_v10 = vmul.f32 %v4711_v26, %v3181_v52  ;;  %4714 = vrsqrt.f32 %v2872_v54  ;;  %vm3195_vm11 = vmor %vm3193_vm10, %vm3194_vm6  ;;  %vm3203_vm13 = vweird.f32 %v2872_v54 }
 0x32c   : > { %v7821_v39 = vsub.f32 %v7568_v11, %v2503_v49  ;;  %v3189_v61 = vmul.f32 %v4713_v32, %v3188_v22  ;;  %v7829_v30 = vadd.f32 %v7585_v1, %v2311_v23 }
 0x32d   : > { %v3186_v19 = vsel %vm3185_vm9, %v4711_v26, %v3182_v10 }
 0x32e   : > { %v2631_v8 = vmul.f32 %v7821_v39, %v7821_v39  ;;  %v3574_v25 = vmul.f32 %v3186_v19, %v7519_v60  ;;  %v3190_v11 = vmul.f32 0.5, %v3189_v61 }
 0x330   : > { %2739 = vadd.xlane.f32.xlu0 %v2631_v8  ;;  %v3642_v21 = vmul.f32 %v7714_v9, %v3574_v25  ;;  %2442 = vadd.xlane.f32.xlu2 %v7829_v30  ;;  %v3191_v2 = vsub.f32 1.5, %v3190_v11 }
 0x331   : > { %v2415_v41 = vpop.xlane.xlu0 %2414  ;;  %v4715_v44 = vpop.eup %4714 }
 0x332   : > { %v2504_v48 = vmul.f32 %v6359_v59, %v2415_v41  ;;  %v3710_v60 = vadd.f32 %v7725_v55, %v3642_v21  ;;  %v3192_v35 = vmul.f32 %v4713_v32, %v3191_v2  ;;  %v3198_v58 = vmul.f32 %v4715_v44, %v2872_v54 }
 0x333   : > { %v2314_v26 = vpop.f32.mrf.mxu2  ;;  %vm3204_vm12 = vweird.f32 %v4715_v44 }
 0x334   : > { %v7837_v18 = vsub.f32 %v7588_v12, %v2504_v48  ;;  %v4213_v49 = vpack.c.bf16 %v3710_v60, %v3709_v36  ;;  %v7840_v52 = vadd.f32 %v7585_v1, %v2314_v26  ;;  %v3199_v24 = vmul.f32 %v4715_v44, %v3198_v58  ;;  %vm3205_vm0 = vmor %vm3203_vm13, %vm3204_vm12 }
 0x335   : > { %v3196_v12 = vsel %vm3195_vm11, %v4713_v32, %v3192_v35 }
 0x336   : > { %v2632_v23 = vmul.f32 %v7837_v18, %v7837_v18  ;;  %4317 = vst [vmem:[%s7352_s16 + $0x68] sm:$0xff] %v4213_v49   ;;  %v3200_v10 = vmul.f32 0.5, %v3199_v24  ;;  %v3575_v33 = vmul.f32 %v3196_v12, %v7544_v15 }
 0x338   : > { %2444 = vadd.xlane.f32.xlu0 %v7840_v52  ;;  %2741 = vadd.xlane.f32.xlu1 %v2632_v23  ;;  %v2712_v22 = vpop.xlane.xlu1 %2711  ;;  %v3201_v8 = vsub.f32 1.5, %v3200_v10  ;;  %v3643_v2 = vmul.f32 %v7714_v9, %v3575_v33 }
 0x339   : > { %v2809_v19 = vmul.f32 %v2712_v22, %v6359_v59 }
 0x33a   : > { %v3202_v11 = vmul.f32 %v4715_v44, %v3201_v8 }
 0x33b   : > { %v2316_v61 = vpop.f32.mrf.mxu2  ;;  %v2714_v25 = vpop.xlane.xlu2 %2713  ;;  %v2873_v40 = vadd.f32 1e-05, %v2809_v19 }
 0x33c   : > { %v2810_v41 = vmul.f32 %v2714_v25, %v6359_v59  ;;  %v7851_v21 = vadd.f32 %v7585_v1, %v2316_v61  ;;  %v3206_v32 = vsel %vm3205_vm0, %v4715_v44, %v3202_v11  ;;  %v3711_v44 = vadd.f32 %v7725_v55, %v3643_v2 }
 0x33d   : > { %4716 = vrsqrt.f32 %v2873_v40  ;;  %v3576_v26 = vmul.f32 %v3206_v32, %v7564_v42  ;;  %vm3213_vm15 = vweird.f32 %v2873_v40 }
 0x33e   : > { %v2874_v48 = vadd.f32 1e-05, %v2810_v41 }
 0x33f   : > { %v3644_v15 = vmul.f32 %v7714_v9, %v3576_v26 }
 0x340   : > { %2446 = vadd.xlane.f32.xlu1 %v7851_v21  ;;  %4718 = vrsqrt.f32 %v2874_v48  ;;  %v2417_v54 = vpop.xlane.xlu1 %2416  ;;  %vm3223_vm2 = vweird.f32 %v2874_v48 }
 0x341   : > { %v2505_v60 = vmul.f32 %v6359_v59, %v2417_v54  ;;  %v3712_v35 = vadd.f32 %v7725_v55, %v3644_v15 }
 0x343   : > { %v2716_v36 = vpop.xlane.xlu0 %2715  ;;  %v2419_v58 = vpop.xlane.xlu2 %2418  ;;  %v7862_v42 = vsub.f32 %v7618_v28, %v2505_v60  ;;  %v4218_v12 = vpack.c.bf16 %v3712_v35, %v3711_v44 }
 0x344   : > { %v2811_v1 = vmul.f32 %v2716_v36, %v6359_v59  ;;  %v4717_v49 = vpop.eup %4716  ;;  %v2506_v23 = vmul.f32 %v6359_v59, %v2419_v58 }
 0x345   : > { %v3208_v10 = vmul.f32 %v4717_v49, %v2873_v40  ;;  %v2633_v19 = vmul.f32 %v7862_v42, %v7862_v42  ;;  %4318 = vst [vmem:[%s7352_s16 + $0x70] sm:$0xff] %v4218_v12   ;;  %vm3214_vm14 = vweird.f32 %v4717_v49 }
 0x346   : > { %v7865_v24 = vadd.f32 1e-05, %v2811_v1  ;;  %v4719_v22 = vpop.eup %4718  ;;  %v7868_v8 = vsub.f32 %v7624_v57, %v2506_v23  ;;  %vm3215_vm1 = vmor %vm3213_vm15, %vm3214_vm14 }
 0x347   : > { %v3209_v61 = vmul.f32 %v4717_v49, %v3208_v10  ;;  %v3218_v33 = vmul.f32 %v4719_v22, %v2874_v48  ;;  %2743 = vadd.xlane.f32.xlu2 %v2633_v19  ;;  %vm3224_vm3 = vweird.f32 %v4719_v22 }
 0x348   : > { %4720 = vrsqrt.f32 %v7865_v24  ;;  %v2634_v28 = vmul.f32 %v7868_v8, %v7868_v8  ;;  %vm3225_vm4 = vmor %vm3223_vm2, %vm3224_vm3  ;;  %vm3233_vm7 = vweird.f32 %v7865_v24 }
 0x349   : > { %v3210_v25 = vmul.f32 0.5, %v3209_v61  ;;  %v3219_v11 = vmul.f32 %v4719_v22, %v3218_v33 }
 0x34a   : > { %2745 = vadd.xlane.f32.xlu0 %v2634_v28 }
 0x34b   : > { %v2718_v41 = vpop.xlane.xlu1 %2717  ;;  %v2421_v32 = vpop.xlane.xlu0 %2420  ;;  %v3211_v26 = vsub.f32 1.5, %v3210_v25  ;;  %v3220_v15 = vmul.f32 0.5, %v3219_v11 }
 0x34c   : > { %v2812_v57 = vmul.f32 %v2718_v41, %v6359_v59  ;;  %v2507_v2 = vmul.f32 %v6359_v59, %v2421_v32 }
 0x34d   : > { %v3212_v1 = vmul.f32 %v4717_v49, %v3211_v26  ;;  %v3221_v44 = vsub.f32 1.5, %v3220_v15 }
 0x34e   : > { %v4721_v54 = vpop.eup %4720  ;;  %v2876_v36 = vadd.f32 1e-05, %v2812_v57  ;;  %v7879_v60 = vsub.f32 %v7634_v53, %v2507_v2 }
 0x34f   : > { %v3228_v35 = vmul.f32 %v4721_v54, %v7865_v24  ;;  %v3216_v23 = vsel %vm3215_vm1, %v4717_v49, %v3212_v1  ;;  %v3222_v12 = vmul.f32 %v4719_v22, %v3221_v44  ;;  %vm3234_vm5 = vweird.f32 %v4721_v54 }
 0x350   : > { %4722 = vrsqrt.f32 %v2876_v36  ;;  %v2635_v58 = vmul.f32 %v7879_v60, %v7879_v60  ;;  %v3577_v40 = vmul.f32 %v3216_v23, %v7597_v45  ;;  %vm3235_vm8 = vmor %vm3233_vm7, %vm3234_vm5  ;;  %vm3243_vm6 = vweird.f32 %v2876_v36 }
 0x351   : > { %v3229_v10 = vmul.f32 %v4721_v54, %v3228_v35  ;;  %v3226_v53 = vsel %vm3225_vm4, %v4719_v22, %v3222_v12 }
 0x352   : > { %2747 = vadd.xlane.f32.xlu1 %v2635_v58  ;;  %v3645_v28 = vmul.f32 %v7714_v9, %v3577_v40  ;;  %v3578_v25 = vmul.f32 %v3226_v53, %v7600_v62 }
 0x353   : > { %v3230_v19 = vmul.f32 0.5, %v3229_v10  ;;  %v2720_v61 = vpop.xlane.xlu2 %2719  ;;  %v2423_v33 = vpop.xlane.xlu1 %2422 }
 0x354   : > { %v2813_v11 = vmul.f32 %v2720_v61, %v6359_v59  ;;  %v2508_v41 = vmul.f32 %v6359_v59, %v2423_v33  ;;  %v3646_v48 = vmul.f32 %v7714_v9, %v3578_v25  ;;  %v3713_v26 = vadd.f32 %v7725_v55, %v3645_v28 }
 0x355   : > { %v3231_v49 = vsub.f32 1.5, %v3230_v19 }
 0x356   : > { %v4723_v32 = vpop.eup %4722  ;;  %v2877_v57 = vadd.f32 1e-05, %v2813_v11  ;;  %v7891_v45 = vsub.f32 %v7645_v20, %v2508_v41  ;;  %v3714_v62 = vadd.f32 %v7725_v55, %v3646_v48 }
 0x357   : > { %v3232_v22 = vmul.f32 %v4721_v54, %v3231_v49  ;;  %v3238_v2 = vmul.f32 %v4723_v32, %v2876_v36  ;;  %vm3244_vm9 = vweird.f32 %v4723_v32 }
 0x358   : > { %4724 = vrsqrt.f32 %v2877_v57  ;;  %v2636_v15 = vmul.f32 %v7891_v45, %v7891_v45  ;;  %v4223_v44 = vpack.c.bf16 %v3714_v62, %v3713_v26  ;;  %vm3245_vm10 = vmor %vm3243_vm6, %vm3244_vm9  ;;  %vm3253_vm12 = vweird.f32 %v2877_v57 }
 0x359   : > { %v3239_v1 = vmul.f32 %v4723_v32, %v3238_v2  ;;  %v3236_v20 = vsel %vm3235_vm8, %v4721_v54, %v3232_v22 }
 0x35a   : > { %2749 = vadd.xlane.f32.xlu2 %v2636_v15  ;;  %4319 = vst [vmem:[%s7352_s16 + $0x78] sm:$0xff] %v4223_v44   ;;  %v3579_v40 = vmul.f32 %v3236_v20, %v7615_v34 }
 0x35b   : > { %v3240_v35 = vmul.f32 0.5, %v3239_v1  ;;  %v2425_v58 = vpop.xlane.xlu2 %2424  ;;  %v2722_v61 = vpop.xlane.xlu0 %2721 }
 0x35c   : > { %v2509_v23 = vmul.f32 %v6359_v59, %v2425_v58  ;;  %v2814_v54 = vmul.f32 %v2722_v61, %v6359_v59  ;;  %v3647_v11 = vmul.f32 %v7714_v9, %v3579_v40 }
 0x35d   : > { %v3241_v12 = vsub.f32 1.5, %v3240_v35 }
 0x35e   : > { %v4725_v10 = vpop.eup %4724  ;;  %v7902_v53 = vsub.f32 %v7662_v16, %v2509_v23  ;;  %v2878_v34 = vadd.f32 1e-05, %v2814_v54  ;;  %v3715_v22 = vadd.f32 %v7725_v55, %v3647_v11 }
 0x35f   : > { %v3242_v19 = vmul.f32 %v4723_v32, %v3241_v12  ;;  %v3248_v24 = vmul.f32 %v4725_v10, %v2877_v57  ;;  %vm3254_vm11 = vweird.f32 %v4725_v10 }
 0x360   : > { %v2637_v33 = vmul.f32 %v7902_v53, %v7902_v53  ;;  %4726 = vrsqrt.f32 %v2878_v34  ;;  %vm3255_vm13 = vmor %vm3253_vm12, %vm3254_vm11  ;;  %vm3263_vm14 = vweird.f32 %v2878_v34 }
 0x361   : > { %v3246_v28 = vsel %vm3245_vm10, %v4723_v32, %v3242_v19  ;;  %v3249_v25 = vmul.f32 %v4725_v10, %v3248_v24 }
 0x362   : > { %v3580_v41 = vmul.f32 %v3246_v28, %v7631_v7  ;;  %2751 = vadd.xlane.f32.xlu0 %v2637_v33 }
 0x363   : > { %v3250_v16 = vmul.f32 0.5, %v3249_v25  ;;  %v2724_v48 = vpop.xlane.xlu1 %2723  ;;  %v2427_v26 = vpop.xlane.xlu0 %2426 }
 0x364   : > { %v3648_v36 = vmul.f32 %v7714_v9, %v3580_v41  ;;  %v2815_v32 = vmul.f32 %v2724_v48, %v6359_v59  ;;  %v2510_v7 = vmul.f32 %v6359_v59, %v2427_v26 }
 0x365   : > { %v3251_v49 = vsub.f32 1.5, %v3250_v16 }
 0x366   : > { %v3716_v2 = vadd.f32 %v7725_v55, %v3648_v36  ;;  %v2879_v15 = vadd.f32 1e-05, %v2815_v32  ;;  %v4727_v44 = vpop.eup %4726  ;;  %v7916_v20 = vsub.f32 %v7682_v14, %v2510_v7 }
 0x367   : > { %v3252_v1 = vmul.f32 %v4725_v10, %v3251_v49  ;;  %v3258_v35 = vmul.f32 %v4727_v44, %v2878_v34  ;;  %vm3264_vm0 = vweird.f32 %v4727_v44 }
 0x368   : > { %v4228_v62 = vpack.c.bf16 %v3716_v2, %v3715_v22  ;;  %4728 = vrsqrt.f32 %v2879_v15  ;;  %v2638_v58 = vmul.f32 %v7916_v20, %v7916_v20  ;;  %vm3265_vm15 = vmor %vm3263_vm14, %vm3264_vm0  ;;  %vm3273_vm1 = vweird.f32 %v2879_v15 }
 0x369   : > { %v3256_v23 = vsel %vm3255_vm13, %v4725_v10, %v3252_v1  ;;  %v3259_v12 = vmul.f32 %v4727_v44, %v3258_v35 }
 0x36a   : > { %4320 = vst [vmem:[%s7352_s16 + $0x80] sm:$0xff] %v4228_v62   ;;  %2753 = vadd.xlane.f32.xlu1 %v2638_v58  ;;  %v3581_v14 = vmul.f32 %v3256_v23, %v7642_v0 }
 0x36b   : > { %v2429_v40 = vpop.xlane.xlu1 %2428  ;;  %v2726_v19 = vpop.xlane.xlu2 %2725  ;;  %v3260_v61 = vmul.f32 0.5, %v3259_v12 }
 0x36c   : > { %v2511_v24 = vmul.f32 %v6359_v59, %v2429_v40  ;;  %v2816_v54 = vmul.f32 %v2726_v19, %v6359_v59  ;;  %v3649_v36 = vmul.f32 %v7714_v9, %v3581_v14 }
 0x36d   : > { %v3261_v28 = vsub.f32 1.5, %v3260_v61 }
 0x36e   : > { %v4729_v33 = vpop.eup %4728  ;;  %v7924_v57 = vsub.f32 %v7694_v56, %v2511_v24  ;;  %v2880_v11 = vadd.f32 1e-05, %v2816_v54  ;;  %v3717_v1 = vadd.f32 %v7725_v55, %v3649_v36 }
 0x36f   : > { %v3268_v25 = vmul.f32 %v4729_v33, %v2879_v15  ;;  %v3262_v41 = vmul.f32 %v4727_v44, %v3261_v28  ;;  %vm3274_vm3 = vweird.f32 %v4729_v33 }
 0x370   : > { %v2639_v10 = vmul.f32 %v7924_v57, %v7924_v57  ;;  %4730 = vrsqrt.f32 %v2880_v11  ;;  %vm3275_vm2 = vmor %vm3273_vm1, %vm3274_vm3  ;;  %vm3283_vm5 = vweird.f32 %v2880_v11 }
 0x371   : > { %v3269_v16 = vmul.f32 %v4729_v33, %v3268_v25  ;;  %v3266_v49 = vsel %vm3265_vm15, %v4727_v44, %v3262_v41 }
 0x372   : > { %2755 = vadd.xlane.f32.xlu2 %v2639_v10  ;;  %v3582_v56 = vmul.f32 %v3266_v49, %v7659_v43 }
 0x373   : > { %v3270_v0 = vmul.f32 0.5, %v3269_v16  ;;  %v2728_v48 = vpop.xlane.xlu0 %2727  ;;  %v2431_v22 = vpop.xlane.xlu2 %2430 }
 0x374   : > { %v2817_v2 = vmul.f32 %v2728_v48, %v6359_v59  ;;  %v2512_v26 = vmul.f32 %v6359_v59, %v2431_v22  ;;  %v3650_v62 = vmul.f32 %v7714_v9, %v3582_v56 }
 0x375   : > { %v3271_v32 = vsub.f32 1.5, %v3270_v0 }
 0x376   : > { %v2881_v34 = vadd.f32 1e-05, %v2817_v2  ;;  %v4731_v7 = vpop.eup %4730  ;;  %v7935_v44 = vsub.f32 %v7709_v47, %v2512_v26  ;;  %v3718_v35 = vadd.f32 %v7725_v55, %v3650_v62 }
 0x377   : > { %v3272_v43 = vmul.f32 %v4729_v33, %v3271_v32  ;;  %v3278_v58 = vmul.f32 %v4731_v7, %v2880_v11  ;;  %vm3284_vm4 = vweird.f32 %v4731_v7 }
 0x378   : > { %4732 = vrsqrt.f32 %v2881_v34  ;;  %v2640_v23 = vmul.f32 %v7935_v44, %v7935_v44  ;;  %v4233_v12 = vpack.c.bf16 %v3718_v35, %v3717_v1  ;;  %vm3285_vm7 = vmor %vm3283_vm5, %vm3284_vm4  ;;  %vm3293_vm9 = vweird.f32 %v2881_v34 }
 0x379   : > { %v3279_v40 = vmul.f32 %v4731_v7, %v3278_v58  ;;  %v3276_v19 = vsel %vm3275_vm2, %v4729_v33, %v3272_v43 }
 0x37a   : > { %2757 = vadd.xlane.f32.xlu0 %v2640_v23  ;;  %4321 = vst [vmem:[%s7352_s16 + $0x88] sm:$0xff] %v4233_v12   ;;  %v3583_v14 = vmul.f32 %v3276_v19, %v7676_v63 }
 0x37b   : > { %v3280_v24 = vmul.f32 0.5, %v3279_v40  ;;  %v2433_v47 = vpop.xlane.xlu0 %2432  ;;  %v2730_v25 = vpop.xlane.xlu1 %2729 }
 0x37c   : > { %v2513_v10 = vmul.f32 %v6359_v59, %v2433_v47  ;;  %v2818_v15 = vmul.f32 %v2730_v25, %v6359_v59  ;;  %v3651_v0 = vmul.f32 %v7714_v9, %v3583_v14 }
 0x37d   : > { %v3281_v54 = vsub.f32 1.5, %v3280_v24 }
 0x37e   : > { %v4733_v61 = vpop.eup %4732  ;;  %v7945_v36 = vsub.f32 %v7736_v29, %v2513_v10  ;;  %v2882_v49 = vadd.f32 1e-05, %v2818_v15  ;;  %v3719_v32 = vadd.f32 %v7725_v55, %v3651_v0 }
 0x37f   : > { %v3288_v28 = vmul.f32 %v4733_v61, %v2881_v34  ;;  %v3282_v41 = vmul.f32 %v4731_v7, %v3281_v54  ;;  %vm3294_vm8 = vweird.f32 %v4733_v61 }
 0x380   : > { %v2641_v56 = vmul.f32 %v7945_v36, %v7945_v36  ;;  %4734 = vrsqrt.f32 %v2882_v49  ;;  %vm3295_vm6 = vmor %vm3293_vm9, %vm3294_vm8  ;;  %vm3303_vm11 = vweird.f32 %v2882_v49 }
 0x381   : > { %v3289_v16 = vmul.f32 %v4733_v61, %v3288_v28  ;;  %v3286_v33 = vsel %vm3285_vm7, %v4731_v7, %v3282_v41 }
 0x382   : > { %v3584_v48 = vmul.f32 %v3286_v33, %v7691_v4  ;;  %2759 = vadd.xlane.f32.xlu1 %v2641_v56 }
 0x383   : > { %v3290_v63 = vmul.f32 0.5, %v3289_v16  ;;  %v2732_v22 = vpop.xlane.xlu2 %2731  ;;  %v2435_v7 = vpop.xlane.xlu1 %2434 }
 0x384   : > { %v3652_v11 = vmul.f32 %v7714_v9, %v3584_v48  ;;  %v2819_v2 = vmul.f32 %v2732_v22, %v6359_v59  ;;  %v2514_v4 = vmul.f32 %v6359_v59, %v2435_v7 }
 0x385   : > { %v3291_v29 = vsub.f32 1.5, %v3290_v63 }
 0x386   : > { %v3720_v26 = vadd.f32 %v7725_v55, %v3652_v11  ;;  %v2883_v62 = vadd.f32 1e-05, %v2819_v2  ;;  %v4735_v35 = vpop.eup %4734  ;;  %v7957_v58 = vsub.f32 %v7757_v31, %v2514_v4 }
 0x387   : > { %v3292_v43 = vmul.f32 %v4733_v61, %v3291_v29  ;;  %v3298_v23 = vmul.f32 %v4735_v35, %v2882_v49  ;;  %vm3304_vm10 = vweird.f32 %v4735_v35 }
 0x388   : > { %v4238_v1 = vpack.c.bf16 %v3720_v26, %v3719_v32  ;;  %4736 = vrsqrt.f32 %v2883_v62  ;;  %v2642_v12 = vmul.f32 %v7957_v58, %v7957_v58  ;;  %vm3305_vm12 = vmor %vm3303_vm11, %vm3304_vm10  ;;  %vm3313_vm0 = vweird.f32 %v2883_v62 }
 0x389   : > { %v3299_v19 = vmul.f32 %v4735_v35, %v3298_v23  ;;  %v3296_v47 = vsel %vm3295_vm6, %v4733_v61, %v3292_v43 }
 0x38a   : > { %4322 = vst [vmem:[%s7352_s16 + $0x90] sm:$0xff] %v4238_v1   ;;  %2761 = vadd.xlane.f32.xlu2 %v2642_v12  ;;  %v3585_v41 = vmul.f32 %v3296_v47, %v7702_v17 }
 0x38b   : > { %v2437_v40 = vpop.xlane.xlu2 %2436  ;;  %v2734_v54 = vpop.xlane.xlu0 %2733  ;;  %v3300_v25 = vmul.f32 0.5, %v3299_v19 }
 0x38c   : > { %v2515_v24 = vmul.f32 %v6359_v59, %v2437_v40  ;;  %v2820_v14 = vmul.f32 %v2734_v54, %v6359_v59  ;;  %v3653_v63 = vmul.f32 %v7714_v9, %v3585_v41 }
 0x38d   : > { %v3301_v15 = vsub.f32 1.5, %v3300_v25 }
 0x38e   : > { %v4737_v28 = vpop.eup %4736  ;;  %v7965_v31 = vsub.f32 %v7771_v51, %v2515_v24  ;;  %v2884_v34 = vadd.f32 1e-05, %v2820_v14  ;;  %v3721_v1 = vadd.f32 %v7725_v55, %v3653_v63 }
 0x38f   : > { %v3308_v10 = vmul.f32 %v4737_v28, %v2883_v62  ;;  %v3302_v61 = vmul.f32 %v4735_v35, %v3301_v15  ;;  %vm3314_vm13 = vweird.f32 %v4737_v28 }
 0x390   : > { %v2643_v16 = vmul.f32 %v7965_v31, %v7965_v31  ;;  %4738 = vrsqrt.f32 %v2884_v34  ;;  %vm3315_vm14 = vmor %vm3313_vm0, %vm3314_vm13  ;;  %vm3323_vm3 = vweird.f32 %v2884_v34 }
 0x391   : > { %v3309_v33 = vmul.f32 %v4737_v28, %v3308_v10  ;;  %v3306_v56 = vsel %vm3305_vm12, %v4735_v35, %v3302_v61 }
 0x392   : > { %2763 = vadd.xlane.f32.xlu0 %v2643_v16  ;;  %v3586_v17 = vmul.f32 %v3306_v56, %v7733_v38 }
 0x393   : > { %v2736_v0 = vpop.xlane.xlu1 %2735  ;;  %v3310_v48 = vmul.f32 0.5, %v3309_v33  ;;  %v2439_v22 = vpop.xlane.xlu0 %2438 }
 0x394   : > { %v2821_v51 = vmul.f32 %v2736_v0, %v6359_v59  ;;  %v2516_v29 = vmul.f32 %v6359_v59, %v2439_v22  ;;  %v3654_v49 = vmul.f32 %v7714_v9, %v3586_v17 }
 0x395   : > { %v3311_v11 = vsub.f32 1.5, %v3310_v48 }
 0x396   : > { %v7973_v2 = vadd.f32 1e-05, %v2821_v51  ;;  %v4739_v32 = vpop.eup %4738  ;;  %v7979_v4 = vsub.f32 %v7787_v27, %v2516_v29  ;;  %v3722_v38 = vadd.f32 %v7725_v55, %v3654_v49  ;;  %v2521_v29 = vmul.f32 %v6359_v59, %v7575_v5 }
 0x397   : > { %v3312_v26 = vmul.f32 %v4737_v28, %v3311_v11  ;;  %v3318_v7 = vmul.f32 %v4739_v32, %v2884_v34  ;;  %vm3324_vm15 = vweird.f32 %v4739_v32 }
 0x398   : > { %4740 = vrsqrt.f32 %v7973_v2  ;;  %v2644_v43 = vmul.f32 %v7979_v4, %v7979_v4  ;;  %v4243_v23 = vpack.c.bf16 %v3722_v38, %v3721_v1  ;;  %vm3325_vm1 = vmor %vm3323_vm3, %vm3324_vm15  ;;  %vm3333_vm4 = vweird.f32 %v7973_v2 }
 0x399   : > { %v3319_v35 = vmul.f32 %v4739_v32, %v3318_v7  ;;  %v3316_v19 = vsel %vm3315_vm14, %v4737_v28, %v3312_v26 }
 0x39a   : > { %2765 = vadd.xlane.f32.xlu1 %v2644_v43  ;;  %4323 = vst [vmem:[%s7352_s16 + $0x98] sm:$0xff] %v4243_v23   ;;  %v3587_v25 = vmul.f32 %v3316_v19, %v7747_v13  ;;  %v8494_v43 = vld [vmem:[#allocation8_spill] sm:$0xff] }
 0x39b   : > { %v2738_v12 = vpop.xlane.xlu2 %2737  ;;  %v2441_v40 = vpop.xlane.xlu1 %2440  ;;  %v3320_v24 = vmul.f32 0.5, %v3319_v35  ;;  %v8016_v23 = vsub.f32 %v8494_v43, %v2521_v29 }
 0x39c   : > { %v2822_v27 = vmul.f32 %v2738_v12, %v6359_v59  ;;  %v2517_v54 = vmul.f32 %v6359_v59, %v2441_v40  ;;  %v3655_v51 = vmul.f32 %v7714_v9, %v3587_v25 }
 0x39d   : > { %v3321_v14 = vsub.f32 1.5, %v3320_v24 }
 0x39e   : > { %v4741_v47 = vpop.eup %4740  ;;  %v2886_v10 = vadd.f32 1e-05, %v2822_v27  ;;  %v7991_v41 = vsub.f32 %v7805_v50, %v2517_v54 }
 0x39f   : > { %v3328_v62 = vmul.f32 %v4741_v47, %v7973_v2  ;;  %v3322_v15 = vmul.f32 %v4739_v32, %v3321_v14  ;;  %vm3334_vm2 = vweird.f32 %v4741_v47  ;;  %v2522_v2 = vmul.f32 %v6359_v59, %v7578_v6 }
 0x3a0   : > { %4742 = vrsqrt.f32 %v2886_v10  ;;  %v2645_v16 = vmul.f32 %v7991_v41, %v7991_v41  ;;  %vm3335_vm5 = vmor %vm3333_vm4, %vm3334_vm2  ;;  %vm3343_vm8 = vweird.f32 %v2886_v10 }
 0x3a1   : > { %v3329_v28 = vmul.f32 %v4741_v47, %v3328_v62  ;;  %v3326_v61 = vsel %vm3325_vm1, %v4739_v32, %v3322_v15 }
 0x3a2   : > { %v3588_v13 = vmul.f32 %v3326_v61, %v7767_v3  ;;  %2767 = vadd.xlane.f32.xlu2 %v2645_v16  ;;  %v3723_v3 = vadd.f32 %v7725_v55, %v3655_v51 }
 0x3a3   : > { %v2740_v33 = vpop.xlane.xlu0 %2739  ;;  %v3330_v0 = vmul.f32 0.5, %v3329_v28  ;;  %v2443_v50 = vpop.xlane.xlu2 %2442  ;;  %v8495_v28 = vld [vmem:[#allocation7_spill] sm:$0xff] }
 0x3a4   : > { %v2823_v48 = vmul.f32 %v2740_v33, %v6359_v59  ;;  %v2518_v34 = vmul.f32 %v6359_v59, %v2443_v50  ;;  %v3656_v22 = vmul.f32 %v7714_v9, %v3588_v13  ;;  %v8031_v16 = vsub.f32 %v8495_v28, %v2522_v2 }
 0x3a5   : > { %v3331_v63 = vsub.f32 1.5, %v3330_v0 }
 0x3a6   : > { %v7999_v56 = vadd.f32 1e-05, %v2823_v48  ;;  %v8003_v17 = vsub.f32 %v7829_v30, %v2518_v34  ;;  %v4743_v11 = vpop.eup %4742  ;;  %v3724_v32 = vadd.f32 %v7725_v55, %v3656_v22 }
 0x3a7   : > { %v3332_v49 = vmul.f32 %v4741_v47, %v3331_v63  ;;  %v3338_v26 = vmul.f32 %v4743_v11, %v2886_v10  ;;  %vm3344_vm7 = vweird.f32 %v4743_v11 }
 0x3a8   : > { %4744 = vrsqrt.f32 %v7999_v56  ;;  %v2646_v9 = vmul.f32 %v8003_v17, %v8003_v17  ;;  %v4248_v7 = vpack.c.bf16 %v3724_v32, %v3723_v3  ;;  %vm3345_vm9 = vmor %vm3343_vm8, %vm3344_vm7  ;;  %vm3353_vm10 = vweird.f32 %v7999_v56 }
 0x3a9   : > { %v3339_v38 = vmul.f32 %v4743_v11, %v3338_v26  ;;  %v3336_v12 = vsel %vm3335_vm5, %v4741_v47, %v3332_v49 }
 0x3aa   : > { %2769 = vadd.xlane.f32.xlu0 %v2646_v9  ;;  %4324 = vst [vmem:[%s7352_s16 + $0xa0] sm:$0xff] %v4248_v7   ;;  %v3589_v62 = vmul.f32 %v3336_v12, %v7780_v46  ;;  %v8037_v46 = vld [vmem:[%s8214_s5] ss:$0 sm:$0xff] }
 0x3ab   : > { %v2742_v30 = vpop.xlane.xlu1 %2741  ;;  %v2445_v1 = vpop.xlane.xlu0 %2444  ;;  %v3340_v40 = vmul.f32 0.5, %v3339_v38 }
 0x3ac   : > { %v2824_v5 = vmul.f32 %v2742_v30, %v6359_v59  ;;  %v2519_v35 = vmul.f32 %v6359_v59, %v2445_v1  ;;  %v3657_v10 = vmul.f32 %v8037_v46, %v3589_v62 }
 0x3ad   : > { %v3341_v54 = vsub.f32 1.5, %v3340_v40 }
 0x3ae   : > { %v4745_v55 = vpop.eup %4744  ;;  %v2888_v19 = vadd.f32 1e-05, %v2824_v5  ;;  %v8020_v24 = vsub.f32 %v7840_v52, %v2519_v35  ;;  %v2649_v52 = vmul.f32 %v8016_v23, %v8016_v23 }
 0x3af   : > { %v3348_v27 = vmul.f32 %v4745_v55, %v7999_v56  ;;  %v3342_v47 = vmul.f32 %v4743_v11, %v3341_v54  ;;  %vm3354_vm6 = vweird.f32 %v4745_v55 }
 0x3b0   : > { %4746 = vrsqrt.f32 %v2888_v19  ;;  %v2647_v14 = vmul.f32 %v8020_v24, %v8020_v24  ;;  %vm3355_vm11 = vmor %vm3353_vm10, %vm3354_vm6  ;;  %vm3363_vm13 = vweird.f32 %v2888_v19 }
 0x3b1   : > { %v3349_v25 = vmul.f32 %v4745_v55, %v3348_v27  ;;  %v3346_v33 = vsel %vm3345_vm9, %v4743_v11, %v3342_v47  ;;  %v2650_v11 = vmul.f32 %v8031_v16, %v8031_v16 }
 0x3b2   : > { %2771 = vadd.xlane.f32.xlu1 %v2647_v14  ;;  %2775 = vadd.xlane.f32.xlu0 %v2649_v52  ;;  %v3590_v0 = vmul.f32 %v3346_v33, %v7797_v37  ;;  %v8052_v37 = vld [vmem:[%s8215_s6] ss:$0 sm:$0xff] }
 0x3b3   : > { %v3350_v15 = vmul.f32 0.5, %v3349_v25  ;;  %v2447_v6 = vpop.xlane.xlu1 %2446 }
 0x3b4   : > { %v2520_v61 = vmul.f32 %v6359_v59, %v2447_v6  ;;  %v3658_v50 = vmul.f32 %v8037_v46, %v3590_v0 }
 0x3b5   : > { %v3351_v48 = vsub.f32 1.5, %v3350_v15 }
 0x3b6   : > { %v4747_v51 = vpop.eup %4746  ;;  %v8042_v13 = vsub.f32 %v7851_v21, %v2520_v61  ;;  %v3725_v21 = vadd.f32 %v8052_v37, %v3657_v10  ;;  %v3726_v29 = vadd.f32 %v8052_v37, %v3658_v50 }
 0x3b7   : > { %v3352_v63 = vmul.f32 %v4745_v55, %v3351_v48  ;;  %v3358_v34 = vmul.f32 %v4747_v51, %v2888_v19  ;;  %vm3364_vm12 = vweird.f32 %v4747_v51 }
 0x3b8   : > { %v2648_v22 = vmul.f32 %v8042_v13, %v8042_v13  ;;  %v4253_v32 = vpack.c.bf16 %v3726_v29, %v3725_v21  ;;  %vm3365_vm0 = vmor %vm3363_vm13, %vm3364_vm12 }
 0x3b9   : > { %v3359_v3 = vmul.f32 %v4747_v51, %v3358_v34  ;;  %v3356_v49 = vsel %vm3355_vm11, %v4745_v55, %v3352_v63 }
 0x3ba   : > { %2773 = vadd.xlane.f32.xlu2 %v2648_v22  ;;  %2777 = vadd.xlane.f32.xlu1 %v2650_v11  ;;  %v2744_v9 = vpop.xlane.xlu2 %2743  ;;  %4325 = vst [vmem:[%s7352_s16 + $0xa8] sm:$0xff] %v4253_v32   ;;  %v3591_v1 = vmul.f32 %v3356_v49, %v7821_v39 }
 0x3bb   : > { %v3360_v26 = vmul.f32 0.5, %v3359_v3  ;;  %v2825_v30 = vmul.f32 %v2744_v9, %v6359_v59 }
 0x3bc   : > { %v3659_v12 = vmul.f32 %v8037_v46, %v3591_v1 }
 0x3bd   : > { %v3361_v7 = vsub.f32 1.5, %v3360_v26  ;;  %v2746_v38 = vpop.xlane.xlu0 %2745  ;;  %v2889_v35 = vadd.f32 1e-05, %v2825_v30 }
 0x3be   : > { %v2826_v56 = vmul.f32 %v2746_v38, %v6359_v59  ;;  %v3727_v19 = vadd.f32 %v8052_v37, %v3659_v12 }
 0x3bf   : > { %v3362_v5 = vmul.f32 %v4747_v51, %v3361_v7  ;;  %4748 = vrsqrt.f32 %v2889_v35  ;;  %vm3373_vm15 = vweird.f32 %v2889_v35 }
 0x3c0   : > { %v2890_v55 = vadd.f32 1e-05, %v2826_v56 }
 0x3c1   : > { %v3366_v43 = vsel %vm3365_vm0, %v4747_v51, %v3362_v5 }
 0x3c2   : > { %v3592_v40 = vmul.f32 %v3366_v43, %v7837_v18  ;;  %4750 = vrsqrt.f32 %v2890_v55  ;;  %vm3383_vm2 = vweird.f32 %v2890_v55 }
 0x3c4   : > { %v3660_v2 = vmul.f32 %v8037_v46, %v3592_v40 }
 0x3c5   : > { %v2748_v27 = vpop.xlane.xlu1 %2747  ;;  %v4749_v14 = vpop.eup %4748 }
 0x3c6   : > { %v2827_v39 = vmul.f32 %v2748_v27, %v6359_v59  ;;  %v3728_v54 = vadd.f32 %v8052_v37, %v3660_v2  ;;  %v3368_v47 = vmul.f32 %v4749_v14, %v2889_v35  ;;  %vm3374_vm14 = vweird.f32 %v4749_v14 }
 0x3c7   : > { %vm3375_vm1 = vmor %vm3373_vm15, %vm3374_vm14 }
 0x3c8   : > { %v2891_v62 = vadd.f32 1e-05, %v2827_v39  ;;  %v4258_v25 = vpack.c.bf16 %v3728_v54, %v3727_v19  ;;  %v4751_v52 = vpop.eup %4750  ;;  %v3369_v15 = vmul.f32 %v4749_v14, %v3368_v47 }
 0x3c9   : > { %v3378_v6 = vmul.f32 %v4751_v52, %v2890_v55  ;;  %vm3384_vm3 = vweird.f32 %v4751_v52 }
 0x3ca   : > { %4752 = vrsqrt.f32 %v2891_v62  ;;  %4326 = vst [vmem:[%s7352_s16 + $0xb0] sm:$0xff] %v4258_v25   ;;  %v3370_v18 = vmul.f32 0.5, %v3369_v15  ;;  %vm3385_vm4 = vmor %vm3383_vm2, %vm3384_vm3  ;;  %vm3393_vm7 = vweird.f32 %v2891_v62 }
 0x3cb   : > { %v3379_v28 = vmul.f32 %v4751_v52, %v3378_v6 }
 0x3cc   : > { %v3371_v10 = vsub.f32 1.5, %v3370_v18 }
 0x3cd   : > { %v2750_v33 = vpop.xlane.xlu2 %2749  ;;  %v3380_v0 = vmul.f32 0.5, %v3379_v28 }
 0x3ce   : > { %v2828_v61 = vmul.f32 %v2750_v33, %v6359_v59  ;;  %v3372_v50 = vmul.f32 %v4749_v14, %v3371_v10 }
 0x3cf   : > { %v3381_v63 = vsub.f32 1.5, %v3380_v0 }
 0x3d0   : > { %v4753_v48 = vpop.eup %4752  ;;  %v2892_v51 = vadd.f32 1e-05, %v2828_v61  ;;  %v3376_v22 = vsel %vm3375_vm1, %v4749_v14, %v3372_v50 }
 0x3d1   : > { %v3388_v34 = vmul.f32 %v4753_v48, %v2891_v62  ;;  %v3382_v11 = vmul.f32 %v4751_v52, %v3381_v63  ;;  %v3593_v29 = vmul.f32 %v3376_v22, %v7862_v42  ;;  %vm3394_vm5 = vweird.f32 %v4753_v48 }
 0x3d2   : > { %4754 = vrsqrt.f32 %v2892_v51  ;;  %vm3395_vm8 = vmor %vm3393_vm7, %vm3394_vm5  ;;  %vm3403_vm6 = vweird.f32 %v2892_v51 }
 0x3d3   : > { %v3389_v21 = vmul.f32 %v4753_v48, %v3388_v34  ;;  %v3386_v3 = vsel %vm3385_vm4, %v4751_v52, %v3382_v11  ;;  %v3661_v26 = vmul.f32 %v8037_v46, %v3593_v29 }
 0x3d4   : > { %v3594_v9 = vmul.f32 %v3386_v3, %v7868_v8 }
 0x3d5   : > { %v3390_v32 = vmul.f32 0.5, %v3389_v21  ;;  %v2752_v49 = vpop.xlane.xlu0 %2751  ;;  %v3729_v42 = vadd.f32 %v8052_v37, %v3661_v26 }
 0x3d6   : > { %v2829_v7 = vmul.f32 %v2752_v49, %v6359_v59  ;;  %v3662_v38 = vmul.f32 %v8037_v46, %v3594_v9 }
 0x3d7   : > { %v3391_v30 = vsub.f32 1.5, %v3390_v32 }
 0x3d8   : > { %v4755_v1 = vpop.eup %4754  ;;  %v2893_v5 = vadd.f32 1e-05, %v2829_v7  ;;  %v3730_v43 = vadd.f32 %v8052_v37, %v3662_v38 }
 0x3d9   : > { %v3392_v35 = vmul.f32 %v4753_v48, %v3391_v30  ;;  %v3398_v56 = vmul.f32 %v4755_v1, %v2892_v51  ;;  %vm3404_vm9 = vweird.f32 %v4755_v1 }
 0x3da   : > { %4756 = vrsqrt.f32 %v2893_v5  ;;  %v4263_v12 = vpack.c.bf16 %v3730_v43, %v3729_v42  ;;  %vm3405_vm10 = vmor %vm3403_vm6, %vm3404_vm9  ;;  %vm3413_vm12 = vweird.f32 %v2893_v5 }
 0x3db   : > { %v3399_v55 = vmul.f32 %v4755_v1, %v3398_v56  ;;  %v3396_v8 = vsel %vm3395_vm8, %v4753_v48, %v3392_v35 }
 0x3dc   : > { %4327 = vst [vmem:[%s7352_s16 + $0xb8] sm:$0xff] %v4263_v12   ;;  %v3595_v39 = vmul.f32 %v3396_v8, %v7879_v60 }
 0x3dd   : > { %v3400_v40 = vmul.f32 0.5, %v3399_v55  ;;  %v2754_v14 = vpop.xlane.xlu1 %2753 }
 0x3de   : > { %v2830_v25 = vmul.f32 %v2754_v14, %v6359_v59  ;;  %v3663_v52 = vmul.f32 %v8037_v46, %v3595_v39 }
 0x3df   : > { %v3401_v2 = vsub.f32 1.5, %v3400_v40 }
 0x3e0   : > { %v4757_v27 = vpop.eup %4756  ;;  %v2894_v6 = vadd.f32 1e-05, %v2830_v25  ;;  %v3731_v61 = vadd.f32 %v8052_v37, %v3663_v52 }
 0x3e1   : > { %v3402_v19 = vmul.f32 %v4755_v1, %v3401_v2  ;;  %v3408_v54 = vmul.f32 %v4757_v27, %v2893_v5  ;;  %vm3414_vm11 = vweird.f32 %v4757_v27 }
 0x3e2   : > { %4758 = vrsqrt.f32 %v2894_v6  ;;  %vm3415_vm13 = vmor %vm3413_vm12, %vm3414_vm11  ;;  %vm3423_vm14 = vweird.f32 %v2894_v6 }
 0x3e3   : > { %v3406_v47 = vsel %vm3405_vm10, %v4755_v1, %v3402_v19  ;;  %v3409_v62 = vmul.f32 %v4757_v27, %v3408_v54 }
 0x3e4   : > { %v3596_v15 = vmul.f32 %v3406_v47, %v7891_v45 }
 0x3e5   : > { %v3410_v18 = vmul.f32 0.5, %v3409_v62  ;;  %v2756_v33 = vpop.xlane.xlu2 %2755 }
 0x3e6   : > { %v3664_v28 = vmul.f32 %v8037_v46, %v3596_v15  ;;  %v2831_v0 = vmul.f32 %v2756_v33, %v6359_v59 }
 0x3e7   : > { %v3411_v60 = vsub.f32 1.5, %v3410_v18 }
 0x3e8   : > { %v3732_v10 = vadd.f32 %v8052_v37, %v3664_v28  ;;  %v2895_v51 = vadd.f32 1e-05, %v2831_v0  ;;  %v4759_v63 = vpop.eup %4758 }
 0x3e9   : > { %v3412_v50 = vmul.f32 %v4757_v27, %v3411_v60  ;;  %v3418_v45 = vmul.f32 %v4759_v63, %v2894_v6  ;;  %vm3424_vm0 = vweird.f32 %v4759_v63 }
 0x3ea   : > { %v4268_v48 = vpack.c.bf16 %v3732_v10, %v3731_v61  ;;  %4760 = vrsqrt.f32 %v2895_v51  ;;  %vm3425_vm15 = vmor %vm3423_vm14, %vm3424_vm0  ;;  %vm3433_vm1 = vweird.f32 %v2895_v51 }
 0x3eb   : > { %v3416_v34 = vsel %vm3415_vm13, %v4757_v27, %v3412_v50  ;;  %v3419_v22 = vmul.f32 %v4759_v63, %v3418_v45 }
 0x3ec   : > { %4328 = vst [vmem:[%s7352_s16 + $0xc0] sm:$0xff] %v4268_v48   ;;  %v3597_v32 = vmul.f32 %v3416_v34, %v7902_v53 }
 0x3ed   : > { %v2758_v11 = vpop.xlane.xlu0 %2757  ;;  %v3420_v21 = vmul.f32 0.5, %v3419_v22 }
 0x3ee   : > { %v2832_v29 = vmul.f32 %v2758_v11, %v6359_v59  ;;  %v3665_v1 = vmul.f32 %v8037_v46, %v3597_v32 }
 0x3ef   : > { %v3421_v49 = vsub.f32 1.5, %v3420_v21 }
 0x3f0   : > { %v4761_v3 = vpop.eup %4760  ;;  %v2896_v9 = vadd.f32 1e-05, %v2832_v29  ;;  %v3733_v55 = vadd.f32 %v8052_v37, %v3665_v1 }
 0x3f1   : > { %v3428_v26 = vmul.f32 %v4761_v3, %v2895_v51  ;;  %v3422_v7 = vmul.f32 %v4759_v63, %v3421_v49  ;;  %vm3434_vm3 = vweird.f32 %v4761_v3 }
 0x3f2   : > { %4762 = vrsqrt.f32 %v2896_v9  ;;  %vm3435_vm2 = vmor %vm3433_vm1, %vm3434_vm3  ;;  %vm3443_vm5 = vweird.f32 %v2896_v9 }
 0x3f3   : > { %v3429_v30 = vmul.f32 %v4761_v3, %v3428_v26  ;;  %v3426_v38 = vsel %vm3425_vm15, %v4759_v63, %v3422_v7 }
 0x3f4   : > { %v3598_v35 = vmul.f32 %v3426_v38, %v7916_v20 }
 0x3f5   : > { %v3430_v5 = vmul.f32 0.5, %v3429_v30  ;;  %v2760_v53 = vpop.xlane.xlu1 %2759 }
 0x3f6   : > { %v3666_v42 = vmul.f32 %v8037_v46, %v3598_v35  ;;  %v2833_v12 = vmul.f32 %v2760_v53, %v6359_v59 }
 0x3f7   : > { %v3431_v56 = vsub.f32 1.5, %v3430_v5 }
 0x3f8   : > { %v4763_v43 = vpop.eup %4762  ;;  %v3734_v8 = vadd.f32 %v8052_v37, %v3666_v42  ;;  %v2897_v27 = vadd.f32 1e-05, %v2833_v12 }
 0x3f9   : > { %v3432_v40 = vmul.f32 %v4761_v3, %v3431_v56  ;;  %v3438_v2 = vmul.f32 %v4763_v43, %v2896_v9  ;;  %vm3444_vm4 = vweird.f32 %v4763_v43 }
 0x3fa   : > { %v4273_v39 = vpack.c.bf16 %v3734_v8, %v3733_v55  ;;  %4764 = vrsqrt.f32 %v2897_v27  ;;  %vm3445_vm7 = vmor %vm3443_vm5, %vm3444_vm4  ;;  %vm3453_vm9 = vweird.f32 %v2897_v27 }
 0x3fb   : > { %v3439_v19 = vmul.f32 %v4763_v43, %v3438_v2  ;;  %v3436_v20 = vsel %vm3435_vm2, %v4761_v3, %v3432_v40 }
 0x3fc   : > { %4329 = vst [vmem:[%s7352_s16 + $0xc8] sm:$0xff] %v4273_v39   ;;  %v3599_v25 = vmul.f32 %v3436_v20, %v7924_v57 }
 0x3fd   : > { %v3440_v54 = vmul.f32 0.5, %v3439_v19  ;;  %v2762_v47 = vpop.xlane.xlu2 %2761 }
 0x3fe   : > { %v2834_v52 = vmul.f32 %v2762_v47, %v6359_v59  ;;  %v3667_v60 = vmul.f32 %v8037_v46, %v3599_v25 }
 0x3ff   : > { %v3441_v14 = vsub.f32 1.5, %v3440_v54 }
 0x400   : > { %v4765_v15 = vpop.eup %4764  ;;  %v2898_v28 = vadd.f32 1e-05, %v2834_v52  ;;  %v3735_v51 = vadd.f32 %v8052_v37, %v3667_v60 }
 0x401   : > { %v3442_v62 = vmul.f32 %v4763_v43, %v3441_v14  ;;  %v3448_v18 = vmul.f32 %v4765_v15, %v2897_v27  ;;  %vm3454_vm8 = vweird.f32 %v4765_v15 }
 0x402   : > { %4766 = vrsqrt.f32 %v2898_v28  ;;  %vm3455_vm6 = vmor %vm3453_vm9, %vm3454_vm8  ;;  %vm3463_vm11 = vweird.f32 %v2898_v28 }
 0x403   : > { %v3446_v6 = vsel %vm3445_vm7, %v4763_v43, %v3442_v62  ;;  %v3449_v61 = vmul.f32 %v4765_v15, %v3448_v18 }
 0x404   : > { %v3600_v33 = vmul.f32 %v3446_v6, %v7935_v44 }
 0x405   : > { %v2764_v10 = vpop.xlane.xlu0 %2763  ;;  %v3450_v48 = vmul.f32 0.5, %v3449_v61 }
 0x406   : > { %v3668_v57 = vmul.f32 %v8037_v46, %v3600_v33  ;;  %v2835_v0 = vmul.f32 %v2764_v10, %v6359_v59 }
 0x407   : > { %v3451_v45 = vsub.f32 1.5, %v3450_v48 }
 0x408   : > { %v3736_v50 = vadd.f32 %v8052_v37, %v3668_v57  ;;  %v2899_v63 = vadd.f32 1e-05, %v2835_v0  ;;  %v4767_v22 = vpop.eup %4766 }
 0x409   : > { %v3452_v11 = vmul.f32 %v4765_v15, %v3451_v45  ;;  %v3458_v44 = vmul.f32 %v4767_v22, %v2898_v28  ;;  %vm3464_vm10 = vweird.f32 %v4767_v22 }
 0x40a   : > { %v4278_v34 = vpack.c.bf16 %v3736_v50, %v3735_v51  ;;  %4768 = vrsqrt.f32 %v2899_v63  ;;  %vm3465_vm12 = vmor %vm3463_vm11, %vm3464_vm10  ;;  %vm3473_vm0 = vweird.f32 %v2899_v63 }
 0x40b   : > { %v3459_v21 = vmul.f32 %v4767_v22, %v3458_v44  ;;  %v3456_v32 = vsel %vm3455_vm6, %v4765_v15, %v3452_v11 }
 0x40c   : > { %4330 = vst [vmem:[%s7352_s16 + $0xd0] sm:$0xff] %v4278_v34   ;;  %v3601_v1 = vmul.f32 %v3456_v32, %v7945_v36 }
 0x40d   : > { %v2766_v29 = vpop.xlane.xlu1 %2765  ;;  %v3460_v49 = vmul.f32 0.5, %v3459_v21 }
 0x40e   : > { %v2836_v26 = vmul.f32 %v2766_v29, %v6359_v59  ;;  %v3669_v53 = vmul.f32 %v8037_v46, %v3601_v1 }
 0x40f   : > { %v3461_v7 = vsub.f32 1.5, %v3460_v49 }
 0x410   : > { %v4769_v3 = vpop.eup %4768  ;;  %v2900_v30 = vadd.f32 1e-05, %v2836_v26  ;;  %v3737_v2 = vadd.f32 %v8052_v37, %v3669_v53 }
 0x411   : > { %v3468_v9 = vmul.f32 %v4769_v3, %v2899_v63  ;;  %v3462_v5 = vmul.f32 %v4767_v22, %v3461_v7  ;;  %vm3474_vm13 = vweird.f32 %v4769_v3 }
 0x412   : > { %4770 = vrsqrt.f32 %v2900_v30  ;;  %vm3475_vm14 = vmor %vm3473_vm0, %vm3474_vm13  ;;  %vm3483_vm3 = vweird.f32 %v2900_v30 }
 0x413   : > { %v3469_v38 = vmul.f32 %v4769_v3, %v3468_v9  ;;  %v3466_v56 = vsel %vm3465_vm12, %v4767_v22, %v3462_v5 }
 0x414   : > { %v3602_v43 = vmul.f32 %v3466_v56, %v7957_v58 }
 0x415   : > { %v3470_v35 = vmul.f32 0.5, %v3469_v38  ;;  %v2768_v42 = vpop.xlane.xlu2 %2767 }
 0x416   : > { %v2837_v12 = vmul.f32 %v2768_v42, %v6359_v59  ;;  %v3670_v8 = vmul.f32 %v8037_v46, %v3602_v43 }
 0x417   : > { %v3471_v55 = vsub.f32 1.5, %v3470_v35 }
 0x418   : > { %v2901_v40 = vadd.f32 1e-05, %v2837_v12  ;;  %v4771_v36 = vpop.eup %4770  ;;  %v3738_v27 = vadd.f32 %v8052_v37, %v3670_v8 }
 0x419   : > { %v3472_v39 = vmul.f32 %v4769_v3, %v3471_v55  ;;  %v3478_v19 = vmul.f32 %v4771_v36, %v2900_v30  ;;  %vm3484_vm15 = vweird.f32 %v4771_v36 }
 0x41a   : > { %4772 = vrsqrt.f32 %v2901_v40  ;;  %v4283_v20 = vpack.c.bf16 %v3738_v27, %v3737_v2  ;;  %vm3485_vm1 = vmor %vm3483_vm3, %vm3484_vm15  ;;  %vm3493_vm4 = vweird.f32 %v2901_v40 }
 0x41b   : > { %v3479_v54 = vmul.f32 %v4771_v36, %v3478_v19  ;;  %v3476_v25 = vsel %vm3475_vm14, %v4769_v3, %v3472_v39 }
 0x41c   : > { %4331 = vst [vmem:[%s7352_s16 + $0xd8] sm:$0xff] %v4283_v20   ;;  %v3603_v6 = vmul.f32 %v3476_v25, %v7965_v31 }
 0x41d   : > { %v2770_v58 = vpop.xlane.xlu0 %2769  ;;  %v3480_v47 = vmul.f32 0.5, %v3479_v54 }
 0x41e   : > { %v2838_v14 = vmul.f32 %v2770_v58, %v6359_v59  ;;  %v3671_v0 = vmul.f32 %v8037_v46, %v3603_v6 }
 0x41f   : > { %v3481_v52 = vsub.f32 1.5, %v3480_v47 }
 0x420   : > { %v2902_v62 = vadd.f32 1e-05, %v2838_v14  ;;  %v4773_v15 = vpop.eup %4772  ;;  %v3739_v44 = vadd.f32 %v8052_v37, %v3671_v0 }
 0x421   : > { %v3482_v18 = vmul.f32 %v4771_v36, %v3481_v52  ;;  %v3488_v28 = vmul.f32 %v4773_v15, %v2901_v40  ;;  %vm3494_vm2 = vweird.f32 %v4773_v15 }
 0x422   : > { %4774 = vrsqrt.f32 %v2902_v62  ;;  %vm3495_vm5 = vmor %vm3493_vm4, %vm3494_vm2  ;;  %vm3503_vm8 = vweird.f32 %v2902_v62 }
 0x423   : > { %v3486_v61 = vsel %vm3485_vm1, %v4771_v36, %v3482_v18  ;;  %v3489_v10 = vmul.f32 %v4773_v15, %v3488_v28 }
 0x424   : > { %v3604_v48 = vmul.f32 %v3486_v61, %v7979_v4 }
 0x425   : > { %v2772_v60 = vpop.xlane.xlu1 %2771  ;;  %v2776_v57 = vpop.xlane.xlu0 %2775  ;;  %v3490_v63 = vmul.f32 0.5, %v3489_v10 }
 0x426   : > { %v2839_v33 = vmul.f32 %v2772_v60, %v6359_v59  ;;  %v2841_v50 = vmul.f32 %v2776_v57, %v6359_v59  ;;  %v3672_v45 = vmul.f32 %v8037_v46, %v3604_v48 }
 0x427   : > { %v3491_v22 = vsub.f32 1.5, %v3490_v63 }
 0x428   : > { %v2903_v51 = vadd.f32 1e-05, %v2839_v33  ;;  %v4775_v31 = vpop.eup %4774  ;;  %v2905_v34 = vadd.f32 1e-05, %v2841_v50  ;;  %v3740_v21 = vadd.f32 %v8052_v37, %v3672_v45 }
 0x429   : > { %v3498_v11 = vmul.f32 %v4775_v31, %v2902_v62  ;;  %v3492_v29 = vmul.f32 %v4773_v15, %v3491_v22  ;;  %vm3504_vm7 = vweird.f32 %v4775_v31 }
 0x42a   : > { %4776 = vrsqrt.f32 %v2903_v51  ;;  %v4288_v49 = vpack.c.bf16 %v3740_v21, %v3739_v44  ;;  %vm3505_vm9 = vmor %vm3503_vm8, %vm3504_vm7  ;;  %vm3513_vm10 = vweird.f32 %v2903_v51  ;;  %vm3533_vm13 = vweird.f32 %v2905_v34 }
 0x42b   : > { %4778 = vrsqrt.f32 %v2905_v34  ;;  %v3499_v4 = vmul.f32 %v4775_v31, %v3498_v11  ;;  %v3496_v7 = vsel %vm3495_vm5, %v4773_v15, %v3492_v29 }
 0x42c   : > { %4332 = vst [vmem:[%s7352_s16 + $0xe0] sm:$0xff] %v4288_v49   ;;  %v3605_v53 = vmul.f32 %v3496_v7, %v7991_v41 }
 0x42d   : > { %v2774_v3 = vpop.xlane.xlu2 %2773  ;;  %v2778_v32 = vpop.xlane.xlu1 %2777  ;;  %v3500_v30 = vmul.f32 0.5, %v3499_v4 }
 0x42e   : > { %v2840_v26 = vmul.f32 %v2774_v3, %v6359_v59  ;;  %v2842_v9 = vmul.f32 %v2778_v32, %v6359_v59  ;;  %v3673_v36 = vmul.f32 %v8037_v46, %v3605_v53 }
 0x42f   : > { %v3501_v35 = vsub.f32 1.5, %v3500_v30 }
 0x430   : > { %v4777_v1 = vpop.eup %4776  ;;  %v2904_v38 = vadd.f32 1e-05, %v2840_v26  ;;  %v2906_v5 = vadd.f32 1e-05, %v2842_v9  ;;  %v3741_v25 = vadd.f32 %v8052_v37, %v3673_v36 }
 0x431   : > { %v3508_v56 = vmul.f32 %v4777_v1, %v2903_v51  ;;  %v4779_v42 = vpop.eup %4778  ;;  %v3502_v43 = vmul.f32 %v4775_v31, %v3501_v35  ;;  %vm3514_vm6 = vweird.f32 %v4777_v1 }
 0x432   : > { %4780 = vrsqrt.f32 %v2904_v38  ;;  %v3528_v12 = vmul.f32 %v4779_v42, %v2905_v34  ;;  %vm3534_vm11 = vweird.f32 %v4779_v42  ;;  %vm3515_vm12 = vmor %vm3513_vm10, %vm3514_vm6  ;;  %vm3523_vm15 = vweird.f32 %v2904_v38 }
 0x433   : > { %v3509_v55 = vmul.f32 %v4777_v1, %v3508_v56  ;;  %4782 = vrsqrt.f32 %v2906_v5  ;;  %v3506_v59 = vsel %vm3505_vm9, %v4775_v31, %v3502_v43  ;;  %vm3535_vm0 = vmor %vm3533_vm13, %vm3534_vm11  ;;  %vm3543_vm2 = vweird.f32 %v2906_v5 }
 0x434   : > { %v3529_v40 = vmul.f32 %v4779_v42, %v3528_v12  ;;  %v3606_v2 = vmul.f32 %v3506_v59, %v8003_v17 }
 0x435   : > { %v3510_v8 = vmul.f32 0.5, %v3509_v55 }
 0x436   : > { %v3530_v39 = vmul.f32 0.5, %v3529_v40  ;;  %v3674_v20 = vmul.f32 %v8037_v46, %v3606_v2 }
 0x437   : > { %v3511_v27 = vsub.f32 1.5, %v3510_v8 }
 0x438   : > { %v4781_v19 = vpop.eup %4780  ;;  %v3531_v54 = vsub.f32 1.5, %v3530_v39  ;;  %v3742_v47 = vadd.f32 %v8052_v37, %v3674_v20 }
 0x439   : > { %v3512_v41 = vmul.f32 %v4777_v1, %v3511_v27  ;;  %v3518_v58 = vmul.f32 %v4781_v19, %v2904_v38  ;;  %v4783_v14 = vpop.eup %4782  ;;  %vm3524_vm14 = vweird.f32 %v4781_v19 }
 0x43a   : > { %v3532_v62 = vmul.f32 %v4779_v42, %v3531_v54  ;;  %v3538_v17 = vmul.f32 %v4783_v14, %v2906_v5  ;;  %v4293_v15 = vpack.c.bf16 %v3742_v47, %v3741_v25  ;;  %vm3544_vm3 = vweird.f32 %v4783_v14  ;;  %vm3525_vm1 = vmor %vm3523_vm15, %vm3524_vm14 }
 0x43b   : > { %v3519_v52 = vmul.f32 %v4781_v19, %v3518_v58  ;;  %v3516_v6 = vsel %vm3515_vm12, %v4777_v1, %v3512_v41  ;;  %vm3545_vm4 = vmor %vm3543_vm2, %vm3544_vm3 }
 0x43c   : > { %v3539_v28 = vmul.f32 %v4783_v14, %v3538_v17  ;;  %4333 = vst [vmem:[%s7352_s16 + $0xe8] sm:$0xff] %v4293_v15   ;;  %v3536_v60 = vsel %vm3535_vm0, %v4779_v42, %v3532_v62  ;;  %v3607_v10 = vmul.f32 %v3516_v6, %v8020_v24 }
 0x43d   : > { %v3520_v18 = vmul.f32 0.5, %v3519_v52  ;;  %v3609_v48 = vmul.f32 %v3536_v60, %v8016_v23 }
 0x43e   : > { %v3540_v61 = vmul.f32 0.5, %v3539_v28  ;;  %v3675_v63 = vmul.f32 %v8037_v46, %v3607_v10 }
 0x43f   : > { %v3521_v33 = vsub.f32 1.5, %v3520_v18  ;;  %v3677_v24 = vmul.f32 %v8037_v46, %v3609_v48 }
 0x440   : > { %v3541_v0 = vsub.f32 1.5, %v3540_v61  ;;  %v3743_v23 = vadd.f32 %v8052_v37, %v3675_v63 }
 0x441   : > { %v3522_v57 = vmul.f32 %v4781_v19, %v3521_v33  ;;  %v3745_v21 = vadd.f32 %v8052_v37, %v3677_v24 }
 0x442   : > { %v3542_v50 = vmul.f32 %v4783_v14, %v3541_v0 }
 0x443   : > { %v3526_v51 = vsel %vm3525_vm1, %v4781_v19, %v3522_v57 }
 0x444   : > { %v3608_v31 = vmul.f32 %v3526_v51, %v8042_v13  ;;  %v3546_v45 = vsel %vm3545_vm4, %v4783_v14, %v3542_v50 }
 0x445   : > { %v3610_v22 = vmul.f32 %v3546_v45, %v8031_v16 }
 0x446   : > { %v3676_v34 = vmul.f32 %v8037_v46, %v3608_v31 }
 0x447   : > { %v3678_v44 = vmul.f32 %v8037_v46, %v3610_v22 }
 0x448   : > { %v3744_v11 = vadd.f32 %v8052_v37, %v3676_v34 }
 0x449   : > { %v3746_v4 = vadd.f32 %v8052_v37, %v3678_v44  ;;  %3882 = sbr.rel (!%p4950_p5) target bundleno = 1134 (0x46e), region = 52 }
 0x44a   : > { %v4298_v29 = vpack.c.bf16 %v3744_v11, %v3743_v23 }
 0x44b   : > { %v4303_v13 = vpack.c.bf16 %v3746_v4, %v3745_v21 }
 0x44c   : > { %4334 = vst [vmem:[%s7352_s16 + $0xf0] sm:$0xff] %v4298_v29  }
 0x44d   : > { %4335 = vst [vmem:[%s7352_s16 + $0xf8] sm:$0xff] %v4303_v13  }
 0x44e   : > { %s8503_s17 = smov (!%p3885_p11, %s3884_s17), 64 }
 0x44f   : > { %s4129_s18 = sshll.u32 %s8503_s17, 2 }
 0x450   : > { %s3888_s19 = ssub.s32 256, %s4129_s18 }
 0x451   : > { %s3889_s21 = sshll.u32 %s3888_s19, 4 }
 0x452   : > { %3890 = vsyncadd %s8148_s14, %s3889_s21  ;;  %p8157_p12 = scmp.ne.s32.totalorder %s4129_s18, 0  ;;  %s4144_s11 = sshll.u32 %s4933_s28, 8 }
 0x453   : > { %s3893_s23 = scalar_lea.hbm %s8216_s7, %s4144_s11  ;;  %s3895_s29 = sshll.u32 %s7352_s16, 4  ;;  %s8166_s29 = int_to_ptr.vmem [resolvable:$true] %s3895_s29 }
 0x454   : > { %s3897_s8 = sshll.u32 %s3893_s23, 4  ;;  %s8249_s20 = sshll.u32 %s8503_s17, 6  ;;  %s8168_s8 = int_to_ptr.hbm [resolvable:$true] %s3897_s8 }
 0x455   : > { %s4793_s13 = sshra.s32 %s8166_s29, 4  ;;  %s4795_s18 = sshrl.u32 %s8249_s20, 4  ;;  %s4794_s13 = int_to_ptr.vmem [resolvable:$true] %s4793_s13 }
 0x456   : > { %s4800_s19 = scalar_lea.vmem %s4794_s13, %s4795_s18  ;;  %s4869_s28 = smov [#allocation2]  }
 0x457   : > { %p4801_p13 = scmp.ne.s32.totalorder %s4794_s13, %s4800_s19  ;;  %s4804_s21 = scalar_lea.vmem %s4869_s28, 512 }
 0x458   : > { %p4806_p2 = scmp.lt.s32.totalorder %s4804_s21, %s4800_s19 }
 0x459   : > { %p4802_p0 = pnand %p4801_p13, %p8157_p12 }
 0x45b   : > { %p4803_p1 = pneg %p4802_p0 }
 0x45d   : > { %p4808_p3 = pnand %p4806_p2, %p4803_p1 }
 0x45f   : > { %4811 = shalt.err (!%p4808_p3)
}
 0x460   : > { %s4812_s16 = sshra.s32 %s8168_s8, 4  ;;  %s4823_s23 = scalar_lea.hbm %s8216_s7, 500  ;;  %s4813_s16 = int_to_ptr.hbm [resolvable:$true] %s4812_s16 }
 0x461   : > { %s4819_s11 = scalar_lea.hbm %s4813_s16, %s4795_s18  ;;  %p4824_p8 = scmp.lt.s32.totalorder %s4813_s16, %s8216_s7 }
 0x462   : > { %p4820_p4 = scmp.ne.s32.totalorder %s4813_s16, %s4819_s11  ;;  %p4825_p9 = scmp.lt.s32.totalorder %s4823_s23, %s4819_s11 }
 0x464   : > { %p4821_p5 = pnand %p4820_p4, %p8157_p12  ;;  %p4826_p10 = por %p4825_p9, %p4824_p8 }
 0x466   : > { %p4822_p7 = pneg %p4821_p5 }
 0x468   : > { %p4827_p11 = pnand %p4826_p10, %p4822_p7 }
 0x46a   : > { %4830 = shalt.err (!%p4827_p11)
}
 0x46b   : > { %s4870_s19 = smov 64   ;;  %s4871_s18 = smov 4  }
 0x46c   : > { %s8497_s28 = sshll.u32 %s8503_s17, 6 }
 0x46d   : > { %3903 = dma.vmem_to_hbm [thread:$0]  (%p8157_p12), %s8166_s29, %s8497_s28, %s8168_s8, %s8148_s14, %s4870_s19, %s4870_s19, %s4871_s18  }
 0x46e PF: > { %p4358_p13 = scmp.ge.s32.totalorder %s4866_s27, 2  ;;  %s3912_s20 = sand.u32 1, %s4854_s24  }
 0x46f   : > { %s3913_s21 = scalar_lea.sflag [#allocation3], %s3912_s20 }
 0x470   : > { %p4355_p0 = pnand %p4358_p13, %p4954_p6 }
 0x472   : > { %p4356_p1 = pneg %p4355_p0 }
 0x474   : > { %4849 = dma.done.wait (%p4356_p1), %s3913_s21, 4096  }
 0x475   : > { %4851 = vsyncadd (%p4356_p1), %s3913_s21, 4294963200  ;;  %p17_p2 = scmp.ge.s32.totalorder %s4937_s30, 4   ;;  %s8498_s24 = smov %s4858_s25 }
 0x476   : > { %s8499_s25 = smov %s4862_s26  ;;  %s8500_s26 = smov %s4948_s10 }
 0x477   : > { %s8501_s27 = smov %s4937_s30  ;;  %19 = sbr.rel (!%p17_p2) target bundleno = 3 (0x3), region = 83 }
 0x47c   :  { %3919 = vsyncpa [#allocation3], 1 }
 0x47d   :  { %3921 = vsyncpa [#allocation3 + $0x1], 1 }

</bundles_post_ra>
